<compile_context>
chip_gen: v6e
topology: v6e:2x2x1
jax: 0.10.0
libtpu: 0.0.40
codegen_flags: <defaults>
</compile_context>

<pallas_src>
import functools

import jax
import jax.numpy as jnp
from jax.experimental import pallas as pl
from jax.experimental.pallas import tpu as pltpu

EPS_BN = 1e-5
E_LAMBDA = 1e-4          # SimAM default e_lambda

K1, K2, K3, K4 = 15, 3, 3, 3
FC_OUT = 256
POOL_OUT = 4


# ----------------------------- kernel helpers ------------------------------ #

def _relu(h):
    return jnp.maximum(h, 0.0)


def _simam(h):
    """SimAM over the length axis (torch dim=2 == axis 1 here), single-pass stats."""
    l = h.shape[1]
    inv_n = 1.0 / float(l - 1)
    mu = jnp.mean(h, axis=1, keepdims=True)                      # (blk, 1, C)
    sum_sq = jnp.sum(h * h, axis=1, keepdims=True)               # (blk, 1, C)
    # sum((h-mu)^2) = sum(h^2) - L*mu^2 ; clamp tiny negative from f32 cancellation.
    ssd = jnp.maximum(sum_sq - float(l) * mu * mu, 0.0)
    d = (h - mu) ** 2
    inv = pl.reciprocal(4.0 * (ssd * inv_n + E_LAMBDA), approx=True)   # EUP slot
    return h * jax.nn.sigmoid(d * inv + 0.5)


def _conv_accum(h, w_ref, b_ref):
    """Valid Conv1d (BN folded) as K accumulated 2-D GEMMs.

    h:     (blk, Lin, Cin) f32, channel-last
    w_ref: (K, Cin, Cout)  bf16
    b_ref: (1, Cout)       f32
    ->     (blk, Lout, Cout) f32
    """
    blk, lin, cin = h.shape
    k, _, cout = w_ref.shape
    lout = lin - k + 1
    hb = h.astype(jnp.bfloat16)
    acc = jnp.dot(hb[:, 0:lout, :].reshape(blk * lout, cin), w_ref[0],
                  preferred_element_type=jnp.float32)
    for j in range(1, k):
        acc = acc + jnp.dot(hb[:, j:j + lout, :].reshape(blk * lout, cin), w_ref[j],
                            preferred_element_type=jnp.float32)
    return acc.reshape(blk, lout, cout) + b_ref[...]


# --------------------------------- kernel ---------------------------------- #

def simcnn_kernel(cols1_ref, w1_ref, b1_ref, w2_ref, b2_ref, w3_ref, b3_ref,
                  w4_ref, b4_ref, fcw_ref, fcb_ref, out_ref):
    # layer1: Conv1d(Cin,16,15) [BN folded] + SimAM + ReLU.
    # Input is the host-built im2col patch tensor (blk, L1, K1*Cin) bf16 -> one GEMM.
    cols = cols1_ref[...]
    blk, l1, kc1 = cols.shape
    c1 = w1_ref.shape[-1]
    h = jnp.dot(cols.reshape(blk * l1, kc1), w1_ref[...],
                preferred_element_type=jnp.float32)
    h = h.reshape(blk, l1, c1) + b1_ref[...]
    h = _relu(_simam(h))

    # layer2: Conv1d(16,32,3) [BN folded] + ReLU + MaxPool1d(2,2)
    h = _relu(_conv_accum(h, w2_ref, b2_ref))
    blk, l2, c2 = h.shape
    lp = (l2 // 2) * 2
    h = jnp.max(h[:, :lp, :].reshape(blk, lp // 2, 2, c2), axis=2)

    # layer3: Conv1d(32,64,3) [BN folded] + SimAM + ReLU
    h = _relu(_simam(_conv_accum(h, w3_ref, b3_ref)))

    # layer4: Conv1d(64,128,3) [BN folded] + SimAM + ReLU
    h = _relu(_simam(_conv_accum(h, w4_ref, b4_ref)))
    l4 = h.shape[1]

    # AdaptiveMaxPool1d(4) + flatten + Linear(512,256) fused as ONE 512-deep GEMM:
    # pooled segments are lane-concatenated at 128-lane boundaries; fcw was permuted
    # on the host to the matching p-major row order.
    segs = []
    for p in range(POOL_OUT):
        s = (p * l4) // POOL_OUT
        e = -((-(p + 1) * l4) // POOL_OUT)            # ceil, PyTorch adaptive pooling
        segs.append(jnp.max(h[:, s:e, :], axis=1))    # (blk, 128)
    feat = jnp.concatenate(segs, axis=1).astype(jnp.bfloat16)       # (blk, 512)
    out = fcb_ref[...] + jnp.dot(feat, fcw_ref[...],
                                 preferred_element_type=jnp.float32)

    # layer5 ReLU; Dropout is identity in eval mode.
    # TODO(synk): train-mode Dropout (stochastic mask) not implemented.
    out_ref[...] = _relu(out).astype(out_ref.dtype)


# --------------------------- host-side preparation -------------------------- #

def prepare_params(params):
    """One-time preprocessing: fold BN into conv weights/bias, reorder conv weights
    to (K, Cin, Cout) (layer 1 flattened to (K*Cin, Cout)), permute FC weight to
    p-major row order, cast all matmul operands to bf16."""
    (w1, b1, bn1, w2, b2, bn2, w3, b3, bn3, w4, b4, bn4, fcw, fcb) = params

    def fold(w, b, bn):
        # bn: (4, C) = [gamma, beta, running_mean, running_var] (eval-mode BN)
        gamma, beta, mean, var = bn
        scale = gamma * jax.lax.rsqrt(var + EPS_BN)                    # (Cout,)
        w_f = w.astype(jnp.float32) * scale[:, None, None]             # (Cout, Cin, K)
        b_f = (b.astype(jnp.float32) - mean) * scale + beta            # (Cout,)
        wk = jnp.transpose(w_f, (2, 1, 0)).astype(jnp.bfloat16)        # (K, Cin, Cout)
        return wk, b_f.reshape(1, -1)

    w1k, b1c = fold(w1, b1, bn1)
    w2k, b2c = fold(w2, b2, bn2)
    w3k, b3c = fold(w3, b3, bn3)
    w4k, b4c = fold(w4, b4, bn4)

    k1, cin1, c1 = w1k.shape
    w1m = w1k.reshape(k1 * cin1, c1)     # row index = j*Cin + c, matches host im2col

    # Linear(512,256): torch weight (256, 512), flatten index f = c*4 + p.
    # Kernel feature lane order is g = p*128 + c  ->  permute rows to p-major.
    c4 = w4k.shape[-1]
    fcw_r = jnp.transpose(fcw.astype(jnp.float32), (1, 0))             # (512, 256), row f
    fcw_r = fcw_r.reshape(c4, POOL_OUT, FC_OUT)                        # [c, p, o]
    fcw_r = jnp.transpose(fcw_r, (1, 0, 2)).reshape(c4 * POOL_OUT, FC_OUT)
    fcw_r = fcw_r.astype(jnp.bfloat16)                                 # (512, 256)
    fcb_r = fcb.astype(jnp.float32).reshape(1, FC_OUT)

    return (w1m, b1c, w2k, b2c, w3k, b3c, w4k, b4c, fcw_r, fcb_r)


@functools.partial(jax.jit, static_argnames=("batch_block",))
def simcnn_forward(x, prepped, batch_block=None):
    """x: (B, Cin, L) in PyTorch NCL layout. prepped: output of prepare_params."""
    b, cin, l = x.shape
    lout1 = l - K1 + 1

    # Host-side layer-1 im2col: lane-dense bf16 patches (B, L1, K1*Cin).
    xt = jnp.transpose(x.astype(jnp.float32), (0, 2, 1))               # (B, L, Cin)
    cols = jnp.concatenate([xt[:, j:j + lout1, :] for j in range(K1)], axis=2)
    cols = cols.astype(jnp.bfloat16)                                   # (B, L1, K1*Cin)

    if batch_block is None:
        # >=2 grid steps whenever B>=2 so v7x can shard samples across both
        # TensorCores; cap at 32 samples/block (a few MiB of VMEM -> fits every gen).
        batch_block = min(32, max(1, pl.cdiv(b, 2)))
    blk = batch_block
    nb = pl.cdiv(b, blk)
    bp = nb * blk
    if bp != b:
        cols = jnp.pad(cols, ((0, bp - b), (0, 0), (0, 0)))
    cols = cols.reshape(nb, blk, lout1, K1 * cin)

    args = (cols,) + tuple(prepped)

    def const_spec(a):
        nd = a.ndim
        return pl.BlockSpec(a.shape, lambda i, _nd=nd: (0,) * _nd)     # resident weights

    in_specs = [pl.BlockSpec((None, blk, lout1, K1 * cin), lambda i: (i, 0, 0, 0))]
    in_specs += [const_spec(a) for a in prepped]
    out_specs = pl.BlockSpec((None, blk, FC_OUT), lambda i: (i, 0, 0))

    out = pl.pallas_call(
        simcnn_kernel,
        out_shape=jax.ShapeDtypeStruct((nb, blk, FC_OUT), jnp.float32),
        grid=(nb,),
        in_specs=in_specs,
        out_specs=out_specs,
        compiler_params=pltpu.CompilerParams(
            dimension_semantics=("parallel",),
            vmem_limit_bytes=48 * 1024 * 1024),
    )(*args)

    return out.reshape(bp, FC_OUT)[:b]


# ----------------------------------- demo ----------------------------------- #

if __name__ == "__main__":
    key = jax.random.PRNGKey(0)
    ks = jax.random.split(key, 16)

    B, Cin, L = 2, 1, 128  # L=128 -> 114 -> 112 -> pool 56 -> 54 -> 52 -> adaptive 4

    def conv_params(kw, kb, cout, cin, ksz):
        w = jax.random.normal(kw, (cout, cin, ksz), jnp.float32) * 0.1
        bb = jax.random.normal(kb, (cout,), jnp.float32) * 0.1
        return w, bb

    w1, b1 = conv_params(ks[0], ks[1], 16, 1, 15)
    w2, b2 = conv_params(ks[2], ks[3], 32, 16, 3)
    w3, b3 = conv_params(ks[4], ks[5], 64, 32, 3)
    w4, b4 = conv_params(ks[6], ks[7], 128, 64, 3)
    fcw = jax.random.normal(ks[8], (256, 512), jnp.float32) * 0.05
    fcb = jax.random.normal(ks[9], (256,), jnp.float32) * 0.05

    def bn_params(k, c):
        # eval-mode BatchNorm1d: [gamma, beta, running_mean, running_var]
        kk = jax.random.split(k, 3)
        gamma = 1.0 + 0.1 * jax.random.normal(kk[0], (c,), jnp.float32)
        beta = 0.1 * jax.random.normal(kk[1], (c,), jnp.float32)
        mean = 0.1 * jax.random.normal(kk[2], (c,), jnp.float32)
        var = jnp.ones((c,), jnp.float32) * 0.9
        return jnp.stack([gamma, beta, mean, var], axis=0)

    bn1 = bn_params(ks[10], 16)
    bn2 = bn_params(ks[11], 32)
    bn3 = bn_params(ks[12], 64)
    bn4 = bn_params(ks[13], 128)

    x = jax.random.normal(ks[14], (B, Cin, L), jnp.float32)

    # One-time host-side preprocessing (kept out of the per-call path).
    prepped = prepare_params(
        (w1, b1, bn1, w2, b2, bn2, w3, b3, bn3, w4, b4, bn4, fcw, fcb))
    prepped = jax.tree_util.tree_map(jax.block_until_ready, prepped)

    out = simcnn_forward(x, prepped)
    jax.block_until_ready(out)
    assert out.shape == (B, 256) and out.dtype == jnp.float32
    assert bool(jnp.all(jnp.isfinite(out)))
    print("KERNEL_OK")
</pallas_src>

<mosaic_0001>
module attributes {stable_mosaic.version = 11 : i64} {
  func.func @simcnn_kernel(%arg0: i32, %arg1: memref<1x1x114x15xbf16, #tpu.memory_space<vmem>>, %arg2: memref<15x16xbf16, #tpu.memory_space<vmem>>, %arg3: memref<1x16xf32, #tpu.memory_space<vmem>>, %arg4: memref<3x16x32xbf16, #tpu.memory_space<vmem>>, %arg5: memref<1x32xf32, #tpu.memory_space<vmem>>, %arg6: memref<3x32x64xbf16, #tpu.memory_space<vmem>>, %arg7: memref<1x64xf32, #tpu.memory_space<vmem>>, %arg8: memref<3x64x128xbf16, #tpu.memory_space<vmem>>, %arg9: memref<1x128xf32, #tpu.memory_space<vmem>>, %arg10: memref<512x256xbf16, #tpu.memory_space<vmem>>, %arg11: memref<1x256xf32, #tpu.memory_space<vmem>>, %arg12: memref<1x1x256xf32, #tpu.memory_space<vmem>>) attributes {dimension_semantics = [#tpu.dimension_semantics<parallel>], iteration_bounds = array<i64: 2>, scalar_prefetch = 0 : i64, scratch_operands = 0 : i64, tpu.core_type = #tpu.core_type<tc>, window_params = [{transform_indices = @transform_0, window_bounds = array<i64: 1, 1, 114, 15>}, {pipeline_mode = #tpu.pipeline_mode<synchronous>, transform_indices = @transform_1, window_bounds = array<i64: 15, 16>}, {pipeline_mode = #tpu.pipeline_mode<synchronous>, transform_indices = @transform_2, window_bounds = array<i64: 1, 16>}, {pipeline_mode = #tpu.pipeline_mode<synchronous>, transform_indices = @transform_3, window_bounds = array<i64: 3, 16, 32>}, {pipeline_mode = #tpu.pipeline_mode<synchronous>, transform_indices = @transform_4, window_bounds = array<i64: 1, 32>}, {pipeline_mode = #tpu.pipeline_mode<synchronous>, transform_indices = @transform_5, window_bounds = array<i64: 3, 32, 64>}, {pipeline_mode = #tpu.pipeline_mode<synchronous>, transform_indices = @transform_6, window_bounds = array<i64: 1, 64>}, {pipeline_mode = #tpu.pipeline_mode<synchronous>, transform_indices = @transform_7, window_bounds = array<i64: 3, 64, 128>}, {pipeline_mode = #tpu.pipeline_mode<synchronous>, transform_indices = @transform_8, window_bounds = array<i64: 1, 128>}, {pipeline_mode = #tpu.pipeline_mode<synchronous>, transform_indices = @transform_9, window_bounds = array<i64: 512, 256>}, {pipeline_mode = #tpu.pipeline_mode<synchronous>, transform_indices = @transform_10, window_bounds = array<i64: 1, 256>}, {transform_indices = @transform_11, window_bounds = array<i64: 1, 1, 256>}]} {
    %c0 = arith.constant 0 : index
    %c0_0 = arith.constant 0 : index
    %c0_1 = arith.constant 0 : index
    %c0_2 = arith.constant 0 : index
    %0 = vector.load %arg1[%c0, %c0_0, %c0_1, %c0_2] : memref<1x1x114x15xbf16, #tpu.memory_space<vmem>>, vector<1x1x114x15xbf16>
    %1 = vector.shape_cast %0 : vector<1x1x114x15xbf16> to vector<1x114x15xbf16>
    %2 = vector.shape_cast %1 : vector<1x114x15xbf16> to vector<114x15xbf16>
    %c0_3 = arith.constant 0 : index
    %c0_4 = arith.constant 0 : index
    %3 = vector.load %arg2[%c0_3, %c0_4] : memref<15x16xbf16, #tpu.memory_space<vmem>>, vector<15x16xbf16>
    %cst = arith.constant dense<0.000000e+00> : vector<114x16xf32>
    %4 = tpu.matmul %2, %3, %cst {dimension_numbers = #tpu.dot_dimension_numbers<[1], [0], [0], [1], [0, 0, 1, 1], [], []>} : vector<114x15xbf16>, vector<15x16xbf16>, vector<114x16xf32> -> vector<114x16xf32>
    %5 = vector.shape_cast %4 : vector<114x16xf32> to vector<1x114x16xf32>
    %c0_5 = arith.constant 0 : index
    %c0_6 = arith.constant 0 : index
    %6 = vector.load %arg3[%c0_5, %c0_6] : memref<1x16xf32, #tpu.memory_space<vmem>>, vector<1x16xf32>
    %7 = vector.shape_cast %6 : vector<1x16xf32> to vector<1x1x16xf32>
    %8 = vector.broadcast %7 : vector<1x1x16xf32> to vector<1x114x16xf32>
    %9 = arith.addf %5, %8 : vector<1x114x16xf32>
    %cst_7 = arith.constant dense<0.000000e+00> : vector<1x16xf32>
    %10 = vector.multi_reduction <add>, %9, %cst_7 [1] : vector<1x114x16xf32> to vector<1x16xf32>
    %11 = vector.shape_cast %10 : vector<1x16xf32> to vector<1x1x16xf32>
    %cst_8 = arith.constant 1.140000e+02 : f32
    %12 = vector.broadcast %cst_8 : f32 to vector<1x1x16xf32>
    %13 = arith.divf %11, %12 : vector<1x1x16xf32>
    %14 = arith.mulf %9, %9 : vector<1x114x16xf32>
    %cst_9 = arith.constant dense<0.000000e+00> : vector<1x16xf32>
    %15 = vector.multi_reduction <add>, %14, %cst_9 [1] : vector<1x114x16xf32> to vector<1x16xf32>
    %16 = vector.shape_cast %15 : vector<1x16xf32> to vector<1x1x16xf32>
    %cst_10 = arith.constant 1.140000e+02 : f32
    %17 = vector.broadcast %cst_10 : f32 to vector<1x1x16xf32>
    %18 = arith.mulf %17, %13 : vector<1x1x16xf32>
    %19 = arith.mulf %18, %13 : vector<1x1x16xf32>
    %20 = arith.subf %16, %19 : vector<1x1x16xf32>
    %cst_11 = arith.constant 0.000000e+00 : f32
    %21 = vector.broadcast %cst_11 : f32 to vector<1x1x16xf32>
    %22 = arith.maximumf %20, %21 : vector<1x1x16xf32>
    %23 = vector.broadcast %13 : vector<1x1x16xf32> to vector<1x114x16xf32>
    %24 = arith.subf %9, %23 : vector<1x114x16xf32>
    %25 = arith.mulf %24, %24 : vector<1x114x16xf32>
    %cst_12 = arith.constant 0.00884955748 : f32
    %26 = vector.broadcast %cst_12 : f32 to vector<1x1x16xf32>
    %27 = arith.mulf %22, %26 : vector<1x1x16xf32>
    %cst_13 = arith.constant 9.99999974E-5 : f32
    %28 = vector.broadcast %cst_13 : f32 to vector<1x1x16xf32>
    %29 = arith.addf %27, %28 : vector<1x1x16xf32>
    %cst_14 = arith.constant 4.000000e+00 : f32
    %30 = vector.broadcast %cst_14 : f32 to vector<1x1x16xf32>
    %31 = arith.mulf %30, %29 : vector<1x1x16xf32>
    %32 = tpu.reciprocal %31 {approx = true} : vector<1x1x16xf32> -> vector<1x1x16xf32>
    %33 = vector.broadcast %32 : vector<1x1x16xf32> to vector<1x114x16xf32>
    %34 = arith.mulf %25, %33 : vector<1x114x16xf32>
    %cst_15 = arith.constant 5.000000e-01 : f32
    %35 = vector.broadcast %cst_15 : f32 to vector<1x114x16xf32>
    %36 = arith.addf %34, %35 : vector<1x114x16xf32>
    %37 = arith.negf %36 : vector<1x114x16xf32>
    %38 = math.exp %37 : vector<1x114x16xf32>
    %cst_16 = arith.constant 1.000000e+00 : f32
    %39 = vector.broadcast %cst_16 : f32 to vector<1x114x16xf32>
    %40 = arith.addf %39, %38 : vector<1x114x16xf32>
    %41 = arith.divf %39, %40 : vector<1x114x16xf32>
    %42 = arith.mulf %9, %41 : vector<1x114x16xf32>
    %cst_17 = arith.constant 0.000000e+00 : f32
    %43 = vector.broadcast %cst_17 : f32 to vector<1x114x16xf32>
    %44 = arith.maximumf %42, %43 : vector<1x114x16xf32>
    %45 = arith.truncf %44 : vector<1x114x16xf32> to vector<1x114x16xbf16>
    %46 = vector.extract_strided_slice %45 {offsets = [0, 0, 0], sizes = [1, 112, 16], strides = [1, 1, 1]} : vector<1x114x16xbf16> to vector<1x112x16xbf16>
    %47 = vector.shape_cast %46 : vector<1x112x16xbf16> to vector<112x16xbf16>
    %c0_18 = arith.constant 0 : index
    %c0_19 = arith.constant 0 : index
    %c0_20 = arith.constant 0 : index
    %48 = vector.load %arg4[%c0_18, %c0_19, %c0_20] : memref<3x16x32xbf16, #tpu.memory_space<vmem>>, vector<1x16x32xbf16>
    %49 = vector.shape_cast %48 : vector<1x16x32xbf16> to vector<16x32xbf16>
    %cst_21 = arith.constant dense<0.000000e+00> : vector<112x32xf32>
    %50 = tpu.matmul %47, %49, %cst_21 {dimension_numbers = #tpu.dot_dimension_numbers<[1], [0], [0], [1], [0, 0, 1, 1], [], []>} : vector<112x16xbf16>, vector<16x32xbf16>, vector<112x32xf32> -> vector<112x32xf32>
    %51 = vector.extract_strided_slice %45 {offsets = [0, 1, 0], sizes = [1, 112, 16], strides = [1, 1, 1]} : vector<1x114x16xbf16> to vector<1x112x16xbf16>
    %52 = vector.shape_cast %51 : vector<1x112x16xbf16> to vector<112x16xbf16>
    %c1 = arith.constant 1 : index
    %c0_22 = arith.constant 0 : index
    %c0_23 = arith.constant 0 : index
    %53 = vector.load %arg4[%c1, %c0_22, %c0_23] : memref<3x16x32xbf16, #tpu.memory_space<vmem>>, vector<1x16x32xbf16>
    %54 = vector.shape_cast %53 : vector<1x16x32xbf16> to vector<16x32xbf16>
    %cst_24 = arith.constant dense<0.000000e+00> : vector<112x32xf32>
    %55 = tpu.matmul %52, %54, %cst_24 {dimension_numbers = #tpu.dot_dimension_numbers<[1], [0], [0], [1], [0, 0, 1, 1], [], []>} : vector<112x16xbf16>, vector<16x32xbf16>, vector<112x32xf32> -> vector<112x32xf32>
    %56 = arith.addf %50, %55 : vector<112x32xf32>
    %57 = vector.extract_strided_slice %45 {offsets = [0, 2, 0], sizes = [1, 112, 16], strides = [1, 1, 1]} : vector<1x114x16xbf16> to vector<1x112x16xbf16>
    %58 = vector.shape_cast %57 : vector<1x112x16xbf16> to vector<112x16xbf16>
    %c2 = arith.constant 2 : index
    %c0_25 = arith.constant 0 : index
    %c0_26 = arith.constant 0 : index
    %59 = vector.load %arg4[%c2, %c0_25, %c0_26] : memref<3x16x32xbf16, #tpu.memory_space<vmem>>, vector<1x16x32xbf16>
    %60 = vector.shape_cast %59 : vector<1x16x32xbf16> to vector<16x32xbf16>
    %cst_27 = arith.constant dense<0.000000e+00> : vector<112x32xf32>
    %61 = tpu.matmul %58, %60, %cst_27 {dimension_numbers = #tpu.dot_dimension_numbers<[1], [0], [0], [1], [0, 0, 1, 1], [], []>} : vector<112x16xbf16>, vector<16x32xbf16>, vector<112x32xf32> -> vector<112x32xf32>
    %62 = arith.addf %56, %61 : vector<112x32xf32>
    %63 = vector.shape_cast %62 : vector<112x32xf32> to vector<1x112x32xf32>
    %c0_28 = arith.constant 0 : index
    %c0_29 = arith.constant 0 : index
    %64 = vector.load %arg5[%c0_28, %c0_29] : memref<1x32xf32, #tpu.memory_space<vmem>>, vector<1x32xf32>
    %65 = vector.shape_cast %64 : vector<1x32xf32> to vector<1x1x32xf32>
    %66 = vector.broadcast %65 : vector<1x1x32xf32> to vector<1x112x32xf32>
    %67 = arith.addf %63, %66 : vector<1x112x32xf32>
    %cst_30 = arith.constant 0.000000e+00 : f32
    %68 = vector.broadcast %cst_30 : f32 to vector<1x112x32xf32>
    %69 = arith.maximumf %67, %68 : vector<1x112x32xf32>
    %70 = vector.shape_cast %69 : vector<1x112x32xf32> to vector<1x56x2x32xf32>
    %cst_31 = arith.constant dense<0xFF800000> : vector<1x56x32xf32>
    %71 = vector.multi_reduction <maximumf>, %70, %cst_31 [2] : vector<1x56x2x32xf32> to vector<1x56x32xf32>
    %72 = arith.truncf %71 : vector<1x56x32xf32> to vector<1x56x32xbf16>
    %73 = vector.extract_strided_slice %72 {offsets = [0, 0, 0], sizes = [1, 54, 32], strides = [1, 1, 1]} : vector<1x56x32xbf16> to vector<1x54x32xbf16>
    %74 = vector.shape_cast %73 : vector<1x54x32xbf16> to vector<54x32xbf16>
    %c0_32 = arith.constant 0 : index
    %c0_33 = arith.constant 0 : index
    %c0_34 = arith.constant 0 : index
    %75 = vector.load %arg6[%c0_32, %c0_33, %c0_34] : memref<3x32x64xbf16, #tpu.memory_space<vmem>>, vector<1x32x64xbf16>
    %76 = vector.shape_cast %75 : vector<1x32x64xbf16> to vector<32x64xbf16>
    %cst_35 = arith.constant dense<0.000000e+00> : vector<54x64xf32>
    %77 = tpu.matmul %74, %76, %cst_35 {dimension_numbers = #tpu.dot_dimension_numbers<[1], [0], [0], [1], [0, 0, 1, 1], [], []>} : vector<54x32xbf16>, vector<32x64xbf16>, vector<54x64xf32> -> vector<54x64xf32>
    %78 = vector.extract_strided_slice %72 {offsets = [0, 1, 0], sizes = [1, 54, 32], strides = [1, 1, 1]} : vector<1x56x32xbf16> to vector<1x54x32xbf16>
    %79 = vector.shape_cast %78 : vector<1x54x32xbf16> to vector<54x32xbf16>
    %c1_36 = arith.constant 1 : index
    %c0_37 = arith.constant 0 : index
    %c0_38 = arith.constant 0 : index
    %80 = vector.load %arg6[%c1_36, %c0_37, %c0_38] : memref<3x32x64xbf16, #tpu.memory_space<vmem>>, vector<1x32x64xbf16>
    %81 = vector.shape_cast %80 : vector<1x32x64xbf16> to vector<32x64xbf16>
    %cst_39 = arith.constant dense<0.000000e+00> : vector<54x64xf32>
    %82 = tpu.matmul %79, %81, %cst_39 {dimension_numbers = #tpu.dot_dimension_numbers<[1], [0], [0], [1], [0, 0, 1, 1], [], []>} : vector<54x32xbf16>, vector<32x64xbf16>, vector<54x64xf32> -> vector<54x64xf32>
    %83 = arith.addf %77, %82 : vector<54x64xf32>
    %84 = vector.extract_strided_slice %72 {offsets = [0, 2, 0], sizes = [1, 54, 32], strides = [1, 1, 1]} : vector<1x56x32xbf16> to vector<1x54x32xbf16>
    %85 = vector.shape_cast %84 : vector<1x54x32xbf16> to vector<54x32xbf16>
    %c2_40 = arith.constant 2 : index
    %c0_41 = arith.constant 0 : index
    %c0_42 = arith.constant 0 : index
    %86 = vector.load %arg6[%c2_40, %c0_41, %c0_42] : memref<3x32x64xbf16, #tpu.memory_space<vmem>>, vector<1x32x64xbf16>
    %87 = vector.shape_cast %86 : vector<1x32x64xbf16> to vector<32x64xbf16>
    %cst_43 = arith.constant dense<0.000000e+00> : vector<54x64xf32>
    %88 = tpu.matmul %85, %87, %cst_43 {dimension_numbers = #tpu.dot_dimension_numbers<[1], [0], [0], [1], [0, 0, 1, 1], [], []>} : vector<54x32xbf16>, vector<32x64xbf16>, vector<54x64xf32> -> vector<54x64xf32>
    %89 = arith.addf %83, %88 : vector<54x64xf32>
    %90 = vector.shape_cast %89 : vector<54x64xf32> to vector<1x54x64xf32>
    %c0_44 = arith.constant 0 : index
    %c0_45 = arith.constant 0 : index
    %91 = vector.load %arg7[%c0_44, %c0_45] : memref<1x64xf32, #tpu.memory_space<vmem>>, vector<1x64xf32>
    %92 = vector.shape_cast %91 : vector<1x64xf32> to vector<1x1x64xf32>
    %93 = vector.broadcast %92 : vector<1x1x64xf32> to vector<1x54x64xf32>
    %94 = arith.addf %90, %93 : vector<1x54x64xf32>
    %cst_46 = arith.constant dense<0.000000e+00> : vector<1x64xf32>
    %95 = vector.multi_reduction <add>, %94, %cst_46 [1] : vector<1x54x64xf32> to vector<1x64xf32>
    %96 = vector.shape_cast %95 : vector<1x64xf32> to vector<1x1x64xf32>
    %cst_47 = arith.constant 5.400000e+01 : f32
    %97 = vector.broadcast %cst_47 : f32 to vector<1x1x64xf32>
    %98 = arith.divf %96, %97 : vector<1x1x64xf32>
    %99 = arith.mulf %94, %94 : vector<1x54x64xf32>
    %cst_48 = arith.constant dense<0.000000e+00> : vector<1x64xf32>
    %100 = vector.multi_reduction <add>, %99, %cst_48 [1] : vector<1x54x64xf32> to vector<1x64xf32>
    %101 = vector.shape_cast %100 : vector<1x64xf32> to vector<1x1x64xf32>
    %cst_49 = arith.constant 5.400000e+01 : f32
    %102 = vector.broadcast %cst_49 : f32 to vector<1x1x64xf32>
    %103 = arith.mulf %102, %98 : vector<1x1x64xf32>
    %104 = arith.mulf %103, %98 : vector<1x1x64xf32>
    %105 = arith.subf %101, %104 : vector<1x1x64xf32>
    %cst_50 = arith.constant 0.000000e+00 : f32
    %106 = vector.broadcast %cst_50 : f32 to vector<1x1x64xf32>
    %107 = arith.maximumf %105, %106 : vector<1x1x64xf32>
    %108 = vector.broadcast %98 : vector<1x1x64xf32> to vector<1x54x64xf32>
    %109 = arith.subf %94, %108 : vector<1x54x64xf32>
    %110 = arith.mulf %109, %109 : vector<1x54x64xf32>
    %cst_51 = arith.constant 0.0188679248 : f32
    %111 = vector.broadcast %cst_51 : f32 to vector<1x1x64xf32>
    %112 = arith.mulf %107, %111 : vector<1x1x64xf32>
    %cst_52 = arith.constant 9.99999974E-5 : f32
    %113 = vector.broadcast %cst_52 : f32 to vector<1x1x64xf32>
    %114 = arith.addf %112, %113 : vector<1x1x64xf32>
    %cst_53 = arith.constant 4.000000e+00 : f32
    %115 = vector.broadcast %cst_53 : f32 to vector<1x1x64xf32>
    %116 = arith.mulf %115, %114 : vector<1x1x64xf32>
    %117 = tpu.reciprocal %116 {approx = true} : vector<1x1x64xf32> -> vector<1x1x64xf32>
    %118 = vector.broadcast %117 : vector<1x1x64xf32> to vector<1x54x64xf32>
    %119 = arith.mulf %110, %118 : vector<1x54x64xf32>
    %cst_54 = arith.constant 5.000000e-01 : f32
    %120 = vector.broadcast %cst_54 : f32 to vector<1x54x64xf32>
    %121 = arith.addf %119, %120 : vector<1x54x64xf32>
    %122 = arith.negf %121 : vector<1x54x64xf32>
    %123 = math.exp %122 : vector<1x54x64xf32>
    %cst_55 = arith.constant 1.000000e+00 : f32
    %124 = vector.broadcast %cst_55 : f32 to vector<1x54x64xf32>
    %125 = arith.addf %124, %123 : vector<1x54x64xf32>
    %126 = arith.divf %124, %125 : vector<1x54x64xf32>
    %127 = arith.mulf %94, %126 : vector<1x54x64xf32>
    %cst_56 = arith.constant 0.000000e+00 : f32
    %128 = vector.broadcast %cst_56 : f32 to vector<1x54x64xf32>
    %129 = arith.maximumf %127, %128 : vector<1x54x64xf32>
    %130 = arith.truncf %129 : vector<1x54x64xf32> to vector<1x54x64xbf16>
    %131 = vector.extract_strided_slice %130 {offsets = [0, 0, 0], sizes = [1, 52, 64], strides = [1, 1, 1]} : vector<1x54x64xbf16> to vector<1x52x64xbf16>
    %132 = vector.shape_cast %131 : vector<1x52x64xbf16> to vector<52x64xbf16>
    %c0_57 = arith.constant 0 : index
    %c0_58 = arith.constant 0 : index
    %c0_59 = arith.constant 0 : index
    %133 = vector.load %arg8[%c0_57, %c0_58, %c0_59] : memref<3x64x128xbf16, #tpu.memory_space<vmem>>, vector<1x64x128xbf16>
    %134 = vector.shape_cast %133 : vector<1x64x128xbf16> to vector<64x128xbf16>
    %cst_60 = arith.constant dense<0.000000e+00> : vector<52x128xf32>
    %135 = tpu.matmul %132, %134, %cst_60 {dimension_numbers = #tpu.dot_dimension_numbers<[1], [0], [0], [1], [0, 0, 1, 1], [], []>} : vector<52x64xbf16>, vector<64x128xbf16>, vector<52x128xf32> -> vector<52x128xf32>
    %136 = vector.extract_strided_slice %130 {offsets = [0, 1, 0], sizes = [1, 52, 64], strides = [1, 1, 1]} : vector<1x54x64xbf16> to vector<1x52x64xbf16>
    %137 = vector.shape_cast %136 : vector<1x52x64xbf16> to vector<52x64xbf16>
    %c1_61 = arith.constant 1 : index
    %c0_62 = arith.constant 0 : index
    %c0_63 = arith.constant 0 : index
    %138 = vector.load %arg8[%c1_61, %c0_62, %c0_63] : memref<3x64x128xbf16, #tpu.memory_space<vmem>>, vector<1x64x128xbf16>
    %139 = vector.shape_cast %138 : vector<1x64x128xbf16> to vector<64x128xbf16>
    %cst_64 = arith.constant dense<0.000000e+00> : vector<52x128xf32>
    %140 = tpu.matmul %137, %139, %cst_64 {dimension_numbers = #tpu.dot_dimension_numbers<[1], [0], [0], [1], [0, 0, 1, 1], [], []>} : vector<52x64xbf16>, vector<64x128xbf16>, vector<52x128xf32> -> vector<52x128xf32>
    %141 = arith.addf %135, %140 : vector<52x128xf32>
    %142 = vector.extract_strided_slice %130 {offsets = [0, 2, 0], sizes = [1, 52, 64], strides = [1, 1, 1]} : vector<1x54x64xbf16> to vector<1x52x64xbf16>
    %143 = vector.shape_cast %142 : vector<1x52x64xbf16> to vector<52x64xbf16>
    %c2_65 = arith.constant 2 : index
    %c0_66 = arith.constant 0 : index
    %c0_67 = arith.constant 0 : index
    %144 = vector.load %arg8[%c2_65, %c0_66, %c0_67] : memref<3x64x128xbf16, #tpu.memory_space<vmem>>, vector<1x64x128xbf16>
    %145 = vector.shape_cast %144 : vector<1x64x128xbf16> to vector<64x128xbf16>
    %cst_68 = arith.constant dense<0.000000e+00> : vector<52x128xf32>
    %146 = tpu.matmul %143, %145, %cst_68 {dimension_numbers = #tpu.dot_dimension_numbers<[1], [0], [0], [1], [0, 0, 1, 1], [], []>} : vector<52x64xbf16>, vector<64x128xbf16>, vector<52x128xf32> -> vector<52x128xf32>
    %147 = arith.addf %141, %146 : vector<52x128xf32>
    %148 = vector.shape_cast %147 : vector<52x128xf32> to vector<1x52x128xf32>
    %c0_69 = arith.constant 0 : index
    %c0_70 = arith.constant 0 : index
    %149 = vector.load %arg9[%c0_69, %c0_70] : memref<1x128xf32, #tpu.memory_space<vmem>>, vector<1x128xf32>
    %150 = vector.shape_cast %149 : vector<1x128xf32> to vector<1x1x128xf32>
    %151 = vector.broadcast %150 : vector<1x1x128xf32> to vector<1x52x128xf32>
    %152 = arith.addf %148, %151 : vector<1x52x128xf32>
    %cst_71 = arith.constant dense<0.000000e+00> : vector<1x128xf32>
    %153 = vector.multi_reduction <add>, %152, %cst_71 [1] : vector<1x52x128xf32> to vector<1x128xf32>
    %154 = vector.shape_cast %153 : vector<1x128xf32> to vector<1x1x128xf32>
    %cst_72 = arith.constant 5.200000e+01 : f32
    %155 = vector.broadcast %cst_72 : f32 to vector<1x1x128xf32>
    %156 = arith.divf %154, %155 : vector<1x1x128xf32>
    %157 = arith.mulf %152, %152 : vector<1x52x128xf32>
    %cst_73 = arith.constant dense<0.000000e+00> : vector<1x128xf32>
    %158 = vector.multi_reduction <add>, %157, %cst_73 [1] : vector<1x52x128xf32> to vector<1x128xf32>
    %159 = vector.shape_cast %158 : vector<1x128xf32> to vector<1x1x128xf32>
    %cst_74 = arith.constant 5.200000e+01 : f32
    %160 = vector.broadcast %cst_74 : f32 to vector<1x1x128xf32>
    %161 = arith.mulf %160, %156 : vector<1x1x128xf32>
    %162 = arith.mulf %161, %156 : vector<1x1x128xf32>
    %163 = arith.subf %159, %162 : vector<1x1x128xf32>
    %cst_75 = arith.constant 0.000000e+00 : f32
    %164 = vector.broadcast %cst_75 : f32 to vector<1x1x128xf32>
    %165 = arith.maximumf %163, %164 : vector<1x1x128xf32>
    %166 = vector.broadcast %156 : vector<1x1x128xf32> to vector<1x52x128xf32>
    %167 = arith.subf %152, %166 : vector<1x52x128xf32>
    %168 = arith.mulf %167, %167 : vector<1x52x128xf32>
    %cst_76 = arith.constant 0.0196078438 : f32
    %169 = vector.broadcast %cst_76 : f32 to vector<1x1x128xf32>
    %170 = arith.mulf %165, %169 : vector<1x1x128xf32>
    %cst_77 = arith.constant 9.99999974E-5 : f32
    %171 = vector.broadcast %cst_77 : f32 to vector<1x1x128xf32>
    %172 = arith.addf %170, %171 : vector<1x1x128xf32>
    %cst_78 = arith.constant 4.000000e+00 : f32
    %173 = vector.broadcast %cst_78 : f32 to vector<1x1x128xf32>
    %174 = arith.mulf %173, %172 : vector<1x1x128xf32>
    %175 = tpu.reciprocal %174 {approx = true} : vector<1x1x128xf32> -> vector<1x1x128xf32>
    %176 = vector.broadcast %175 : vector<1x1x128xf32> to vector<1x52x128xf32>
    %177 = arith.mulf %168, %176 : vector<1x52x128xf32>
    %cst_79 = arith.constant 5.000000e-01 : f32
    %178 = vector.broadcast %cst_79 : f32 to vector<1x52x128xf32>
    %179 = arith.addf %177, %178 : vector<1x52x128xf32>
    %180 = arith.negf %179 : vector<1x52x128xf32>
    %181 = math.exp %180 : vector<1x52x128xf32>
    %cst_80 = arith.constant 1.000000e+00 : f32
    %182 = vector.broadcast %cst_80 : f32 to vector<1x52x128xf32>
    %183 = arith.addf %182, %181 : vector<1x52x128xf32>
    %184 = arith.divf %182, %183 : vector<1x52x128xf32>
    %185 = arith.mulf %152, %184 : vector<1x52x128xf32>
    %cst_81 = arith.constant 0.000000e+00 : f32
    %186 = vector.broadcast %cst_81 : f32 to vector<1x52x128xf32>
    %187 = arith.maximumf %185, %186 : vector<1x52x128xf32>
    %188 = vector.extract_strided_slice %187 {offsets = [0, 0, 0], sizes = [1, 13, 128], strides = [1, 1, 1]} : vector<1x52x128xf32> to vector<1x13x128xf32>
    %cst_82 = arith.constant dense<0xFF800000> : vector<1x128xf32>
    %189 = vector.multi_reduction <maximumf>, %188, %cst_82 [1] : vector<1x13x128xf32> to vector<1x128xf32>
    %190 = vector.extract_strided_slice %187 {offsets = [0, 13, 0], sizes = [1, 13, 128], strides = [1, 1, 1]} : vector<1x52x128xf32> to vector<1x13x128xf32>
    %cst_83 = arith.constant dense<0xFF800000> : vector<1x128xf32>
    %191 = vector.multi_reduction <maximumf>, %190, %cst_83 [1] : vector<1x13x128xf32> to vector<1x128xf32>
    %192 = vector.extract_strided_slice %187 {offsets = [0, 26, 0], sizes = [1, 13, 128], strides = [1, 1, 1]} : vector<1x52x128xf32> to vector<1x13x128xf32>
    %cst_84 = arith.constant dense<0xFF800000> : vector<1x128xf32>
    %193 = vector.multi_reduction <maximumf>, %192, %cst_84 [1] : vector<1x13x128xf32> to vector<1x128xf32>
    %194 = vector.extract_strided_slice %187 {offsets = [0, 39, 0], sizes = [1, 13, 128], strides = [1, 1, 1]} : vector<1x52x128xf32> to vector<1x13x128xf32>
    %cst_85 = arith.constant dense<0xFF800000> : vector<1x128xf32>
    %195 = vector.multi_reduction <maximumf>, %194, %cst_85 [1] : vector<1x13x128xf32> to vector<1x128xf32>
    %196 = tpu.concatenate %189, %191, %193, %195 in 1 : vector<1x128xf32>, vector<1x128xf32>, vector<1x128xf32>, vector<1x128xf32> -> vector<1x512xf32>
    %197 = arith.truncf %196 : vector<1x512xf32> to vector<1x512xbf16>
    %c0_86 = arith.constant 0 : index
    %c0_87 = arith.constant 0 : index
    %198 = vector.load %arg11[%c0_86, %c0_87] : memref<1x256xf32, #tpu.memory_space<vmem>>, vector<1x256xf32>
    %c0_88 = arith.constant 0 : index
    %c0_89 = arith.constant 0 : index
    %199 = vector.load %arg10[%c0_88, %c0_89] : memref<512x256xbf16, #tpu.memory_space<vmem>>, vector<512x256xbf16>
    %cst_90 = arith.constant dense<0.000000e+00> : vector<1x256xf32>
    %200 = tpu.matmul %197, %199, %cst_90 {dimension_numbers = #tpu.dot_dimension_numbers<[1], [0], [0], [1], [0, 0, 1, 1], [], []>} : vector<1x512xbf16>, vector<512x256xbf16>, vector<1x256xf32> -> vector<1x256xf32>
    %201 = arith.addf %198, %200 : vector<1x256xf32>
    %cst_91 = arith.constant 0.000000e+00 : f32
    %202 = vector.broadcast %cst_91 : f32 to vector<1x256xf32>
    %203 = arith.maximumf %201, %202 : vector<1x256xf32>
    %c0_92 = arith.constant 0 : index
    %c0_93 = arith.constant 0 : index
    %c0_94 = arith.constant 0 : index
    %204 = vector.load %arg12[%c0_92, %c0_93, %c0_94] : memref<1x1x256xf32, #tpu.memory_space<vmem>>, vector<1x1x256xf32>
    %205 = vector.shape_cast %204 : vector<1x1x256xf32> to vector<1x256xf32>
    %206 = vector.shape_cast %203 : vector<1x256xf32> to vector<1x1x256xf32>
    tpu.vector_store %arg12[%c0_92, %c0_93, %c0_94], %206 {strides = array<i32>} : memref<1x1x256xf32, #tpu.memory_space<vmem>>, vector<1x1x256xf32>,
    return
  }
  func.func @transform_0(%arg0: i32) -> (i32, i32, i32, i32) {
    %c0_i32 = arith.constant 0 : i32
    %c0_i32_0 = arith.constant 0 : i32
    %c0_i32_1 = arith.constant 0 : i32
    %c0_i32_2 = arith.constant 0 : i32
    return %arg0, %c0_i32, %c0_i32_0, %c0_i32_1 : i32, i32, i32, i32
  }
  func.func @transform_1(%arg0: i32) -> (i32, i32) {
    %c0_i32 = arith.constant 0 : i32
    %c0_i32_0 = arith.constant 0 : i32
    %c0_i32_1 = arith.constant 0 : i32
    return %c0_i32, %c0_i32_0 : i32, i32
  }
  func.func @transform_2(%arg0: i32) -> (i32, i32) {
    %c0_i32 = arith.constant 0 : i32
    %c0_i32_0 = arith.constant 0 : i32
    %c0_i32_1 = arith.constant 0 : i32
    return %c0_i32, %c0_i32_0 : i32, i32
  }
  func.func @transform_3(%arg0: i32) -> (i32, i32, i32) {
    %c0_i32 = arith.constant 0 : i32
    %c0_i32_0 = arith.constant 0 : i32
    %c0_i32_1 = arith.constant 0 : i32
    %c0_i32_2 = arith.constant 0 : i32
    return %c0_i32, %c0_i32_0, %c0_i32_1 : i32, i32, i32
  }
  func.func @transform_4(%arg0: i32) -> (i32, i32) {
    %c0_i32 = arith.constant 0 : i32
    %c0_i32_0 = arith.constant 0 : i32
    %c0_i32_1 = arith.constant 0 : i32
    return %c0_i32, %c0_i32_0 : i32, i32
  }
  func.func @transform_5(%arg0: i32) -> (i32, i32, i32) {
    %c0_i32 = arith.constant 0 : i32
    %c0_i32_0 = arith.constant 0 : i32
    %c0_i32_1 = arith.constant 0 : i32
    %c0_i32_2 = arith.constant 0 : i32
    return %c0_i32, %c0_i32_0, %c0_i32_1 : i32, i32, i32
  }
  func.func @transform_6(%arg0: i32) -> (i32, i32) {
    %c0_i32 = arith.constant 0 : i32
    %c0_i32_0 = arith.constant 0 : i32
    %c0_i32_1 = arith.constant 0 : i32
    return %c0_i32, %c0_i32_0 : i32, i32
  }
  func.func @transform_7(%arg0: i32) -> (i32, i32, i32) {
    %c0_i32 = arith.constant 0 : i32
    %c0_i32_0 = arith.constant 0 : i32
    %c0_i32_1 = arith.constant 0 : i32
    %c0_i32_2 = arith.constant 0 : i32
    return %c0_i32, %c0_i32_0, %c0_i32_1 : i32, i32, i32
  }
  func.func @transform_8(%arg0: i32) -> (i32, i32) {
    %c0_i32 = arith.constant 0 : i32
    %c0_i32_0 = arith.constant 0 : i32
    %c0_i32_1 = arith.constant 0 : i32
    return %c0_i32, %c0_i32_0 : i32, i32
  }
  func.func @transform_9(%arg0: i32) -> (i32, i32) {
    %c0_i32 = arith.constant 0 : i32
    %c0_i32_0 = arith.constant 0 : i32
    %c0_i32_1 = arith.constant 0 : i32
    return %c0_i32, %c0_i32_0 : i32, i32
  }
  func.func @transform_10(%arg0: i32) -> (i32, i32) {
    %c0_i32 = arith.constant 0 : i32
    %c0_i32_0 = arith.constant 0 : i32
    %c0_i32_1 = arith.constant 0 : i32
    return %c0_i32, %c0_i32_0 : i32, i32
  }
  func.func @transform_11(%arg0: i32) -> (i32, i32, i32) {
    %c0_i32 = arith.constant 0 : i32
    %c0_i32_0 = arith.constant 0 : i32
    %c0_i32_1 = arith.constant 0 : i32
    return %arg0, %c0_i32, %c0_i32_0 : i32, i32, i32
  }
}

</mosaic_0001>

<bundles_post_ra>
// kernel: simcnn_forward.1
= control target key start
LH: loop header
LB: loop body
LE: loop exit
PB: predicated region body
PF: predicated region fallthrough
CT: control target
= control target key end

     0   :  { %16 = vsyncpa [#allocation3], 0  ;;  %s4837_s17 = smov 0   ;;  %s6052_s0 = inlined_call_operand.vmem [shape: bf16[2,1,114,15], index: 0, kind: input, shape index: {}]   ;;  %s6053_s1 = inlined_call_operand.vmem [shape: bf16[15,16], index: 1, kind: input, shape index: {}]   ;;  %s6054_s2 = inlined_call_operand.vmem [shape: f32[1,16], index: 2, kind: input, shape index: {}]   ;;  %s6055_s3 = inlined_call_operand.vmem [shape: bf16[3,16,32], index: 3, kind: input, shape index: {}]   ;;  %s6056_s4 = inlined_call_operand.vmem [shape: f32[1,32], index: 4, kind: input, shape index: {}]   ;;  %s6057_s5 = inlined_call_operand.vmem [shape: bf16[3,32,64], index: 5, kind: input, shape index: {}]   ;;  %s6058_s6 = inlined_call_operand.vmem [shape: f32[1,64], index: 6, kind: input, shape index: {}]   ;;  %s6059_s7 = inlined_call_operand.vmem [shape: bf16[3,64,128], index: 7, kind: input, shape index: {}]   ;;  %s6060_s8 = inlined_call_operand.vmem [shape: f32[1,128], index: 8, kind: input, shape index: {}]   ;;  %s6061_s9 = inlined_call_operand.hbm [shape: bf16[512,256], index: 9, kind: input, shape index: {}]   ;;  %s6062_s10 = inlined_call_operand.vmem [shape: f32[1,256], index: 10, kind: input, shape index: {}]   ;;  %s6063_s11 = inlined_call_operand.vmem [shape: f32[2,1,256], index: 11, kind: output, shape index: {}]  }
   0x1 LB: > { %s3968_s18 = sadd.s32 4294967295, %s4767_s17   ;;  %p3970_p0 = scmp.ge.s32.totalorder %s4767_s17, 1  ;;  %s4767_s17 = sphi %s4837_s17, %s22_s17  }
   0x2   : > { %p289_p1 = scmp.lt.s32.totalorder %s4767_s17, 3  ;;  %s4769_s19 = smov [#allocation2]  }
   0x3   : > { %s325_s20 = sshll.u32 %s4769_s19, 4  ;;  %p4463_p3 = scmp.eq.s32.totalorder %s3968_s18, 0  ;;  %s326_s20 = int_to_ptr.vmem [resolvable:$true] %s325_s20 }
   0x4   : > { %p4845_p2 = pnand %p3970_p0, %p289_p1  ;;  %s4742_s22 = scalar_lea.vmem %s326_s20, 8192 }
   0x5   : > { %p4743_p7 = scmp.ne.s32.totalorder %s326_s20, %s4742_s22  ;;  %p4750_p10 = scmp.lt.s32.totalorder %s326_s20, %s326_s20 }
   0x6   : > { %p4459_p4 = pneg %p4845_p2  ;;  %p4751_p11 = scmp.lt.s32.totalorder %s4742_s22, %s4742_s22 }
   0x8   : > { %p4460_p5 = pnand %p4463_p3, %p4459_p4  ;;  %p4752_p12 = por %p4751_p11, %p4750_p10 }
   0xa   : > { %p4733_p6 = pneg %p4460_p5 }
   0xc   : > { %p4745_p8 = pnand %p4743_p7, %p4733_p6 }
   0xe   : > { %p4746_p9 = pneg %p4745_p8 }
  0x10   : > { %p4753_p13 = pnand %p4752_p12, %p4746_p9 }
  0x12   : > { %4756 = shalt.err (!%p4753_p13)
}
  0x13   : > { %s4770_s23 = smov 128   ;;  %s4771_s24 = smov 8  }
  0x14   : > { %4462 = dma.hbm_to_vmem [thread:$0]  (!%p4460_p5), %s6061_s9, 8192, %s326_s20, [#allocation3], %s4770_s23, %s4770_s23, %s4771_s24  }
  0x15   : > { %352 = sbr.rel (%p4845_p2) target bundleno = 1667 (0x683), region = 64 }
  0x1a   : > { %4762 = dma.done.wait (%p4463_p3), [#allocation3], 8192  }
  0x1b   : > { %4764 = vsyncadd (%p4463_p3), [#allocation3], 4294959104  ;;  %vm486_vm0 = vcmask 1046528   ;;  %p391_p0 = scmp.lt.s32.totalorder %s3968_s18, 1  ;;  %vm487_vm1 = vcmask 1047552   ;;  %v4772_v0 = vmov 65535  }
  0x1c   : > { %v488_v1 = vsel %vm486_vm0, 4294967295, %v4772_v0  ;;  %v4481_v3 = vld [vmem:[%s6053_s1] sm:$0xff]   ;;  %vm461_vm2 = vcmask 121856   ;;  %v4773_v14 = vmov 0.0   ;;  %vm4774_vm3 = vmmov 0   ;;  %v4491_v15 = vld [vmem:[%s6055_s3 + $0x8] sm:$0xff]  }
  0x1d   : > { %s6119_s18 = smov (!%p391_p0, %s3968_s18), 1  ;;  %v489_v2 = vsel %vm487_vm1, %v488_v1, 0  ;;  %v4490_v13 = vld [vmem:[%s6055_s3] sm:$0xff]   ;;  %4280 = vmatprep.subr.bf16.mxu1 %v4773_v14  ;;  %4282 = vmatprep.mubr.msk.bf16.mxu1 %vm4774_vm3, %v4773_v14  ;;  %vm611_vm4 = vcmask 130048   ;;  %vm639_vm5 = vcmask 123904   ;;  %vm1687_vm7 = vcmask 254976  }
  0x1e   : > { %s4454_s27 = smul.u32 60, %s6119_s18  ;;  %v491_v5 = vand.u32 %v4481_v3, %v489_v2  ;;  %4281 = vmatpush3.bf16.msra.mxu1 %v4491_v15  ;;  %v4893_v17 = vld [vmem:[%s6054_s2] ss:$0 sm:$0xff]  ;;  %vm901_vm6 = vsmask.f32 7424  ;;  %vm2253_vm8 = vcmask 1041409  }
  0x1f   : > { %4340 = vmatprep.subr.bf16.mxu1 %v4773_v14  ;;  %vm2255_vm9 = vcmask 1042434   ;;  %vm2257_vm10 = vcmask 1043459   ;;  %vm2259_vm11 = vcmask 1044484   ;;  %vm2261_vm12 = vcmask 1045509   ;;  %s3976_s21 = sshll.u32 %s6119_s18, 1 }
  0x20   : > { %s395_s30 = scalar_lea.vmem %s6052_s0, %s4454_s27  ;;  %4262 = vmatprep.subr.bf16.mxu0 %v491_v5  ;;  %vm2263_vm13 = vcmask 1046534   ;;  %vm2265_vm14 = vcmask 1047559   ;;  %vm2323_vm15 = vcmask 261120   ;;  %vm2708_vm1 = vcmask 523264   ;;  %s399_s24 = scalar_lea.vmem %s6063_s11, %s3976_s21 }
  0x21   : > { %v4482_v4 = vld [vmem:[%s395_s30] sm:$0xff]   ;;  %v4483_v6 = vld [vmem:[%s395_s30 + $0x8] sm:$0xff]   ;;  %4263 = vmatpush3.bf16.msra.mxu0 %v491_v5  ;;  %v4484_v7 = vld [vmem:[%s395_s30 + $0x10] sm:$0xff]  }
  0x22   : > { %4264 = vmatprep.mubr.msk.bf16.mxu0 %vm461_vm2, %v4482_v4  ;;  %v4485_v8 = vld [vmem:[%s395_s30 + $0x18] sm:$0xff]   ;;  %v4486_v9 = vld [vmem:[%s395_s30 + $0x20] sm:$0xff]   ;;  %v4487_v10 = vld [vmem:[%s395_s30 + $0x28] sm:$0xff]   ;;  %4310 = vmatprep.subr.bf16.mxu0 %v4773_v14 }
  0x23   : > { %v4488_v11 = vld [vmem:[%s395_s30 + $0x30] sm:$0xff]   ;;  %v4489_v12 = vld [vmem:[%s395_s30 + $0x38] ss:$0 sps:$4 sm:$0x11]  }
  0x24   : > { %4265 = vmatmul.mubr.msk.bf16.vlgmr.msra.gmra.mxu0 %vm461_vm2, %v4483_v6 }
  0x25   : > { %4268 = vmatprep.mubr.msk.bf16.mxu0 %vm461_vm2, %v4484_v7  ;;  %4311 = vmatpush3.bf16.msra.mxu0 %v4490_v13 }
  0x2c   : > { %4269 = vmatmul.mubr.msk.bf16.gmra.mxu0 %vm461_vm2, %v4485_v8 }
  0x2d   : > { %4272 = vmatprep.mubr.msk.bf16.mxu0 %vm461_vm2, %v4486_v9 }
  0x34   : > { %4273 = vmatmul.mubr.msk.bf16.gmra.mxu0 %vm461_vm2, %v4487_v10 }
  0x35   : > { %4276 = vmatprep.mubr.msk.bf16.mxu0 %vm461_vm2, %v4488_v11 }
  0x3c   : > { %4277 = vmatmul.mubr.msk.bf16.gmra.mxu0 %vm461_vm2, %v4489_v12  ;;  %vm2720_vm2 = vcmask 521216  }
  0x3d   : > { %4312 = vmatprep.mubr.msk.bf16.mxu0 %vm4774_vm3, %v4773_v14 }
  0xe4   : > { %v4266_v16 = vpop.f32.mrf.mxu0 }
  0xe5   : > { %v4899_v21 = vadd.f32 %v4266_v16, %v4893_v17 }
  0xe6   : > { %v527_v18 = vpop.f32.mrf.mxu0 }
  0xe7   : > { %v4896_v19 = vadd.f32 %v4893_v17, %v527_v18  ;;  %v652_v27 = vmul.f32 %v4899_v21, %v4899_v21  ;;  %v615_v31 = vsel %vm611_vm4, %v4899_v21, 0.0 }
  0xe8   : > { %v4267_v20 = vpop.f32.mrf.mxu0 }
  0xe9   : > { %v650_v23 = vmul.f32 %v4896_v19, %v4896_v19  ;;  %v4904_v24 = vadd.f32 %v4267_v20, %v4893_v17  ;;  %v612_v28 = vsel %vm611_vm4, %v4896_v19, 0.0  ;;  %v668_v41 = vsel %vm611_vm4, %v652_v27, 0.0 }
  0xea   : > { %v530_v22 = vpop.f32.mrf.mxu0 }
  0xeb   : > { %v4907_v25 = vadd.f32 %v4893_v17, %v530_v22  ;;  %v665_v34 = vsel %vm611_vm4, %v650_v23, 0.0  ;;  %v653_v35 = vmul.f32 %v4904_v24, %v4904_v24  ;;  %v617_v42 = vsel %vm611_vm4, %v4904_v24, 0.0 }
  0xec   : > { %v4270_v26 = vpop.f32.mrf.mxu0 }
  0xed   : > { %v613_v29 = vsel %vm611_vm4, %v4907_v25, 0.0  ;;  %v651_v30 = vmul.f32 %v4907_v25, %v4907_v25  ;;  %v4930_v43 = vadd.f32 %v4270_v26, %v4893_v17  ;;  %v670_v48 = vsel %vm611_vm4, %v653_v35, 0.0 }
  0xee   : > { %v614_v32 = vadd.f32 %v613_v29, %v612_v28  ;;  %v543_v33 = vpop.f32.mrf.mxu0 }
  0xef   : > { %v666_v36 = vsel %vm611_vm4, %v651_v30, 0.0  ;;  %v4924_v37 = vadd.f32 %v4893_v17, %v543_v33  ;;  %v656_v55 = vmul.f32 %v4930_v43, %v4930_v43  ;;  %v623_v62 = vsel %vm611_vm4, %v4930_v43, 0.0 }
  0xf0   : > { %v616_v38 = vadd.f32 %v615_v31, %v614_v32  ;;  %v667_v39 = vadd.f32 %v666_v36, %v665_v34  ;;  %v4271_v40 = vpop.f32.mrf.mxu0 }
  0xf1   : > { %v654_v44 = vmul.f32 %v4924_v37, %v4924_v37  ;;  %v619_v49 = vsel %vm611_vm4, %v4924_v37, 0.0  ;;  %v4938_v50 = vadd.f32 %v4271_v40, %v4893_v17  ;;  %v676_v5 = vsel %vm611_vm4, %v656_v55, 0.0 }
  0xf2   : > { %v669_v45 = vadd.f32 %v668_v41, %v667_v39  ;;  %v618_v46 = vadd.f32 %v617_v42, %v616_v38  ;;  %v546_v47 = vpop.f32.mrf.mxu0 }
  0xf3   : > { %v4941_v51 = vadd.f32 %v4893_v17, %v546_v47  ;;  %v672_v56 = vsel %vm611_vm4, %v654_v44, 0.0  ;;  %v657_v63 = vmul.f32 %v4938_v50, %v4938_v50  ;;  %v625_v6 = vsel %vm611_vm4, %v4938_v50, 0.0 }
  0xf4   : > { %v620_v52 = vadd.f32 %v619_v49, %v618_v46  ;;  %v671_v53 = vadd.f32 %v670_v48, %v669_v45  ;;  %v4274_v54 = vpop.f32.mrf.mxu0 }
  0xf5   : > { %v621_v57 = vsel %vm611_vm4, %v4941_v51, 0.0  ;;  %v655_v58 = vmul.f32 %v4941_v51, %v4941_v51  ;;  %v4962_v7 = vadd.f32 %v4274_v54, %v4893_v17  ;;  %v678_v12 = vsel %vm611_vm4, %v657_v63, 0.0 }
  0xf6   : > { %v673_v59 = vadd.f32 %v672_v56, %v671_v53  ;;  %v622_v60 = vadd.f32 %v621_v57, %v620_v52  ;;  %v559_v61 = vpop.f32.mrf.mxu0 }
  0xf7   : > { %v674_v0 = vsel %vm611_vm4, %v655_v58, 0.0  ;;  %v4956_v1 = vadd.f32 %v4893_v17, %v559_v61  ;;  %v660_v23 = vmul.f32 %v4962_v7, %v4962_v7  ;;  %v631_v32 = vsel %vm611_vm4, %v4962_v7, 0.0 }
  0xf8   : > { %v624_v2 = vadd.f32 %v623_v62, %v622_v60  ;;  %v675_v3 = vadd.f32 %v674_v0, %v673_v59  ;;  %v4275_v4 = vpop.f32.mrf.mxu0 }
  0xf9   : > { %v658_v8 = vmul.f32 %v4956_v1, %v4956_v1  ;;  %v627_v13 = vsel %vm611_vm4, %v4956_v1, 0.0  ;;  %v4970_v15 = vadd.f32 %v4275_v4, %v4893_v17  ;;  %v684_v40 = vsel %vm611_vm4, %v660_v23, 0.0 }
  0xfa   : > { %v677_v9 = vadd.f32 %v676_v5, %v675_v3  ;;  %v626_v10 = vadd.f32 %v625_v6, %v624_v2  ;;  %v562_v11 = vpop.f32.mrf.mxu0 }
  0xfb   : > { %v4973_v16 = vadd.f32 %v4893_v17, %v562_v11  ;;  %v680_v26 = vsel %vm611_vm4, %v658_v8, 0.0  ;;  %v661_v33 = vmul.f32 %v4970_v15, %v4970_v15  ;;  %v633_v41 = vsel %vm611_vm4, %v4970_v15, 0.0 }
  0xfc   : > { %v628_v18 = vadd.f32 %v627_v13, %v626_v10  ;;  %v679_v20 = vadd.f32 %v678_v12, %v677_v9  ;;  %v4278_v22 = vpop.f32.mrf.mxu0 }
  0xfd   : > { %v629_v27 = vsel %vm611_vm4, %v4973_v16, 0.0  ;;  %v659_v28 = vmul.f32 %v4973_v16, %v4973_v16  ;;  %v4994_v42 = vadd.f32 %v4278_v22, %v4893_v17  ;;  %v686_v48 = vsel %vm611_vm4, %v661_v33, 0.0 }
  0xfe   : > { %v681_v29 = vadd.f32 %v680_v26, %v679_v20  ;;  %v630_v30 = vadd.f32 %v629_v27, %v628_v18  ;;  %v575_v31 = vpop.f32.mrf.mxu0 }
  0xff   : > { %v682_v34 = vsel %vm611_vm4, %v659_v28, 0.0  ;;  %v4988_v35 = vadd.f32 %v4893_v17, %v575_v31  ;;  %v664_v55 = vmul.f32 %v4994_v42, %v4994_v42  ;;  %v640_v61 = vsel %vm639_vm5, %v4994_v42, 0.0 }
 0x100   : > { %v632_v36 = vadd.f32 %v631_v32, %v630_v30  ;;  %v683_v38 = vadd.f32 %v682_v34, %v681_v29  ;;  %v4279_v39 = vpop.f32.mrf.mxu0 }
 0x101   : > { %v662_v44 = vmul.f32 %v4988_v35, %v4988_v35  ;;  %v635_v49 = vsel %vm611_vm4, %v4988_v35, 0.0  ;;  %v692_v0 = vsel %vm639_vm5, %v664_v55, 0.0  ;;  %vm3366_vm5 = vcmask 1044480  }
 0x102   : > { %v685_v45 = vadd.f32 %v684_v40, %v683_v38  ;;  %v634_v46 = vadd.f32 %v633_v41, %v632_v36  ;;  %v578_v47 = vpop.f32.mrf.mxu0 }
 0x103   : > { %v5002_v52 = vadd.f32 %v4893_v17, %v578_v47  ;;  %v688_v56 = vsel %vm611_vm4, %v662_v44, 0.0 }
 0x104   : > { %v636_v53 = vadd.f32 %v635_v49, %v634_v46  ;;  %v687_v54 = vadd.f32 %v686_v48, %v685_v45 }
 0x105   : > { %v637_v57 = vsel %vm611_vm4, %v5002_v52, 0.0  ;;  %v663_v58 = vmul.f32 %v5002_v52, %v5002_v52 }
 0x106   : > { %v689_v59 = vadd.f32 %v688_v56, %v687_v54  ;;  %v638_v60 = vadd.f32 %v637_v57, %v636_v53 }
 0x107   : > { %v690_v17 = vsel %vm611_vm4, %v663_v58, 0.0 }
 0x108   : > { %v641_v62 = vadd.f32 %v640_v61, %v638_v60  ;;  %v691_v63 = vadd.f32 %v690_v17, %v689_v59 }
 0x10a   : > { %v642_v2 = vrot.slane %v641_v62, 4  ;;  %v693_v3 = vadd.f32 %v692_v0, %v691_v63 }
 0x10c   : > { %v643_v4 = vadd.f32 %v642_v2, %v641_v62  ;;  %v694_v5 = vrot.slane %v693_v3, 4 }
 0x10e   : > { %v644_v6 = vrot.slane %v643_v4, 2  ;;  %v695_v8 = vadd.f32 %v694_v5, %v693_v3 }
 0x110   : > { %v645_v9 = vadd.f32 %v644_v6, %v643_v4  ;;  %v696_v10 = vrot.slane %v695_v8, 2 }
 0x112   : > { %v646_v11 = vrot.slane %v645_v9, 1  ;;  %v697_v12 = vadd.f32 %v696_v10, %v695_v8 }
 0x114   : > { %v647_v13 = vadd.f32 %v646_v11, %v645_v9  ;;  %v698_v20 = vrot.slane %v697_v12, 1 }
 0x116   : > { %v5013_v18 = vmul.f32 0.00877193, %v647_v13  ;;  %v699_v23 = vadd.f32 %v698_v20, %v697_v12 }
 0x118   : > { %v700_v22 = vmul.f32 114.0, %v5013_v18  ;;  %v704_v32 = vsub.f32 %v4896_v19, %v5013_v18  ;;  %v705_v33 = vsub.f32 %v4907_v25, %v5013_v18  ;;  %v706_v34 = vsub.f32 %v4899_v21, %v5013_v18 }
 0x119   : > { %v707_v36 = vsub.f32 %v4904_v24, %v5013_v18  ;;  %v708_v38 = vsub.f32 %v4924_v37, %v5013_v18  ;;  %v709_v39 = vsub.f32 %v4941_v51, %v5013_v18  ;;  %v710_v45 = vsub.f32 %v4930_v43, %v5013_v18 }
 0x11a   : > { %v701_v26 = vmul.f32 %v700_v22, %v5013_v18  ;;  %v719_v40 = vmul.f32 %v704_v32, %v704_v32  ;;  %v720_v41 = vmul.f32 %v705_v33, %v705_v33  ;;  %v721_v44 = vmul.f32 %v706_v34, %v706_v34 }
 0x11b   : > { %v722_v47 = vmul.f32 %v707_v36, %v707_v36  ;;  %v723_v48 = vmul.f32 %v708_v38, %v708_v38  ;;  %v724_v49 = vmul.f32 %v709_v39, %v709_v39  ;;  %v711_v53 = vsub.f32 %v4938_v50, %v5013_v18 }
 0x11c   : > { %v702_v27 = vsub.f32 %v699_v23, %v701_v26  ;;  %v725_v17 = vmul.f32 %v710_v45, %v710_v45  ;;  %v712_v62 = vsub.f32 %v4956_v1, %v5013_v18  ;;  %v713_v3 = vsub.f32 %v4973_v16, %v5013_v18 }
 0x11d   : > { %v726_v2 = vmul.f32 %v711_v53, %v711_v53  ;;  %v714_v8 = vsub.f32 %v4962_v7, %v5013_v18  ;;  %v715_v12 = vsub.f32 %v4970_v15, %v5013_v18  ;;  %v717_v53 = vsub.f32 %v5002_v52, %v5013_v18 }
 0x11e   : > { %v703_v28 = vmax.f32 %v702_v27, 0.0  ;;  %v727_v22 = vmul.f32 %v712_v62, %v712_v62  ;;  %v728_v27 = vmul.f32 %v713_v3, %v713_v3 }
 0x11f   : > { %v730_v33 = vmul.f32 %v715_v12, %v715_v12 }
 0x120   : > { %v734_v29 = vmul.f32 0.0088495575, %v703_v28 }
 0x122   : > { %v735_v30 = vadd.f32 0.0001, %v734_v29 }
 0x124   : > { %v736_v31 = vmul.f32 4.0, %v735_v30  ;;  %v729_v30 = vmul.f32 %v714_v8, %v714_v8  ;;  %v718_v8 = vsub.f32 %v4994_v42, %v5013_v18 }
 0x126   : > { %4607 = vrcp.f32 %v736_v31 }
 0x133   : > { %v5031_v46 = vpop.eup %4607 }
 0x134   : > { %v738_v54 = vmul.f32 %v5031_v46, %v719_v40  ;;  %v739_v55 = vmul.f32 %v5031_v46, %v720_v41  ;;  %v740_v56 = vmul.f32 %v5031_v46, %v721_v44  ;;  %v741_v57 = vmul.f32 %v5031_v46, %v722_v47 }
 0x135   : > { %v742_v58 = vmul.f32 %v5031_v46, %v723_v48  ;;  %v743_v59 = vmul.f32 %v5031_v46, %v724_v49  ;;  %v744_v6 = vmul.f32 %v5031_v46, %v725_v17  ;;  %v745_v11 = vmul.f32 %v5031_v46, %v726_v2 }
 0x136   : > { %v753_v60 = vadd.f32 0.5, %v738_v54  ;;  %v754_v61 = vadd.f32 0.5, %v739_v55  ;;  %v755_v63 = vadd.f32 0.5, %v740_v56  ;;  %v756_v0 = vadd.f32 0.5, %v741_v57 }
 0x137   : > { %v757_v5 = vadd.f32 0.5, %v742_v58  ;;  %v758_v10 = vadd.f32 0.5, %v743_v59  ;;  %v759_v20 = vadd.f32 0.5, %v744_v6  ;;  %v760_v26 = vadd.f32 0.5, %v745_v11 }
 0x138   : > { %v3995_v4 = vmul.f32 -1.442695, %v753_v60  ;;  %v3996_v9 = vmul.f32 -1.442695, %v754_v61  ;;  %v3997_v13 = vmul.f32 -1.442695, %v755_v63  ;;  %v746_v29 = vmul.f32 %v5031_v46, %v727_v22 }
 0x139   : > { %v3998_v23 = vmul.f32 -1.442695, %v756_v0  ;;  %v3999_v28 = vmul.f32 -1.442695, %v757_v5  ;;  %v4000_v31 = vmul.f32 -1.442695, %v758_v10  ;;  %v747_v32 = vmul.f32 %v5031_v46, %v728_v27 }
 0x13a   : > { %4609 = vpow2.f32 %v3995_v4  ;;  %v4001_v34 = vmul.f32 -1.442695, %v759_v20  ;;  %v748_v36 = vmul.f32 %v5031_v46, %v729_v30  ;;  %v4002_v38 = vmul.f32 -1.442695, %v760_v26 }
 0x13b   : > { %4611 = vpow2.f32 %v3996_v9  ;;  %v749_v39 = vmul.f32 %v5031_v46, %v730_v33  ;;  %v761_v40 = vadd.f32 0.5, %v746_v29  ;;  %v762_v41 = vadd.f32 0.5, %v747_v32 }
 0x13c   : > { %4613 = vpow2.f32 %v3997_v13  ;;  %v763_v44 = vadd.f32 0.5, %v748_v36  ;;  %v716_v48 = vsub.f32 %v4988_v35, %v5013_v18  ;;  %v732_v59 = vmul.f32 %v717_v53, %v717_v53 }
 0x13d   : > { %4615 = vpow2.f32 %v3998_v23  ;;  %v764_v45 = vadd.f32 0.5, %v749_v39  ;;  %v4003_v47 = vmul.f32 -1.442695, %v761_v40  ;;  %v4004_v49 = vmul.f32 -1.442695, %v762_v41 }
 0x13e   : > { %4617 = vpow2.f32 %v3999_v28  ;;  %v4005_v54 = vmul.f32 -1.442695, %v763_v44  ;;  %v731_v57 = vmul.f32 %v716_v48, %v716_v48  ;;  %v751_v0 = vmul.f32 %v5031_v46, %v732_v59 }
 0x13f   : > { %4619 = vpow2.f32 %v4000_v31  ;;  %v4006_v55 = vmul.f32 -1.442695, %v764_v45  ;;  %v733_v23 = vmul.f32 %v718_v8, %v718_v8 }
 0x140   : > { %4621 = vpow2.f32 %v4001_v34  ;;  %v750_v17 = vmul.f32 %v5031_v46, %v731_v57  ;;  %v766_v13 = vadd.f32 0.5, %v751_v0 }
 0x141   : > { %4623 = vpow2.f32 %v4002_v38  ;;  %v752_v28 = vmul.f32 %v5031_v46, %v733_v23 }
 0x142   : > { %4625 = vpow2.f32 %v4003_v47  ;;  %v765_v10 = vadd.f32 0.5, %v750_v17  ;;  %v4008_v27 = vmul.f32 -1.442695, %v766_v13 }
 0x143   : > { %4627 = vpow2.f32 %v4004_v49  ;;  %v767_v33 = vadd.f32 0.5, %v752_v28 }
 0x144   : > { %4629 = vpow2.f32 %v4005_v54  ;;  %v4007_v26 = vmul.f32 -1.442695, %v765_v10 }
 0x145   : > { %4631 = vpow2.f32 %v4006_v55  ;;  %v4009_v47 = vmul.f32 -1.442695, %v767_v33 }
 0x147   : > { %v4610_v56 = vpop.eup %4609 }
 0x148   : > { %v4612_v58 = vpop.eup %4611  ;;  %v813_v60 = vadd.f32 1.0, %v4610_v56 }
 0x149   : > { %v4614_v61 = vpop.eup %4613  ;;  %v814_v62 = vadd.f32 1.0, %v4612_v58 }
 0x14a   : > { %v4616_v63 = vpop.eup %4615  ;;  %4633 = vrcp.f32 %v813_v60  ;;  %v815_v2 = vadd.f32 1.0, %v4614_v61 }
 0x14b   : > { %v4618_v3 = vpop.eup %4617  ;;  %4635 = vrcp.f32 %v814_v62  ;;  %v816_v4 = vadd.f32 1.0, %v4616_v63 }
 0x14c   : > { %v4620_v5 = vpop.eup %4619  ;;  %4637 = vrcp.f32 %v815_v2  ;;  %v817_v6 = vadd.f32 1.0, %v4618_v3 }
 0x14d   : > { %v4622_v9 = vpop.eup %4621  ;;  %4639 = vrcp.f32 %v816_v4  ;;  %v818_v11 = vadd.f32 1.0, %v4620_v5 }
 0x14e   : > { %v4624_v12 = vpop.eup %4623  ;;  %4641 = vrcp.f32 %v817_v6  ;;  %v819_v20 = vadd.f32 1.0, %v4622_v9  ;;  %v4492_v6 = vld [vmem:[%s6055_s3 + $0x10] sm:$0xff]  }
 0x14f   : > { %4643 = vrcp.f32 %v818_v11  ;;  %v820_v22 = vadd.f32 1.0, %v4624_v12  ;;  %v4626_v29 = vpop.eup %4625 }
 0x150   : > { %4645 = vrcp.f32 %v819_v20  ;;  %v4628_v30 = vpop.eup %4627  ;;  %v821_v32 = vadd.f32 1.0, %v4626_v29 }
 0x151   : > { %4647 = vrcp.f32 %v820_v22  ;;  %v4630_v18 = vpop.eup %4629  ;;  %v822_v36 = vadd.f32 1.0, %v4628_v30 }
 0x152   : > { %4649 = vpow2.f32 %v4007_v26  ;;  %v4632_v31 = vpop.eup %4631  ;;  %v823_v58 = vadd.f32 1.0, %v4630_v18 }
 0x153   : > { %4651 = vpow2.f32 %v4008_v27  ;;  %v824_v59 = vadd.f32 1.0, %v4632_v31 }
 0x154   : > { %4653 = vrcp.f32 %v821_v32 }
 0x155   : > { %4655 = vrcp.f32 %v822_v36 }
 0x156   : > { %4657 = vpow2.f32 %v4009_v47 }
 0x157   : > { %v4634_v34 = vpop.eup %4633  ;;  %4659 = vrcp.f32 %v823_v58 }
 0x158   : > { %v4636_v38 = vpop.eup %4635  ;;  %v858_v39 = vmul.f32 %v4634_v34, %v4896_v19  ;;  %4661 = vrcp.f32 %v824_v59 }
 0x159   : > { %v4638_v40 = vpop.eup %4637  ;;  %v859_v41 = vmul.f32 %v4636_v38, %v4907_v25 }
 0x15a   : > { %v4640_v44 = vpop.eup %4639  ;;  %v873_v45 = vmax.f32 %v858_v39, 0.0  ;;  %v860_v46 = vmul.f32 %v4638_v40, %v4899_v21 }
 0x15b   : > { %v4642_v48 = vpop.eup %4641  ;;  %v874_v49 = vmax.f32 %v859_v41, 0.0  ;;  %v861_v53 = vmul.f32 %v4640_v44, %v4904_v24 }
 0x15c   : > { %v4644_v54 = vpop.eup %4643  ;;  %v875_v55 = vmax.f32 %v860_v46, 0.0  ;;  %v862_v56 = vmul.f32 %v4642_v48, %v4924_v37 }
 0x15d   : > { %v5069_v57 = vpack.c.bf16 %v874_v49, %v873_v45  ;;  %v876_v19 = vmax.f32 %v861_v53, 0.0  ;;  %v863_v25 = vmul.f32 %v4644_v54, %v4941_v51  ;;  %v4646_v21 = vpop.eup %4645 }
 0x15e   : > { %v877_v61 = vmax.f32 %v862_v56, 0.0  ;;  %v4648_v62 = vpop.eup %4647  ;;  %v864_v2 = vmul.f32 %v4646_v21, %v4930_v43 }
 0x15f   : > { %4313 = vmatmul.mubr.msk.bf16.vlgmr.msra.gmra.mxu0 %vm611_vm4, %v5069_v57  ;;  %v5074_v60 = vpack.c.bf16 %v876_v19, %v875_v55  ;;  %v905_v24 = vshll.u32 %v5069_v57, 16  ;;  %v878_v17 = vmax.f32 %v863_v25, 0.0  ;;  %v903_v37 = vshrl.u32 %v5069_v57, 16  ;;  %v4650_v0 = vpop.eup %4649 }
 0x160   : > { %4316 = vmatprep.mubr.msk.bf16.mxu0 %vm4774_vm3, %v4773_v14  ;;  %v4652_v3 = vpop.eup %4651  ;;  %v865_v9 = vmul.f32 %v4648_v62, %v4938_v50  ;;  %v825_v10 = vadd.f32 1.0, %v4650_v0  ;;  %v879_v22 = vmax.f32 %v864_v2, 0.0 }
 0x161   : > { %v907_v51 = vrot.slane %v905_v24, 1  ;;  %v910_v63 = vshll.u32 %v5074_v60, 16  ;;  %v5085_v8 = vpack.c.bf16 %v878_v17, %v877_v61  ;;  %v826_v12 = vadd.f32 1.0, %v4652_v3  ;;  %v4654_v13 = vpop.eup %4653 }
 0x162   : > { %v914_v43 = vshrl.u32 %v5074_v60, 16  ;;  %v880_v23 = vmax.f32 %v865_v9, 0.0  ;;  %v4656_v26 = vpop.eup %4655  ;;  %4663 = vrcp.f32 %v825_v10  ;;  %v866_v30 = vmul.f32 %v4654_v13, %v4956_v1 }
 0x163   : > { %v908_v4 = vor.u32 %v907_v51, %v903_v37  ;;  %v912_v5 = vrot.slane %v910_v63, 1  ;;  %v918_v20 = vshll.u32 %v5085_v8, 16  ;;  %4665 = vrcp.f32 %v826_v12  ;;  %v4658_v27 = vpop.eup %4657 }
 0x164   : > { %v5098_v29 = vpack.c.bf16 %v880_v23, %v879_v22  ;;  %v867_v18 = vmul.f32 %v4656_v26, %v4973_v16  ;;  %v4660_v32 = vpop.eup %4659  ;;  %v827_v33 = vadd.f32 1.0, %v4658_v27  ;;  %v922_v36 = vshrl.u32 %v5085_v8, 16 }
 0x165   : > { %v913_v11 = vsel %vm901_vm6, %v908_v4, %v912_v5  ;;  %v916_v50 = vor.u32 %v914_v43, %v912_v5  ;;  %v920_v28 = vrot.slane %v918_v20, 1  ;;  %v4662_v34 = vpop.eup %4661  ;;  %v881_v1 = vmax.f32 %v866_v30, 0.0 }
 0x166   : > { %4283 = vmatmul.mubr.msk.bf16.vlgmr.msra.gmra.mxu1 %vm611_vm4, %v913_v11  ;;  %v926_v38 = vshll.u32 %v5098_v29, 16  ;;  %v882_v39 = vmax.f32 %v867_v18, 0.0  ;;  %4667 = vrcp.f32 %v827_v33  ;;  %v868_v44 = vmul.f32 %v4660_v32, %v4962_v7 }
 0x167   : > { %4341 = vmatpush3.bf16.msra.mxu1 %v4492_v6  ;;  %4317 = vmatmul.mubr.msk.bf16.gmra.mxu0 %vm611_vm4, %v5074_v60  ;;  %v921_v31 = vsel %vm901_vm6, %v916_v50, %v920_v28  ;;  %v924_v16 = vor.u32 %v922_v36, %v920_v28  ;;  %v869_v45 = vmul.f32 %v4662_v34, %v4970_v15  ;;  %v930_v49 = vshrl.u32 %v5098_v29, 16 }
 0x168   : > { %4286 = vmatprep.mubr.msk.bf16.mxu1 %vm4774_vm3, %v4773_v14  ;;  %4320 = vmatprep.mubr.msk.bf16.mxu0 %vm4774_vm3, %v4773_v14  ;;  %v928_v40 = vrot.slane %v926_v38, 1  ;;  %v5112_v41 = vpack.c.bf16 %v882_v39, %v881_v1  ;;  %v883_v54 = vmax.f32 %v868_v44, 0.0  ;;  %v1199_v13 = vrot.slane %v5069_v57, 1  ;;  %v4493_v38 = vld [vmem:[%s6057_s5 + $0x18] sm:$0xff]  }
 0x169   : > { %v884_v7 = vmax.f32 %v869_v45, 0.0  ;;  %v1200_v43 = vrot.slane %v5074_v60, 1  ;;  %v1202_v22 = vrot.slane %v5085_v8, 1  ;;  %v1204_v57 = vrot.slane %v5098_v29, 1  ;;  %4370 = vmatprep.subr.bf16.mxu0 %v4493_v38 }
 0x16a   : > { %v929_v46 = vsel %vm901_vm6, %v924_v16, %v928_v40  ;;  %v934_v53 = vshll.u32 %v5112_v41, 16  ;;  %v932_v15 = vor.u32 %v930_v49, %v928_v40  ;;  %v938_v61 = vshrl.u32 %v5112_v41, 16  ;;  %4371 = vmatpush3.bf16.msra.mxu0 %v4493_v38 }
 0x16b   : > { %v893_v25 = vpack.c.bf16 %v884_v7, %v883_v54  ;;  %v1201_v20 = vsel %vm486_vm0, %v1199_v13, %v1200_v43  ;;  %v1203_v23 = vsel %vm486_vm0, %v1200_v43, %v1202_v22  ;;  %v1205_v60 = vsel %vm486_vm0, %v1202_v22, %v1204_v57 }
 0x16c   : > { %v936_v19 = vrot.slane %v934_v53, 1  ;;  %v1206_v26 = vrot.slane %v5112_v41, 1  ;;  %v4775_v38 = vmov 1983009808  }
 0x16d   : > { %v946_v63 = vshrl.u32 %v893_v25, 16  ;;  %v1208_v50 = vrot.slane %v893_v25, 1 }
 0x16e   : > { %4287 = vmatmul.mubr.msk.bf16.gmra.mxu1 %vm611_vm4, %v921_v31  ;;  %v937_v58 = vsel %vm901_vm6, %v932_v15, %v936_v19 }
 0x16f   : > { %4321 = vmatmul.mubr.msk.bf16.gmra.mxu0 %vm611_vm4, %v5085_v8  ;;  %4290 = vmatprep.mubr.msk.bf16.mxu1 %vm4774_vm3, %v4773_v14  ;;  %v4664_v47 = vpop.eup %4663  ;;  %v1207_v8 = vsel %vm486_vm0, %v1204_v57, %v1206_v26  ;;  %v1209_v27 = vsel %vm486_vm0, %v1206_v26, %v1208_v50 }
 0x170   : > { %4324 = vmatprep.mubr.msk.bf16.mxu0 %vm4774_vm3, %v4773_v14  ;;  %v4666_v48 = vpop.eup %4665  ;;  %v870_v55 = vmul.f32 %v4664_v47, %v4988_v35  ;;  %v942_v35 = vshll.u32 %v893_v25, 16 }
 0x171   : > { %v871_v56 = vmul.f32 %v4666_v48, %v5002_v52  ;;  %v940_v52 = vor.u32 %v938_v61, %v936_v19 }
 0x172   : > { %v885_v21 = vmax.f32 %v870_v55, 0.0  ;;  %v944_v62 = vrot.slane %v942_v35, 1 }
 0x173   : > { %v4668_v59 = vpop.eup %4667  ;;  %v886_v24 = vmax.f32 %v871_v56, 0.0 }
 0x174   : > { %v872_v37 = vmul.f32 %v4668_v59, %v4994_v42  ;;  %v945_v51 = vsel %vm901_vm6, %v940_v52, %v944_v62  ;;  %v948_v3 = vor.u32 %v946_v63, %v944_v62 }
 0x175   : > { %v894_v17 = vpack.c.bf16 %v886_v24, %v885_v21 }
 0x176   : > { %4291 = vmatmul.mubr.msk.bf16.gmra.mxu1 %vm611_vm4, %v929_v46  ;;  %v887_v2 = vmax.f32 %v872_v37, 0.0 }
 0x177   : > { %4325 = vmatmul.mubr.msk.bf16.gmra.mxu0 %vm611_vm4, %v5098_v29  ;;  %4294 = vmatprep.mubr.msk.bf16.mxu1 %vm4774_vm3, %v4773_v14  ;;  %v950_v0 = vshll.u32 %v894_v17, 16  ;;  %v954_v6 = vshrl.u32 %v894_v17, 16  ;;  %v1210_v28 = vrot.slane %v894_v17, 1 }
 0x178   : > { %4328 = vmatprep.mubr.msk.bf16.mxu0 %vm4774_vm3, %v4773_v14  ;;  %v895_v5 = vpack.c.bf16 %v887_v2, %v887_v2 }
 0x179   : > { %v952_v4 = vrot.slane %v950_v0, 1  ;;  %v1211_v29 = vsel %vm486_vm0, %v1208_v50, %v1210_v28 }
 0x17a   : > { %v958_v9 = vshll.u32 %v895_v5, 16  ;;  %v1212_v30 = vrot.slane %v895_v5, 1 }
 0x17b   : > { %v953_v42 = vsel %vm901_vm6, %v948_v3, %v952_v4  ;;  %v956_v10 = vor.u32 %v954_v6, %v952_v4 }
 0x17c   : > { %v960_v11 = vrot.slane %v958_v9, 1  ;;  %v1213_v18 = vsel %vm486_vm0, %v1210_v28, %v1212_v30 }
 0x17e   : > { %4295 = vmatmul.mubr.msk.bf16.gmra.mxu1 %vm611_vm4, %v937_v58  ;;  %v961_v12 = vsel %vm901_vm6, %v956_v10, %v960_v11 }
 0x17f   : > { %4329 = vmatmul.mubr.msk.bf16.gmra.mxu0 %vm611_vm4, %v5112_v41  ;;  %4298 = vmatprep.mubr.msk.bf16.mxu1 %vm4774_vm3, %v4773_v14 }
 0x180   : > { %4332 = vmatprep.mubr.msk.bf16.mxu0 %vm4774_vm3, %v4773_v14 }
 0x186   : > { %4299 = vmatmul.mubr.msk.bf16.gmra.mxu1 %vm611_vm4, %v945_v51 }
 0x187   : > { %4333 = vmatmul.mubr.msk.bf16.gmra.mxu0 %vm611_vm4, %v893_v25  ;;  %4302 = vmatprep.mubr.msk.bf16.mxu1 %vm4774_vm3, %v4773_v14 }
 0x188   : > { %4336 = vmatprep.mubr.msk.bf16.mxu0 %vm4774_vm3, %v4773_v14 }
 0x18e   : > { %4303 = vmatmul.mubr.msk.bf16.gmra.mxu1 %vm611_vm4, %v953_v42 }
 0x18f   : > { %4337 = vmatmul.mubr.msk.bf16.gmra.mxu0 %vm611_vm4, %v894_v17  ;;  %4306 = vmatprep.mubr.msk.bf16.mxu1 %vm4774_vm3, %v4773_v14 }
 0x196   : > { %4307 = vmatmul.mubr.msk.bf16.gmra.mxu1 %vm611_vm4, %v961_v12 }
 0x197   : > { %4342 = vmatprep.mubr.msk.bf16.mxu1 %vm4774_vm3, %v4773_v14 }
 0x19e   : > { %4343 = vmatmul.mubr.msk.bf16.vlgmr.msra.gmra.mxu1 %vm611_vm4, %v1201_v20 }
 0x19f   : > { %4346 = vmatprep.mubr.msk.bf16.mxu1 %vm4774_vm3, %v4773_v14 }
 0x1a6   : > { %4347 = vmatmul.mubr.msk.bf16.gmra.mxu1 %vm611_vm4, %v1203_v23 }
 0x1a7   : > { %4350 = vmatprep.mubr.msk.bf16.mxu1 %vm4774_vm3, %v4773_v14 }
 0x1ae   : > { %4351 = vmatmul.mubr.msk.bf16.gmra.mxu1 %vm611_vm4, %v1205_v60 }
 0x1af   : > { %4354 = vmatprep.mubr.msk.bf16.mxu1 %vm4774_vm3, %v4773_v14 }
 0x1b6   : > { %4355 = vmatmul.mubr.msk.bf16.gmra.mxu1 %vm611_vm4, %v1207_v8 }
 0x1b7   : > { %4358 = vmatprep.mubr.msk.bf16.mxu1 %vm4774_vm3, %v4773_v14 }
 0x1be   : > { %4359 = vmatmul.mubr.msk.bf16.gmra.mxu1 %vm611_vm4, %v1209_v27 }
 0x1bf   : > { %4362 = vmatprep.mubr.msk.bf16.mxu1 %vm4774_vm3, %v4773_v14 }
 0x1c6   : > { %4363 = vmatmul.mubr.msk.bf16.gmra.mxu1 %vm611_vm4, %v1211_v29 }
 0x1c7   : > { %4366 = vmatprep.mubr.msk.bf16.mxu1 %vm4774_vm3, %v4773_v14  ;;  %vm3243_vm3 = vcmask 1043456  }
 0x1ce   : > { %4367 = vmatmul.mubr.msk.bf16.gmra.mxu1 %vm611_vm4, %v1213_v18  ;;  %vm3375_vm4 = vcmask 1047557  }
 0x21f   : > { %v1132_v31 = vpop.f32.mrf.mxu0 }
 0x221   : > { %v4314_v32 = vpop.f32.mrf.mxu0 }
 0x223   : > { %v1135_v33 = vpop.f32.mrf.mxu0 }
 0x225   : > { %v4315_v34 = vpop.f32.mrf.mxu0 }
 0x226   : > { %v1023_v36 = vpop.f32.mrf.mxu1 }
 0x227   : > { %v5188_v1 = vadd.f32 %v1132_v31, %v1023_v36  ;;  %v1140_v39 = vpop.f32.mrf.mxu0  ;;  %v4494_v36 = vld [vmem:[%s6057_s5 + $0x28] sm:$0xff]  }
 0x228   : > { %v4284_v16 = vpop.f32.mrf.mxu1  ;;  %4394 = vmatprep.subr.bf16.mxu1 %v4494_v36 }
 0x229   : > { %v4318_v14 = vpop.f32.mrf.mxu0  ;;  %v6064_v16 = vlaneseq  ;;  %4395 = vmatpush3.bf16.msra.mxu1 %v4494_v36 }
 0x22a   : > { %v1026_v40 = vpop.f32.mrf.mxu1 }
 0x22b   : > { %v5190_v41 = vadd.f32 %v1135_v33, %v1026_v40  ;;  %v1143_v44 = vpop.f32.mrf.mxu0 }
 0x22c   : > { %v4285_v45 = vpop.f32.mrf.mxu1 }
 0x22d   : > { %v4319_v46 = vpop.f32.mrf.mxu0 }
 0x22e   : > { %v1031_v47 = vpop.f32.mrf.mxu1  ;;  %v5220_v46 = vshrl.u32 %v6064_v16, 7 }
 0x22f   : > { %v5192_v48 = vadd.f32 %v1140_v39, %v1031_v47  ;;  %v1148_v49 = vpop.f32.mrf.mxu0  ;;  %v1395_v39 = vunpack.c.l.s4 %v4775_v38 }
 0x230   : > { %v4288_v53 = vpop.f32.mrf.mxu1  ;;  %6083 = vst [vmem:[#allocation5_spill] sm:$0xff] %v5220_v46 }
 0x231   : > { %v4322_v54 = vpop.f32.mrf.mxu0  ;;  %v1396_v45 = vunpack.c.0.s8 %v1395_v39 }
 0x232   : > { %v1034_v7 = vpop.f32.mrf.mxu1 }
 0x233   : > { %v5194_v15 = vadd.f32 %v1143_v44, %v1034_v7  ;;  %v1151_v55 = vpop.f32.mrf.mxu0 }
 0x234   : > { %v4289_v56 = vpop.f32.mrf.mxu1 }
 0x235   : > { %v4323_v19 = vpop.f32.mrf.mxu0 }
 0x236   : > { %v1039_v25 = vpop.f32.mrf.mxu1 }
 0x237   : > { %v5196_v58 = vadd.f32 %v1148_v49, %v1039_v25  ;;  %v1156_v59 = vpop.f32.mrf.mxu0  ;;  %v5225_v49 = vld [vmem:[%s6056_s4] ss:$0 sm:$0xff] }
 0x238   : > { %v4292_v21 = vpop.f32.mrf.mxu1 }
 0x239   : > { %v4326_v24 = vpop.f32.mrf.mxu0 }
 0x23a   : > { %v1042_v61 = vpop.f32.mrf.mxu1 }
 0x23b   : > { %v5198_v35 = vadd.f32 %v1151_v55, %v1042_v61  ;;  %v1159_v52 = vpop.f32.mrf.mxu0  ;;  %v5230_v55 = vsub.s32 %v1396_v45, %v5220_v46 }
 0x23c   : > { %v4293_v17 = vpop.f32.mrf.mxu1 }
 0x23d   : > { %v4327_v62 = vpop.f32.mrf.mxu0 }
 0x23e   : > { %v1047_v37 = vpop.f32.mrf.mxu1 }
 0x23f   : > { %v5200_v51 = vadd.f32 %v1156_v59, %v1047_v37  ;;  %v1164_v63 = vpop.f32.mrf.mxu0 }
 0x240   : > { %v4296_v0 = vpop.f32.mrf.mxu1 }
 0x241   : > { %v4330_v2 = vpop.f32.mrf.mxu0 }
 0x242   : > { %v1050_v3 = vpop.f32.mrf.mxu1 }
 0x243   : > { %v5202_v4 = vadd.f32 %v1159_v52, %v1050_v3  ;;  %v1167_v5 = vpop.f32.mrf.mxu0 }
 0x244   : > { %v4297_v42 = vpop.f32.mrf.mxu1 }
 0x245   : > { %v4331_v6 = vpop.f32.mrf.mxu0 }
 0x246   : > { %v1055_v9 = vpop.f32.mrf.mxu1 }
 0x247   : > { %v5204_v10 = vadd.f32 %v1164_v63, %v1055_v9  ;;  %v1172_v11 = vpop.f32.mrf.mxu0 }
 0x248   : > { %v4300_v12 = vpop.f32.mrf.mxu1 }
 0x249   : > { %v4334_v13 = vpop.f32.mrf.mxu0 }
 0x24a   : > { %v1058_v43 = vpop.f32.mrf.mxu1 }
 0x24b   : > { %v5206_v20 = vadd.f32 %v1167_v5, %v1058_v43  ;;  %v1175_v22 = vpop.f32.mrf.mxu0 }
 0x24c   : > { %v4301_v23 = vpop.f32.mrf.mxu1 }
 0x24d   : > { %v4335_v57 = vpop.f32.mrf.mxu0 }
 0x24e   : > { %v1063_v60 = vpop.f32.mrf.mxu1 }
 0x24f   : > { %v5208_v26 = vadd.f32 %v1172_v11, %v1063_v60  ;;  %v1180_v8 = vpop.f32.mrf.mxu0 }
 0x250   : > { %v4304_v50 = vpop.f32.mrf.mxu1 }
 0x251   : > { %v4338_v27 = vpop.f32.mrf.mxu0 }
 0x252   : > { %v1066_v28 = vpop.f32.mrf.mxu1 }
 0x253   : > { %v5210_v29 = vadd.f32 %v1175_v22, %v1066_v28  ;;  %v1183_v30 = vpop.f32.mrf.mxu0 }
 0x254   : > { %v4305_v18 = vpop.f32.mrf.mxu1 }
 0x255   : > { %v4339_v31 = vpop.f32.mrf.mxu0 }
 0x256   : > { %v1071_v32 = vpop.f32.mrf.mxu1 }
 0x257   : > { %v5212_v33 = vadd.f32 %v1180_v8, %v1071_v32 }
 0x258   : > { %v4308_v34 = vpop.f32.mrf.mxu1 }
 0x25a   : > { %v1074_v14 = vpop.f32.mrf.mxu1 }
 0x25b   : > { %v5217_v40 = vadd.f32 %v1183_v30, %v1074_v14 }
 0x25c   : > { %v4309_v44 = vpop.f32.mrf.mxu1 }
 0x25e   : > { %v1275_v47 = vpop.f32.mrf.mxu1 }
 0x25f   : > { %v1330_v53 = vadd.f32 %v1275_v47, %v5188_v1 }
 0x260   : > { %v4344_v54 = vpop.f32.mrf.mxu1 }
 0x261   : > { %v1351_v7 = vadd.f32 %v5225_v49, %v1330_v53 }
 0x262   : > { %v1278_v56 = vpop.f32.mrf.mxu1 }
 0x263   : > { %v1365_v19 = vmax.f32 %v1351_v7, 0.0  ;;  %v1331_v25 = vadd.f32 %v1278_v56, %v5190_v41 }
 0x264   : > { %v4345_v59 = vpop.f32.mrf.mxu1 }
 0x265   : > { %v1393_v21 = vcombine.high %v1365_v19, %v1365_v19  ;;  %v1400_v24 = vrot.slane %v1365_v19, %v5230_v55  ;;  %v1352_v61 = vadd.f32 %v5225_v49, %v1331_v25 }
 0x266   : > { %v1283_v52 = vpop.f32.mrf.mxu1 }
 0x267   : > { %v1407_v1 = vrot.slane %v1393_v21, %v5230_v55  ;;  %v1408_v17 = vcombine.high %v1400_v24, %v1400_v24  ;;  %v1688_v62 = vsel %vm1687_vm7, %v1400_v24, -inf  ;;  %v1366_v37 = vmax.f32 %v1352_v61, 0.0 }
 0x268   : > { %v1689_v63 = vrot.slane %v1688_v62, 4  ;;  %v1332_v0 = vadd.f32 %v1283_v52, %v5192_v48  ;;  %v4348_v2 = vpop.f32.mrf.mxu1 }
 0x269   : > { %v1409_v3 = vcombine.high %v1407_v1, %v1407_v1  ;;  %v1695_v41 = vsel %vm1687_vm7, %v1408_v17, -inf  ;;  %v1702_v5 = vsel %vm1687_vm7, %v1407_v1, -inf  ;;  %v1410_v42 = vcombine.high %v1366_v37, %v1366_v37 }
 0x26a   : > { %v1690_v6 = vmax.f32 %v1688_v62, %v1689_v63  ;;  %v1696_v9 = vrot.slane %v1695_v41, 4  ;;  %v1703_v11 = vrot.slane %v1702_v5, 4  ;;  %v1417_v12 = vrot.slane %v1366_v37, %v5230_v55  ;;  %v1286_v13 = vpop.f32.mrf.mxu1 }
 0x26b   : > { %v1709_v43 = vsel %vm1687_vm7, %v1409_v3, -inf  ;;  %v1424_v22 = vrot.slane %v1410_v42, %v5230_v55  ;;  %v1353_v23 = vadd.f32 %v5225_v49, %v1332_v0  ;;  %v5245_v48 = vadd.f32 %v1286_v13, %v5194_v15 }
 0x26c   : > { %v1691_v57 = vrot.slane %v1690_v6, 2  ;;  %v1697_v60 = vmax.f32 %v1695_v41, %v1696_v9  ;;  %v1704_v8 = vmax.f32 %v1702_v5, %v1703_v11  ;;  %v1710_v50 = vrot.slane %v1709_v43, 4  ;;  %v4349_v27 = vpop.f32.mrf.mxu1 }
 0x26d   : > { %v1425_v28 = vcombine.high %v1417_v12, %v1417_v12  ;;  %v1426_v30 = vcombine.high %v1424_v22, %v1424_v22  ;;  %v1716_v18 = vsel %vm1687_vm7, %v1417_v12, -inf  ;;  %v1730_v31 = vsel %vm1687_vm7, %v1424_v22, -inf }
 0x26e   : > { %v1692_v32 = vmax.f32 %v1690_v6, %v1691_v57  ;;  %v1698_v34 = vrot.slane %v1697_v60, 2  ;;  %v1705_v36 = vrot.slane %v1704_v8, 2  ;;  %v1711_v38 = vmax.f32 %v1709_v43, %v1710_v50  ;;  %v5249_v39 = vpop.f32.mrf.mxu1 }
 0x26f   : > { %v1717_v15 = vrot.slane %v1716_v18, 4  ;;  %v1723_v14 = vsel %vm1687_vm7, %v1425_v28, -inf  ;;  %v1731_v44 = vrot.slane %v1730_v31, 4  ;;  %v1737_v45 = vsel %vm1687_vm7, %v1426_v30, -inf  ;;  %v4495_v30 = vld [vmem:[%s6057_s5 + $0x10] sm:$0xff]  }
 0x270   : > { %v1693_v47 = vrot.slane %v1692_v32, 1  ;;  %v1699_v53 = vmax.f32 %v1697_v60, %v1698_v34  ;;  %v1706_v54 = vmax.f32 %v1704_v8, %v1705_v36  ;;  %v1712_v7 = vrot.slane %v1711_v38, 2  ;;  %v4352_v56 = vpop.f32.mrf.mxu1  ;;  %4372 = vmatprep.subr.bf16.mxu0 %v4495_v30 }
 0x271   : > { %v1718_v19 = vmax.f32 %v1716_v18, %v1717_v15  ;;  %v1724_v25 = vrot.slane %v1723_v14, 4  ;;  %v1732_v59 = vmax.f32 %v1730_v31, %v1731_v44  ;;  %v1738_v21 = vrot.slane %v1737_v45, 4  ;;  %4373 = vmatpush3.bf16.msra.mxu0 %v4495_v30 }
 0x272   : > { %v1694_v24 = vmax.f32 %v1692_v32, %v1693_v47  ;;  %v1700_v61 = vrot.slane %v1699_v53, 1  ;;  %v1707_v52 = vrot.slane %v1706_v54, 1  ;;  %v1713_v1 = vmax.f32 %v1711_v38, %v1712_v7  ;;  %v5253_v17 = vpop.f32.mrf.mxu1 }
 0x273   : > { %v1719_v62 = vrot.slane %v1718_v19, 2  ;;  %v1725_v37 = vmax.f32 %v1723_v14, %v1724_v25  ;;  %v1733_v63 = vrot.slane %v1732_v59, 2  ;;  %v1739_v0 = vmax.f32 %v1737_v45, %v1738_v21 }
 0x274   : > { %v1701_v2 = vmax.f32 %v1699_v53, %v1700_v61  ;;  %v1708_v3 = vmax.f32 %v1706_v54, %v1707_v52  ;;  %v1714_v41 = vrot.slane %v1713_v1, 1  ;;  %v2080_v5 = vpack.c.bf16 %v1694_v24, %v1694_v24  ;;  %v4353_v42 = vpop.f32.mrf.mxu1 }
 0x275   : > { %v1720_v6 = vmax.f32 %v1718_v19, %v1719_v62  ;;  %v1726_v9 = vrot.slane %v1725_v37, 2  ;;  %v1734_v11 = vmax.f32 %v1732_v59, %v1733_v63  ;;  %v1740_v12 = vrot.slane %v1739_v0, 2 }
 0x276   : > { %v1715_v13 = vmax.f32 %v1713_v1, %v1714_v41  ;;  %v2081_v43 = vpack.c.bf16 %v1701_v2, %v1701_v2  ;;  %v2082_v22 = vpack.c.bf16 %v1708_v3, %v1708_v3  ;;  %v2401_v57 = vunpack.c.l.b16 %v2080_v5  ;;  %v5255_v60 = vpop.f32.mrf.mxu1 }
 0x277   : > { %v1721_v8 = vrot.slane %v1720_v6, 1  ;;  %v1727_v50 = vmax.f32 %v1725_v37, %v1726_v9  ;;  %v1735_v27 = vrot.slane %v1734_v11, 1  ;;  %v1741_v28 = vmax.f32 %v1739_v0, %v1740_v12 }
 0x278   : > { %v2083_v18 = vpack.c.bf16 %v1715_v13, %v1715_v13  ;;  %v2199_v31 = vunpack.c.l.b16 %v2081_v43  ;;  %v2200_v32 = vunpack.c.l.b16 %v2082_v22  ;;  %v1367_v34 = vmax.f32 %v1353_v23, 0.0  ;;  %v4356_v36 = vpop.f32.mrf.mxu1 }
 0x279   : > { %v1722_v38 = vmax.f32 %v1720_v6, %v1721_v8  ;;  %v1728_v15 = vrot.slane %v1727_v50, 1  ;;  %v1736_v14 = vmax.f32 %v1734_v11, %v1735_v27  ;;  %v1742_v44 = vrot.slane %v1741_v28, 1 }
 0x27a   : > { %v5260_v45 = vunpack.c.l.b16 %v2083_v18  ;;  %v5263_v47 = vsel %vm2253_vm8, %v2200_v32, %v2199_v31  ;;  %v2402_v53 = vsel %vm2253_vm8, %v2199_v31, %v2401_v57  ;;  %v1427_v54 = vcombine.high %v1367_v34, %v1367_v34  ;;  %v5266_v7 = vpop.f32.mrf.mxu1 }
 0x27b   : > { %v5269_v56 = vsel %vm2255_vm9, %v2200_v32, %v2402_v53  ;;  %v1729_v23 = vmax.f32 %v1727_v50, %v1728_v15  ;;  %v5271_v19 = vmax.f32 %v1741_v28, %v1742_v44  ;;  %v2084_v25 = vpack.c.bf16 %v1722_v38, %v1722_v38 }
 0x27c   : > { %6084 = vst [vmem:[#allocation6_spill] sm:$0xff] %v5269_v56  ;;  %v2548_v59 = vsel %vm2253_vm8, %v5260_v45, %v2200_v32  ;;  %v2086_v21 = vpack.c.bf16 %v1736_v14, %v1736_v14  ;;  %v1434_v24 = vrot.slane %v1367_v34, %v5230_v55  ;;  %v1441_v61 = vrot.slane %v1427_v54, %v5230_v55  ;;  %v4357_v52 = vpop.f32.mrf.mxu1 }
 0x27d   : > { %v2085_v1 = vpack.c.bf16 %v1729_v23, %v1729_v23  ;;  %v5277_v62 = vunpack.c.l.b16 %v2084_v25  ;;  %v1354_v37 = vadd.f32 %v5225_v49, %v5245_v48  ;;  %v1334_v63 = vadd.f32 %v5249_v39, %v5196_v58 }
 0x27e   : > { %v5283_v0 = vunpack.c.l.b16 %v2086_v21  ;;  %v1442_v2 = vcombine.high %v1434_v24, %v1434_v24  ;;  %v1443_v3 = vcombine.high %v1441_v61, %v1441_v61  ;;  %v1744_v41 = vsel %vm1687_vm7, %v1434_v24, -inf  ;;  %v5286_v5 = vpop.f32.mrf.mxu1 }
 0x27f   : > { %v5288_v42 = vunpack.c.l.b16 %v2085_v1  ;;  %v5292_v6 = vsel %vm2255_vm9, %v5277_v62, %v2548_v59  ;;  %v1745_v9 = vrot.slane %v1744_v41, 4  ;;  %v1758_v48 = vsel %vm1687_vm7, %v1441_v61, -inf }
 0x280   : > { %v1751_v11 = vsel %vm1687_vm7, %v1442_v2, -inf  ;;  %v1759_v58 = vrot.slane %v1758_v48, 4  ;;  %v1765_v39 = vsel %vm1687_vm7, %v1443_v3, -inf  ;;  %v1368_v12 = vmax.f32 %v1354_v37, 0.0  ;;  %v4360_v13 = vpop.f32.mrf.mxu1 }
 0x281   : > { %v1746_v43 = vmax.f32 %v1744_v41, %v1745_v9  ;;  %v1752_v22 = vrot.slane %v1751_v11, 4  ;;  %v1766_v57 = vrot.slane %v1765_v39, 4  ;;  %v1355_v8 = vadd.f32 %v5225_v49, %v1334_v63 }
 0x282   : > { %v1760_v50 = vmax.f32 %v1758_v48, %v1759_v58  ;;  %v1444_v27 = vcombine.high %v1368_v12, %v1368_v12  ;;  %v1451_v28 = vrot.slane %v1368_v12, %v5230_v55  ;;  %v5301_v30 = vadd.f32 %v5253_v17, %v5198_v35  ;;  %v5303_v18 = vpop.f32.mrf.mxu1 }
 0x283   : > { %v1747_v31 = vrot.slane %v1746_v43, 2  ;;  %v1753_v32 = vmax.f32 %v1751_v11, %v1752_v22  ;;  %v1767_v34 = vmax.f32 %v1765_v39, %v1766_v57  ;;  %v1369_v36 = vmax.f32 %v1355_v8, 0.0 }
 0x284   : > { %v1761_v38 = vrot.slane %v1760_v50, 2  ;;  %v1458_v15 = vrot.slane %v1444_v27, %v5230_v55  ;;  %v1459_v14 = vcombine.high %v1451_v28, %v1451_v28  ;;  %v1772_v44 = vsel %vm1687_vm7, %v1451_v28, -inf  ;;  %v4361_v53 = vpop.f32.mrf.mxu1 }
 0x285   : > { %v1748_v54 = vmax.f32 %v1746_v43, %v1747_v31  ;;  %v1754_v23 = vrot.slane %v1753_v32, 2  ;;  %v1768_v25 = vrot.slane %v1767_v34, 2  ;;  %v1773_v59 = vrot.slane %v1772_v44, 4 }
 0x286   : > { %v1762_v21 = vmax.f32 %v1760_v50, %v1761_v38  ;;  %v1460_v35 = vcombine.high %v1458_v15, %v1458_v15  ;;  %v1779_v17 = vsel %vm1687_vm7, %v1459_v14, -inf  ;;  %v1786_v24 = vsel %vm1687_vm7, %v1458_v15, -inf  ;;  %v5309_v61 = vpop.f32.mrf.mxu1 }
 0x287   : > { %v1749_v52 = vrot.slane %v1748_v54, 1  ;;  %v1755_v1 = vmax.f32 %v1753_v32, %v1754_v23  ;;  %v1769_v37 = vmax.f32 %v1767_v34, %v1768_v25  ;;  %v1774_v63 = vmax.f32 %v1772_v44, %v1773_v59 }
 0x288   : > { %v1763_v2 = vrot.slane %v1762_v21, 1  ;;  %v1780_v3 = vrot.slane %v1779_v17, 4  ;;  %v1787_v41 = vrot.slane %v1786_v24, 4  ;;  %v1793_v9 = vsel %vm1687_vm7, %v1460_v35, -inf  ;;  %v4364_v48 = vpop.f32.mrf.mxu1 }
 0x289   : > { %v5312_v11 = vmax.f32 %v1748_v54, %v1749_v52  ;;  %v1756_v58 = vrot.slane %v1755_v1, 1  ;;  %v1770_v39 = vrot.slane %v1769_v37, 1  ;;  %v1775_v12 = vrot.slane %v1774_v63, 2 }
 0x28a   : > { %v1764_v13 = vmax.f32 %v1762_v21, %v1763_v2  ;;  %v1781_v43 = vmax.f32 %v1779_v17, %v1780_v3  ;;  %v1788_v22 = vmax.f32 %v1786_v24, %v1787_v41  ;;  %v1794_v57 = vrot.slane %v1793_v9, 4  ;;  %v5314_v8 = vpop.f32.mrf.mxu1 }
 0x28b   : > { %v1757_v50 = vmax.f32 %v1755_v1, %v1756_v58  ;;  %v1771_v27 = vmax.f32 %v1769_v37, %v1770_v39  ;;  %v1776_v31 = vmax.f32 %v1774_v63, %v1775_v12  ;;  %v1461_v23 = vcombine.high %v1369_v36, %v1369_v36  ;;  %v4496_v63 = vld [vmem:[%s6057_s5 + $0x20] sm:$0xff]  }
 0x28c   : > { %v2090_v32 = vpack.c.bf16 %v1764_v13, %v1764_v13  ;;  %v1782_v34 = vrot.slane %v1781_v43, 2  ;;  %v1789_v38 = vrot.slane %v1788_v22, 2  ;;  %v1795_v15 = vmax.f32 %v1793_v9, %v1794_v57  ;;  %v4365_v14 = vpop.f32.mrf.mxu1  ;;  %4396 = vmatprep.subr.bf16.mxu1 %v4496_v63  ;;  %v4497_v13 = vld [vmem:[%s6057_s5 + $0x8] sm:$0xff]  }
 0x28d   : > { %v2089_v44 = vpack.c.bf16 %v1757_v50, %v1757_v50  ;;  %v2091_v53 = vpack.c.bf16 %v1771_v27, %v1771_v27  ;;  %v1777_v54 = vrot.slane %v1776_v31, 1  ;;  %v1468_v37 = vrot.slane %v1369_v36, %v5230_v55  ;;  %4397 = vmatpush3.bf16.msra.mxu1 %v4496_v63  ;;  %4382 = vmatprep.subr.bf16.mxu0 %v4497_v13 }
 0x28e   : > { %v5318_v25 = vunpack.c.l.b16 %v2090_v32  ;;  %v1783_v59 = vmax.f32 %v1781_v43, %v1782_v34  ;;  %v1790_v21 = vmax.f32 %v1788_v22, %v1789_v38  ;;  %v1796_v35 = vrot.slane %v1795_v15, 2  ;;  %v5320_v17 = vpop.f32.mrf.mxu1 }
 0x28f   : > { %v5322_v24 = vunpack.c.l.b16 %v2089_v44  ;;  %v5324_v52 = vunpack.c.l.b16 %v2091_v53  ;;  %v1778_v1 = vmax.f32 %v1776_v31, %v1777_v54  ;;  %v1475_v9 = vrot.slane %v1461_v23, %v5230_v55 }
 0x290   : > { %6085 = vst [vmem:[#allocation7_spill] sm:$0xff] %v5318_v25  ;;  %v1784_v2 = vrot.slane %v1783_v59, 1  ;;  %v1791_v3 = vrot.slane %v1790_v21, 1  ;;  %v1797_v41 = vmax.f32 %v1795_v15, %v1796_v35  ;;  %v4368_v48 = vpop.f32.mrf.mxu1  ;;  %v1476_v12 = vcombine.high %v1468_v37, %v1468_v37 }
 0x291   : > { %v5334_v58 = vsel %vm2253_vm8, %v5318_v25, %v5322_v24  ;;  %v2555_v39 = vsel %vm2253_vm8, %v5324_v52, %v5318_v25  ;;  %v2092_v36 = vpack.c.bf16 %v1778_v1, %v1778_v1  ;;  %v1477_v50 = vcombine.high %v1475_v9, %v1475_v9 }
 0x292   : > { %v1785_v43 = vmax.f32 %v1783_v59, %v1784_v2  ;;  %v1792_v22 = vmax.f32 %v1790_v21, %v1791_v3  ;;  %v1798_v57 = vrot.slane %v1797_v41, 1  ;;  %v5342_v27 = vpop.f32.mrf.mxu1  ;;  %v1800_v32 = vsel %vm1687_vm7, %v1468_v37, -inf }
 0x293   : > { %v5344_v31 = vunpack.c.l.b16 %v2092_v36  ;;  %v1807_v34 = vsel %vm1687_vm7, %v1476_v12, -inf  ;;  %v1814_v38 = vsel %vm1687_vm7, %v1475_v9, -inf  ;;  %v1801_v53 = vrot.slane %v1800_v32, 4 }
 0x294   : > { %v5349_v15 = vmax.f32 %v1797_v41, %v1798_v57  ;;  %v2093_v14 = vpack.c.bf16 %v1785_v43, %v1785_v43  ;;  %v2094_v44 = vpack.c.bf16 %v1792_v22, %v1792_v22  ;;  %v4369_v54 = vpop.f32.mrf.mxu1  ;;  %v1808_v59 = vrot.slane %v1807_v34, 4 }
 0x295   : > { %v5353_v23 = vsel %vm2255_vm9, %v5344_v31, %v2555_v39  ;;  %v1815_v21 = vrot.slane %v1814_v38, 4  ;;  %v1821_v35 = vsel %vm1687_vm7, %v1477_v50, -inf  ;;  %v1802_v63 = vmax.f32 %v1800_v32, %v1801_v53 }
 0x296   : > { %v5356_v1 = vunpack.c.l.b16 %v2093_v14  ;;  %v5358_v37 = vunpack.c.l.b16 %v2094_v44  ;;  %v1822_v2 = vrot.slane %v1821_v35, 4  ;;  %v1809_v3 = vmax.f32 %v1807_v34, %v1808_v59 }
 0x297   : > { %v1816_v41 = vmax.f32 %v1814_v38, %v1815_v21  ;;  %v1356_v9 = vadd.f32 %v5225_v49, %v5301_v30  ;;  %v1336_v48 = vadd.f32 %v5255_v60, %v5200_v51  ;;  %v1803_v39 = vrot.slane %v1802_v63, 2 }
 0x298   : > { %v1823_v36 = vmax.f32 %v1821_v35, %v1822_v2  ;;  %v1337_v12 = vadd.f32 %v5266_v7, %v5202_v4  ;;  %v1338_v13 = vadd.f32 %v5286_v5, %v5204_v10  ;;  %v1810_v43 = vrot.slane %v1809_v3, 2 }
 0x299   : > { %v1817_v22 = vrot.slane %v1816_v41, 2  ;;  %v1370_v57 = vmax.f32 %v1356_v9, 0.0  ;;  %v1357_v50 = vadd.f32 %v5225_v49, %v1336_v48  ;;  %v1804_v32 = vmax.f32 %v1802_v63, %v1803_v39 }
 0x29a   : > { %v1824_v34 = vrot.slane %v1823_v36, 2  ;;  %v1358_v30 = vadd.f32 %v5225_v49, %v1337_v12  ;;  %v5371_v38 = vadd.f32 %v5225_v49, %v1338_v13  ;;  %v5373_v51 = vmax.f32 %v1809_v3, %v1810_v43 }
 0x29b   : > { %v1818_v60 = vmax.f32 %v1816_v41, %v1817_v22  ;;  %v1478_v14 = vcombine.high %v1370_v57, %v1370_v57  ;;  %v1485_v4 = vrot.slane %v1370_v57, %v5230_v55  ;;  %v1805_v7 = vrot.slane %v1804_v32, 1 }
 0x29c   : > { %v1825_v10 = vmax.f32 %v1823_v36, %v1824_v34  ;;  %v1371_v5 = vmax.f32 %v1357_v50, 0.0  ;;  %v5376_v44 = vmax.f32 %v1358_v30, 0.0 }
 0x29d   : > { %v1819_v54 = vrot.slane %v1818_v60, 1  ;;  %v1492_v59 = vrot.slane %v1478_v14, %v5230_v55  ;;  %v1493_v21 = vcombine.high %v1485_v4, %v1485_v4  ;;  %v5380_v35 = vmax.f32 %v1804_v32, %v1805_v7 }
 0x29e   : > { %v1826_v63 = vrot.slane %v1825_v10, 1  ;;  %v1828_v2 = vsel %vm1687_vm7, %v1485_v4, -inf  ;;  %v1495_v3 = vcombine.high %v1371_v5, %v1371_v5 }
 0x29f   : > { %v1820_v41 = vmax.f32 %v1818_v60, %v1819_v54  ;;  %v1494_v9 = vcombine.high %v1492_v59, %v1492_v59  ;;  %v1829_v48 = vrot.slane %v1828_v2, 4  ;;  %v1835_v39 = vsel %vm1687_vm7, %v1493_v21, -inf }
 0x2a0   : > { %v1827_v36 = vmax.f32 %v1825_v10, %v1826_v63  ;;  %v1836_v13 = vrot.slane %v1835_v39, 4  ;;  %v1842_v43 = vsel %vm1687_vm7, %v1492_v59, -inf  ;;  %v1502_v60 = vrot.slane %v1371_v5, %v5230_v55 }
 0x2a1   : > { %v2098_v22 = vpack.c.bf16 %v1820_v41, %v1820_v41  ;;  %v1830_v57 = vmax.f32 %v1828_v2, %v1829_v48  ;;  %v1843_v50 = vrot.slane %v1842_v43, 4  ;;  %v1849_v32 = vsel %vm1687_vm7, %v1494_v9, -inf }
 0x2a2   : > { %v2099_v34 = vpack.c.bf16 %v1827_v36, %v1827_v36  ;;  %v1837_v30 = vmax.f32 %v1835_v39, %v1836_v13  ;;  %v1850_v14 = vrot.slane %v1849_v32, 4  ;;  %v1509_v54 = vrot.slane %v1495_v3, %v5230_v55 }
 0x2a3   : > { %v5389_v4 = vunpack.c.l.b16 %v2098_v22  ;;  %v1831_v7 = vrot.slane %v1830_v57, 2  ;;  %v1844_v10 = vmax.f32 %v1842_v43, %v1843_v50  ;;  %v1510_v41 = vcombine.high %v1502_v60, %v1502_v60 }
 0x2a4   : > { %v5392_v21 = vunpack.c.l.b16 %v2099_v34  ;;  %v1838_v63 = vrot.slane %v1837_v30, 2  ;;  %v1851_v59 = vmax.f32 %v1849_v32, %v1850_v14  ;;  %v1511_v16 = vcombine.high %v1509_v54, %v1509_v54 }
 0x2a5   : > { %6086 = vst [vmem:[#allocation8_spill] sm:$0xff] %v5389_v4  ;;  %v1832_v2 = vmax.f32 %v1830_v57, %v1831_v7  ;;  %v1845_v48 = vrot.slane %v1844_v10, 2  ;;  %v1856_v9 = vsel %vm1687_vm7, %v1502_v60, -inf  ;;  %v1863_v3 = vsel %vm1687_vm7, %v1510_v41, -inf }
 0x2a6   : > { %6087 = vst [vmem:[#allocation9_spill] sm:$0xff] %v5392_v21  ;;  %v2562_v5 = vsel %vm2253_vm8, %v5392_v21, %v5389_v4  ;;  %v1839_v39 = vmax.f32 %v1837_v30, %v1838_v63  ;;  %v1852_v36 = vrot.slane %v1851_v59, 2  ;;  %v1857_v13 = vrot.slane %v1856_v9, 4 }
 0x2a7   : > { %v1833_v43 = vrot.slane %v1832_v2, 1  ;;  %v1846_v22 = vmax.f32 %v1844_v10, %v1845_v48  ;;  %v1870_v50 = vsel %vm1687_vm7, %v1509_v54, -inf  ;;  %v1864_v14 = vrot.slane %v1863_v3, 4 }
 0x2a8   : > { %v1840_v32 = vrot.slane %v1839_v39, 1  ;;  %v1853_v57 = vmax.f32 %v1851_v59, %v1852_v36  ;;  %v1858_v34 = vmax.f32 %v1856_v9, %v1857_v13  ;;  %v1871_v53 = vrot.slane %v1870_v50, 4 }
 0x2a9   : > { %v1834_v60 = vmax.f32 %v1832_v2, %v1833_v43  ;;  %v1847_v7 = vrot.slane %v1846_v22, 1  ;;  %v1877_v12 = vsel %vm1687_vm7, %v1511_v16, -inf  ;;  %v1865_v10 = vmax.f32 %v1863_v3, %v1864_v14 }
 0x2aa   : > { %v1841_v30 = vmax.f32 %v1839_v39, %v1840_v32  ;;  %v1854_v63 = vrot.slane %v1853_v57, 1  ;;  %v1859_v28 = vrot.slane %v1858_v34, 2  ;;  %v1872_v41 = vmax.f32 %v1870_v50, %v1871_v53 }
 0x2ab   : > { %v1848_v48 = vmax.f32 %v1846_v22, %v1847_v7  ;;  %v2100_v46 = vpack.c.bf16 %v1834_v60, %v1834_v60  ;;  %v1878_v25 = vrot.slane %v1877_v12, 4  ;;  %v1866_v36 = vrot.slane %v1865_v10, 2 }
 0x2ac   : > { %v1855_v54 = vmax.f32 %v1853_v57, %v1854_v63  ;;  %v2101_v56 = vpack.c.bf16 %v1841_v30, %v1841_v30  ;;  %v1860_v59 = vmax.f32 %v1858_v34, %v1859_v28  ;;  %v1873_v2 = vrot.slane %v1872_v41, 2 }
 0x2ad   : > { %v2102_v9 = vpack.c.bf16 %v1848_v48, %v1848_v48  ;;  %v5401_v13 = vunpack.c.l.b16 %v2100_v46  ;;  %v1879_v43 = vmax.f32 %v1877_v12, %v1878_v25  ;;  %v1867_v32 = vmax.f32 %v1865_v10, %v1866_v36 }
 0x2ae   : > { %v2103_v16 = vpack.c.bf16 %v1855_v54, %v1855_v54  ;;  %v5403_v21 = vunpack.c.l.b16 %v2101_v56  ;;  %v1861_v39 = vrot.slane %v1860_v59, 1  ;;  %v1874_v22 = vmax.f32 %v1872_v41, %v1873_v2 }
 0x2af   : > { %6088 = vst [vmem:[#allocation10_spill] sm:$0xff] %v5401_v13  ;;  %v5405_v3 = vunpack.c.l.b16 %v2102_v9  ;;  %v2563_v53 = vsel %vm2255_vm9, %v5401_v13, %v2562_v5  ;;  %v1880_v50 = vrot.slane %v1879_v43, 2  ;;  %v1868_v25 = vrot.slane %v1867_v32, 1 }
 0x2b0   : > { %6089 = vst [vmem:[#allocation11_spill] sm:$0xff] %v5403_v21  ;;  %v5409_v28 = vunpack.c.l.b16 %v2103_v16  ;;  %v2564_v46 = vsel %vm2257_vm10, %v5403_v21, %v2563_v53  ;;  %v1862_v57 = vmax.f32 %v1860_v59, %v1861_v39  ;;  %v1875_v12 = vrot.slane %v1874_v22, 1 }
 0x2b1   : > { %6090 = vst [vmem:[#allocation12_spill] sm:$0xff] %v5405_v3  ;;  %v2565_v56 = vsel %vm2259_vm11, %v5405_v3, %v2564_v46  ;;  %v1881_v34 = vmax.f32 %v1879_v43, %v1880_v50  ;;  %v1512_v14 = vcombine.high %v5376_v44, %v5376_v44  ;;  %v1869_v60 = vmax.f32 %v1867_v32, %v1868_v25 }
 0x2b2   : > { %6091 = vst [vmem:[#allocation13_spill] sm:$0xff] %v5409_v28  ;;  %v2104_v7 = vpack.c.bf16 %v1862_v57, %v1862_v57  ;;  %v2566_v5 = vsel %vm2261_vm12, %v5409_v28, %v2565_v56  ;;  %v1519_v30 = vrot.slane %v5376_v44, %v5230_v55  ;;  %v1876_v63 = vmax.f32 %v1874_v22, %v1875_v12 }
 0x2b3   : > { %v1882_v10 = vrot.slane %v1881_v34, 1  ;;  %v1526_v48 = vrot.slane %v1512_v14, %v5230_v55  ;;  %v1373_v41 = vmax.f32 %v5371_v38, 0.0  ;;  %v2105_v54 = vpack.c.bf16 %v1869_v60, %v1869_v60 }
 0x2b4   : > { %v5423_v59 = vunpack.c.l.b16 %v2104_v7  ;;  %v1527_v36 = vcombine.high %v1519_v30, %v1519_v30  ;;  %v1884_v9 = vsel %vm1687_vm7, %v1519_v30, -inf  ;;  %v2106_v43 = vpack.c.bf16 %v1876_v63, %v1876_v63 }
 0x2b5   : > { %v1883_v2 = vmax.f32 %v1881_v34, %v1882_v10  ;;  %v1528_v16 = vcombine.high %v1526_v48, %v1526_v48  ;;  %v1885_v39 = vrot.slane %v1884_v9, 4  ;;  %v5426_v32 = vunpack.c.l.b16 %v2105_v54 }
 0x2b6   : > { %6092 = vst [vmem:[#allocation14_spill] sm:$0xff] %v5423_v59  ;;  %v5430_v44 = vsel %vm2263_vm13, %v5423_v59, %v2566_v5  ;;  %v1891_v53 = vsel %vm1687_vm7, %v1527_v36, -inf  ;;  %v1898_v38 = vsel %vm1687_vm7, %v1526_v48, -inf  ;;  %v2224_v50 = vunpack.c.l.b16 %v2106_v43 }
 0x2b7   : > { %v2107_v22 = vpack.c.bf16 %v1883_v2, %v1883_v2  ;;  %v1886_v46 = vmax.f32 %v1884_v9, %v1885_v39  ;;  %v1892_v57 = vrot.slane %v1891_v53, 4  ;;  %v2423_v25 = vsel %vm2253_vm8, %v5426_v32, %v5423_v59 }
 0x2b8   : > { %v1899_v56 = vrot.slane %v1898_v38, 4  ;;  %v1905_v12 = vsel %vm1687_vm7, %v1528_v16, -inf  ;;  %v1529_v34 = vcombine.high %v1373_v41, %v1373_v41  ;;  %v2281_v60 = vsel %vm2253_vm8, %v2224_v50, %v5426_v32 }
 0x2b9   : > { %v2225_v14 = vunpack.c.l.b16 %v2107_v22  ;;  %v2424_v7 = vsel %vm2255_vm9, %v2224_v50, %v2423_v25  ;;  %v1887_v5 = vrot.slane %v1886_v46, 2  ;;  %v1893_v30 = vmax.f32 %v1891_v53, %v1892_v57 }
 0x2ba   : > { %v1900_v63 = vmax.f32 %v1898_v38, %v1899_v56  ;;  %v1906_v10 = vrot.slane %v1905_v12, 4  ;;  %v1536_v48 = vrot.slane %v1373_v41, %v5230_v55  ;;  %v1543_v22 = vrot.slane %v1529_v34, %v5230_v55 }
 0x2bb   : > { %v2569_v54 = vsel %vm2253_vm8, %v2225_v14, %v2224_v50  ;;  %v1888_v36 = vmax.f32 %v1886_v46, %v1887_v5  ;;  %v2282_v9 = vsel %vm2255_vm9, %v2225_v14, %v2281_v60  ;;  %v2425_v2 = vsel %vm2257_vm10, %v2225_v14, %v2424_v7 }
 0x2bc   : > { %v1894_v43 = vrot.slane %v1893_v30, 2  ;;  %v1901_v16 = vrot.slane %v1900_v63, 2  ;;  %v1907_v39 = vmax.f32 %v1905_v12, %v1906_v10  ;;  %v1544_v25 = vcombine.high %v1536_v48, %v1536_v48 }
 0x2bd   : > { %v1889_v59 = vrot.slane %v1888_v36, 1  ;;  %v1912_v53 = vsel %vm1687_vm7, %v1536_v48, -inf  ;;  %v1339_v38 = vadd.f32 %v5303_v18, %v5206_v20  ;;  %v1545_v46 = vcombine.high %v1543_v22, %v1543_v22 }
 0x2be   : > { %v1895_v41 = vmax.f32 %v1893_v30, %v1894_v43  ;;  %v1902_v57 = vmax.f32 %v1900_v63, %v1901_v16  ;;  %v1908_v50 = vrot.slane %v1907_v39, 2  ;;  %v1913_v60 = vrot.slane %v1912_v53, 4 }
 0x2bf   : > { %v1890_v56 = vmax.f32 %v1888_v36, %v1889_v59  ;;  %v1919_v14 = vsel %vm1687_vm7, %v1544_v25, -inf  ;;  %v1926_v7 = vsel %vm1687_vm7, %v1543_v22, -inf  ;;  %v1933_v21 = vsel %vm1687_vm7, %v1545_v46, -inf }
 0x2c0   : > { %v1896_v12 = vrot.slane %v1895_v41, 1  ;;  %v1903_v5 = vrot.slane %v1902_v57, 1  ;;  %v1909_v34 = vmax.f32 %v1907_v39, %v1908_v50  ;;  %v1920_v10 = vrot.slane %v1919_v14, 4 }
 0x2c1   : > { %v2108_v28 = vpack.c.bf16 %v1890_v56, %v1890_v56  ;;  %v1914_v3 = vmax.f32 %v1912_v53, %v1913_v60  ;;  %v1927_v48 = vrot.slane %v1926_v7, 4  ;;  %v1934_v16 = vrot.slane %v1933_v21, 4 }
 0x2c2   : > { %v1897_v20 = vmax.f32 %v1895_v41, %v1896_v12  ;;  %v1904_v18 = vmax.f32 %v1902_v57, %v1903_v5  ;;  %v1910_v30 = vrot.slane %v1909_v34, 1  ;;  %v1921_v63 = vmax.f32 %v1919_v14, %v1920_v10 }
 0x2c3   : > { %v2226_v43 = vunpack.c.l.b16 %v2108_v28  ;;  %v1915_v59 = vrot.slane %v1914_v3, 2  ;;  %v1928_v36 = vmax.f32 %v1926_v7, %v1927_v48  ;;  %v1935_v7 = vmax.f32 %v1933_v21, %v1934_v16 }
 0x2c4   : > { %v1911_v25 = vmax.f32 %v1909_v34, %v1910_v30  ;;  %v2109_v13 = vpack.c.bf16 %v1897_v20, %v1897_v20  ;;  %v2110_v22 = vpack.c.bf16 %v1904_v18, %v1904_v18  ;;  %v1922_v4 = vrot.slane %v1921_v63, 2 }
 0x2c5   : > { %v2283_v39 = vsel %vm2257_vm10, %v2226_v43, %v2282_v9  ;;  %v2426_v50 = vsel %vm2259_vm11, %v2226_v43, %v2425_v2  ;;  %v2570_v53 = vsel %vm2255_vm9, %v2226_v43, %v2569_v54  ;;  %v1916_v56 = vmax.f32 %v1914_v3, %v1915_v59 }
 0x2c6   : > { %v2111_v46 = vpack.c.bf16 %v1911_v25, %v1911_v25  ;;  %v2227_v41 = vunpack.c.l.b16 %v2109_v13  ;;  %v2228_v57 = vunpack.c.l.b16 %v2110_v22  ;;  %v1923_v60 = vmax.f32 %v1921_v63, %v1922_v4 }
 0x2c7   : > { %v1917_v28 = vrot.slane %v1916_v56, 1  ;;  %v1929_v14 = vrot.slane %v1928_v36, 2  ;;  %v1360_v12 = vadd.f32 %v5225_v49, %v1339_v38  ;;  %v1936_v48 = vrot.slane %v1935_v7, 2 }
 0x2c8   : > { %v5456_v5 = vunpack.c.l.b16 %v2111_v46  ;;  %v2284_v34 = vsel %vm2259_vm11, %v2227_v41, %v2283_v39  ;;  %v2427_v9 = vsel %vm2261_vm12, %v2227_v41, %v2426_v50  ;;  %v2571_v2 = vsel %vm2257_vm10, %v2227_v41, %v2570_v53 }
 0x2c9   : > { %v2285_v3 = vsel %vm2261_vm12, %v2228_v57, %v2284_v34  ;;  %v5463_v13 = vsel %vm2263_vm13, %v2228_v57, %v2427_v9  ;;  %v2572_v4 = vsel %vm2259_vm11, %v2228_v57, %v2571_v2  ;;  %v1918_v54 = vmax.f32 %v1916_v56, %v1917_v28 }
 0x2ca   : > { %6093 = vst [vmem:[#allocation15_spill] sm:$0xff] %v5456_v5  ;;  %6094 = vst [vmem:[#allocation16_spill] sm:$0xff] %v5463_v13  ;;  %v1924_v10 = vrot.slane %v1923_v60, 1  ;;  %v1930_v21 = vmax.f32 %v1928_v36, %v1929_v14  ;;  %v2286_v38 = vsel %vm2263_vm13, %v5456_v5, %v2285_v3  ;;  %v2573_v18 = vsel %vm2261_vm12, %v5456_v5, %v2572_v4 }
 0x2cb   : > { %v2112_v20 = vpack.c.bf16 %v1918_v54, %v1918_v54  ;;  %v1374_v30 = vmax.f32 %v1360_v12, 0.0  ;;  %v1340_v63 = vadd.f32 %v5309_v61, %v5208_v26  ;;  %v1937_v16 = vmax.f32 %v1935_v7, %v1936_v48 }
 0x2cc   : > { %v1925_v43 = vmax.f32 %v1923_v60, %v1924_v10  ;;  %v1931_v59 = vrot.slane %v1930_v21, 1  ;;  %v1341_v25 = vadd.f32 %v5314_v8, %v5210_v29 }
 0x2cd   : > { %v2230_v22 = vunpack.c.l.b16 %v2112_v20  ;;  %v1546_v36 = vcombine.high %v1374_v30, %v1374_v30  ;;  %v1553_v39 = vrot.slane %v1374_v30, %v5230_v55  ;;  %v1361_v50 = vadd.f32 %v5225_v49, %v1340_v63 }
 0x2ce   : > { %v1932_v53 = vmax.f32 %v1930_v21, %v1931_v59  ;;  %v1938_v56 = vrot.slane %v1937_v16, 1  ;;  %v2113_v46 = vpack.c.bf16 %v1925_v43, %v1925_v43  ;;  %v1362_v41 = vadd.f32 %v5225_v49, %v1341_v25 }
 0x2cf   : > { %v5478_v57 = vsel %vm2265_vm14, %v2230_v22, %v2286_v38  ;;  %v5481_v26 = vsel %vm2263_vm13, %v2230_v22, %v2573_v18  ;;  %v1560_v61 = vrot.slane %v1546_v36, %v5230_v55  ;;  %v1561_v29 = vcombine.high %v1553_v39, %v1553_v39 }
 0x2d0   : > { %v1939_v8 = vmax.f32 %v1937_v16, %v1938_v56  ;;  %v2114_v60 = vpack.c.bf16 %v1932_v53, %v1932_v53  ;;  %v5484_v28 = vunpack.c.l.b16 %v2113_v46  ;;  %v1940_v14 = vsel %vm1687_vm7, %v1553_v39, -inf }
 0x2d1   : > { %v1562_v7 = vcombine.high %v1560_v61, %v1560_v61  ;;  %v1941_v12 = vrot.slane %v1940_v14, 4  ;;  %v1947_v34 = vsel %vm1687_vm7, %v1561_v29, -inf  ;;  %v1954_v49 = vsel %vm1687_vm7, %v1560_v61, -inf }
 0x2d2   : > { %v2115_v9 = vpack.c.bf16 %v1939_v8, %v1939_v8  ;;  %v2232_v2 = vunpack.c.l.b16 %v2114_v60  ;;  %v2430_v3 = vsel %vm2253_vm8, %v5484_v28, %v2230_v22  ;;  %v1948_v4 = vrot.slane %v1947_v34, 4 }
 0x2d3   : > { %v1942_v54 = vmax.f32 %v1940_v14, %v1941_v12  ;;  %v1955_v10 = vrot.slane %v1954_v49, 4  ;;  %v1961_v21 = vsel %vm1687_vm7, %v1562_v7, -inf  ;;  %v1375_v48 = vmax.f32 %v1361_v50, 0.0 }
 0x2d4   : > { %v5492_v38 = vunpack.c.l.b16 %v2115_v9  ;;  %v5496_v20 = vsel %vm2253_vm8, %v2232_v2, %v5484_v28  ;;  %v5499_v18 = vsel %vm2255_vm9, %v2232_v2, %v2430_v3  ;;  %v1949_v30 = vmax.f32 %v1947_v34, %v1948_v4 }
 0x2d5   : > { %6095 = vst [vmem:[#allocation17_spill] sm:$0xff] %v5499_v18  ;;  %v1943_v63 = vrot.slane %v1942_v54, 2  ;;  %v1956_v43 = vmax.f32 %v1954_v49, %v1955_v10  ;;  %v1962_v59 = vrot.slane %v1961_v21, 4  ;;  %v1563_v16 = vcombine.high %v1375_v48, %v1375_v48 }
 0x2d6   : > { %v2576_v25 = vsel %vm2253_vm8, %v5492_v38, %v2232_v2  ;;  %v1950_v22 = vrot.slane %v1949_v30, 2  ;;  %v1570_v36 = vrot.slane %v1375_v48, %v5230_v55  ;;  %v1376_v39 = vmax.f32 %v1362_v41, 0.0 }
 0x2d7   : > { %v1944_v50 = vmax.f32 %v1942_v54, %v1943_v63  ;;  %v1957_v53 = vrot.slane %v1956_v43, 2  ;;  %v1963_v56 = vmax.f32 %v1961_v21, %v1962_v59  ;;  %v1577_v46 = vrot.slane %v1563_v16, %v5230_v55 }
 0x2d8   : > { %v1951_v61 = vmax.f32 %v1949_v30, %v1950_v22  ;;  %v1578_v29 = vcombine.high %v1570_v36, %v1570_v36  ;;  %v1968_v8 = vsel %vm1687_vm7, %v1570_v36, -inf  ;;  %v1580_v60 = vcombine.high %v1376_v39, %v1376_v39 }
 0x2d9   : > { %v1945_v14 = vrot.slane %v1944_v50, 1  ;;  %v1958_v7 = vmax.f32 %v1956_v43, %v1957_v53  ;;  %v1964_v12 = vrot.slane %v1963_v56, 2  ;;  %v1579_v34 = vcombine.high %v1577_v46, %v1577_v46 }
 0x2da   : > { %v1952_v49 = vrot.slane %v1951_v61, 1  ;;  %v1969_v9 = vrot.slane %v1968_v8, 4  ;;  %v1975_v2 = vsel %vm1687_vm7, %v1578_v29, -inf  ;;  %v1982_v41 = vsel %vm1687_vm7, %v1577_v46, -inf }
 0x2db   : > { %v1946_v3 = vmax.f32 %v1944_v50, %v1945_v14  ;;  %v1959_v4 = vrot.slane %v1958_v7, 1  ;;  %v1965_v54 = vmax.f32 %v1963_v56, %v1964_v12  ;;  %v1976_v10 = vrot.slane %v1975_v2, 4 }
 0x2dc   : > { %v1953_v21 = vmax.f32 %v1951_v61, %v1952_v49  ;;  %v1970_v48 = vmax.f32 %v1968_v8, %v1969_v9  ;;  %v1983_v30 = vrot.slane %v1982_v41, 4  ;;  %v1989_v63 = vsel %vm1687_vm7, %v1579_v34, -inf }
 0x2dd   : > { %v1960_v59 = vmax.f32 %v1958_v7, %v1959_v4  ;;  %v1966_v16 = vrot.slane %v1965_v54, 1  ;;  %v2116_v43 = vpack.c.bf16 %v1946_v3, %v1946_v3  ;;  %v1977_v22 = vmax.f32 %v1975_v2, %v1976_v10 }
 0x2de   : > { %v2117_v36 = vpack.c.bf16 %v1953_v21, %v1953_v21  ;;  %v1971_v53 = vrot.slane %v1970_v48, 2  ;;  %v1984_v18 = vmax.f32 %v1982_v41, %v1983_v30  ;;  %v1990_v5 = vrot.slane %v1989_v63, 4 }
 0x2df   : > { %v5509_v29 = vmax.f32 %v1965_v54, %v1966_v16  ;;  %v2118_v46 = vpack.c.bf16 %v1960_v59, %v1960_v59  ;;  %v5511_v50 = vunpack.c.l.b16 %v2116_v43  ;;  %v1978_v56 = vrot.slane %v1977_v22, 2 }
 0x2e0   : > { %v5513_v14 = vunpack.c.l.b16 %v2117_v36  ;;  %v1972_v61 = vmax.f32 %v1970_v48, %v1971_v53  ;;  %v1985_v8 = vrot.slane %v1984_v18, 2  ;;  %v1991_v12 = vmax.f32 %v1989_v63, %v1990_v5 }
 0x2e1   : > { %v5515_v34 = vunpack.c.l.b16 %v2118_v46  ;;  %v5519_v7 = vsel %vm2255_vm9, %v5511_v50, %v2576_v25  ;;  %v1979_v49 = vmax.f32 %v1977_v22, %v1978_v56  ;;  %v1587_v9 = vrot.slane %v1376_v39, %v5230_v55 }
 0x2e2   : > { %v1973_v2 = vrot.slane %v1972_v61, 1  ;;  %v1986_v41 = vmax.f32 %v1984_v18, %v1985_v8  ;;  %v1992_v3 = vrot.slane %v1991_v12, 2  ;;  %v1594_v4 = vrot.slane %v1580_v60, %v5230_v55 }
 0x2e3   : > { %v1980_v54 = vrot.slane %v1979_v49, 1  ;;  %v1595_v10 = vcombine.high %v1587_v9, %v1587_v9  ;;  %v1996_v21 = vsel %vm1687_vm7, %v1587_v9, -inf  ;;  %v2087_v5 = vpack.c.bf16 %v5271_v19, %v5271_v19 }
 0x2e4   : > { %v5526_v48 = vmax.f32 %v1972_v61, %v1973_v2  ;;  %v1987_v30 = vrot.slane %v1986_v41, 1  ;;  %v1993_v25 = vmax.f32 %v1991_v12, %v1992_v3  ;;  %v1596_v63 = vcombine.high %v1594_v4, %v1594_v4 }
 0x2e5   : > { %v1981_v59 = vmax.f32 %v1979_v49, %v1980_v54  ;;  %v1997_v16 = vrot.slane %v1996_v21, 4  ;;  %v2003_v39 = vsel %vm1687_vm7, %v1595_v10, -inf  ;;  %v2010_v18 = vsel %vm1687_vm7, %v1594_v4, -inf }
 0x2e6   : > { %v1988_v43 = vmax.f32 %v1986_v41, %v1987_v30  ;;  %v1994_v60 = vrot.slane %v1993_v25, 1  ;;  %v2004_v36 = vrot.slane %v2003_v39, 4  ;;  %v2011_v19 = vrot.slane %v2010_v18, 4 }
 0x2e7   : > { %v2121_v53 = vpack.c.bf16 %v1981_v59, %v1981_v59  ;;  %v1998_v46 = vmax.f32 %v1996_v21, %v1997_v16  ;;  %v2017_v56 = vsel %vm1687_vm7, %v1596_v63, -inf  ;;  %v2095_v41 = vpack.c.bf16 %v5349_v15, %v5349_v15 }
 0x2e8   : > { %v1995_v61 = vmax.f32 %v1993_v25, %v1994_v60  ;;  %v2122_v8 = vpack.c.bf16 %v1988_v43, %v1988_v43  ;;  %v2005_v12 = vmax.f32 %v2003_v39, %v2004_v36  ;;  %v2018_v49 = vrot.slane %v2017_v56, 4 }
 0x2e9   : > { %v5533_v9 = vunpack.c.l.b16 %v2121_v53  ;;  %v1999_v2 = vrot.slane %v1998_v46, 2  ;;  %v2012_v3 = vmax.f32 %v2010_v18, %v2011_v19  ;;  %v5539_v16 = vunpack.c.l.b16 %v2087_v5 }
 0x2ea   : > { %v2123_v4 = vpack.c.bf16 %v1995_v61, %v1995_v61  ;;  %v5537_v54 = vunpack.c.l.b16 %v2122_v8  ;;  %v2006_v10 = vrot.slane %v2005_v12, 2  ;;  %v2019_v30 = vmax.f32 %v2017_v56, %v2018_v49 }
 0x2eb   : > { %v2000_v21 = vmax.f32 %v1998_v46, %v1999_v2  ;;  %v2013_v59 = vrot.slane %v2012_v3, 2  ;;  %v6097_v25 = vpack.c.bf16 %v5312_v11, %v5312_v11  ;;  %v5551_v53 = vunpack.c.l.b16 %v2095_v41 }
 0x2ec   : > { %6096 = vst [vmem:[#allocation18_spill] sm:$0xff] %v5537_v54  ;;  %v5544_v39 = vunpack.c.l.b16 %v2123_v4  ;;  %v5549_v18 = vsel %vm2253_vm8, %v5537_v54, %v5533_v9  ;;  %v2007_v15 = vmax.f32 %v2005_v12, %v2006_v10  ;;  %v2020_v43 = vrot.slane %v2019_v30, 2 }
 0x2ed   : > { %v2206_v63 = vunpack.c.l.b16 %v6097_v25  ;;  %v2001_v60 = vrot.slane %v2000_v21, 1  ;;  %v2014_v36 = vmax.f32 %v2012_v3, %v2013_v59  ;;  %v6098_v5 = vpack.c.bf16 %v5380_v35, %v5380_v35 }
 0x2ee   : > { %v2583_v11 = vsel %vm2253_vm8, %v5544_v39, %v5537_v54  ;;  %v2008_v19 = vrot.slane %v2007_v15, 1  ;;  %v2021_v56 = vmax.f32 %v2019_v30, %v2020_v43  ;;  %v2256_v61 = vsel %vm2255_vm9, %v5260_v45, %v5263_v47 }
 0x2ef   : > { %v2214_v46 = vunpack.c.l.b16 %v6098_v5  ;;  %v2002_v8 = vmax.f32 %v2000_v21, %v2001_v60  ;;  %v2015_v12 = vrot.slane %v2014_v36, 1  ;;  %v2258_v49 = vsel %vm2257_vm10, %v5277_v62, %v2256_v61 }
 0x2f0   : > { %v2268_v35 = vsel %vm2255_vm9, %v5324_v52, %v5334_v58  ;;  %v2009_v2 = vmax.f32 %v2007_v15, %v2008_v19  ;;  %v2022_v3 = vrot.slane %v2021_v56, 1  ;;  %v2260_v41 = vsel %vm2259_vm11, %v5288_v42, %v2258_v49 }
 0x2f1   : > { %v2269_v4 = vsel %vm2257_vm10, %v5344_v31, %v2268_v35  ;;  %v2016_v10 = vmax.f32 %v2014_v36, %v2015_v12  ;;  %v2124_v30 = vpack.c.bf16 %v2002_v8, %v2002_v8  ;;  %v2262_v47 = vsel %vm2261_vm12, %v5283_v0, %v2260_v41 }
 0x2f2   : > { %v2270_v21 = vsel %vm2259_vm11, %v5356_v1, %v2269_v4  ;;  %v5575_v59 = vmax.f32 %v2021_v56, %v2022_v3  ;;  %v2125_v25 = vpack.c.bf16 %v2009_v2, %v2009_v2  ;;  %v2264_v58 = vsel %vm2263_vm13, %v5539_v16, %v2262_v47 }
 0x2f3   : > { %v2271_v15 = vsel %vm2261_vm12, %v5358_v37, %v2270_v21  ;;  %v2126_v43 = vpack.c.bf16 %v2016_v10, %v2016_v10  ;;  %v5581_v60 = vunpack.c.l.b16 %v2124_v30  ;;  %v2266_v36 = vsel %vm2265_vm14, %v2206_v63, %v2264_v58 }
 0x2f4   : > { %v2272_v5 = vsel %vm2263_vm13, %v5551_v53, %v2271_v15  ;;  %v5586_v19 = vunpack.c.l.b16 %v2125_v25  ;;  %v5591_v61 = vsel %vm2253_vm8, %v5322_v24, %v2206_v63  ;;  %v6099_v35 = vrot.slane %v5373_v51, 1 }
 0x2f5   : > { %v2273_v56 = vsel %vm2265_vm14, %v2214_v46, %v2272_v5  ;;  %v5593_v8 = vunpack.c.l.b16 %v2126_v43  ;;  %v5597_v12 = vsel %vm2255_vm9, %v5581_v60, %v2583_v11  ;;  %v2550_v3 = vsel %vm2257_vm10, %v5288_v42, %v5292_v6 }
 0x2f6   : > { %v2307_v49 = vpack.c.b16 %v2273_v56, %v2266_v36  ;;  %v1813_v2 = vmax.f32 %v5373_v51, %v6099_v35  ;;  %v2557_v41 = vsel %vm2257_vm10, %v5356_v1, %v5353_v23  ;;  %v1342_v4 = vadd.f32 %v5320_v17, %v5212_v33  ;;  %v6100_v36 = vld [vmem:[#allocation8_spill] sm:$0xff]  ;;  %v6101_v35 = vld [vmem:[#allocation9_spill] sm:$0xff] }
 0x2f7   : > { %v1343_v11 = vadd.f32 %v5342_v27, %v5217_v40  ;;  %v2551_v51 = vsel %vm2259_vm11, %v5283_v0, %v2550_v3  ;;  %v2558_v30 = vsel %vm2259_vm11, %v5358_v37, %v2557_v41  ;;  %v2568_v6 = vsel %vm2265_vm14, %v5426_v32, %v5430_v44  ;;  %v4729_v40 = vld [vmem:[%s6056_s4] ss:$0 sm:$0xff]  ;;  %v6102_v3 = vld [vmem:[#allocation10_spill] sm:$0xff] }
 0x2f8   : > { %4374 = vmatprep.mubr.msk.bf16.mxu0 %vm2323_vm15, %v2307_v49  ;;  %v2097_v10 = vpack.c.bf16 %v1813_v2, %v1813_v2  ;;  %v2552_v23 = vsel %vm2261_vm12, %v5539_v16, %v2551_v51  ;;  %v2559_v33 = vsel %vm2261_vm12, %v5551_v53, %v2558_v30  ;;  %v1363_v17 = vadd.f32 %v4729_v40, %v1342_v4 }
 0x2f9   : > { %v1364_v27 = vadd.f32 %v4729_v40, %v1343_v11  ;;  %v2553_v21 = vsel %vm2263_vm13, %v2206_v63, %v2552_v23  ;;  %v2560_v25 = vsel %vm2263_vm13, %v2214_v46, %v2559_v33  ;;  %v2575_v32 = vsel %vm2265_vm14, %v5484_v28, %v5481_v26 }
 0x2fa   : > { %v2215_v47 = vunpack.c.l.b16 %v2097_v10  ;;  %v2554_v44 = vsel %vm2265_vm14, %v5322_v24, %v2553_v21  ;;  %v1377_v58 = vmax.f32 %v1363_v17, 0.0  ;;  %v2596_v43 = vpack.c.b16 %v2575_v32, %v2568_v6  ;;  %v6103_v10 = vld [vmem:[#allocation11_spill] sm:$0xff] }
 0x2fb   : > { %v1378_v15 = vmax.f32 %v1364_v27, 0.0  ;;  %v6104_v27 = vld [vmem:[#allocation12_spill] sm:$0xff] }
 0x2fc   : > { %v2274_v5 = vsel %vm2253_vm8, %v6100_v36, %v2215_v47  ;;  %v2416_v56 = vsel %vm2253_vm8, %v2215_v47, %v2214_v46  ;;  %v2561_v49 = vsel %vm2265_vm14, %v2215_v47, %v2560_v25  ;;  %v1597_v28 = vcombine.high %v1377_v58, %v1377_v58 }
 0x2fd   : > { %v2275_v2 = vsel %vm2255_vm9, %v6101_v35, %v2274_v5  ;;  %v2417_v26 = vsel %vm2255_vm9, %v6100_v36, %v2416_v56  ;;  %v2595_v24 = vpack.c.b16 %v2561_v49, %v2554_v44  ;;  %v1604_v46 = vrot.slane %v1377_v58, %v5230_v55 }
 0x2fe   : > { %v2276_v41 = vsel %vm2257_vm10, %v6102_v3, %v2275_v2  ;;  %v2418_v4 = vsel %vm2257_vm10, %v6101_v35, %v2417_v26  ;;  %v1614_v11 = vcombine.high %v1378_v15, %v1378_v15  ;;  %v1611_v6 = vrot.slane %v1597_v28, %v5230_v55 }
 0x2ff   : > { %v2277_v51 = vsel %vm2259_vm11, %v6103_v10, %v2276_v41  ;;  %v5653_v30 = vsel %vm2259_vm11, %v6102_v3, %v2418_v4  ;;  %4398 = vmatprep.mubr.msk.bf16.mxu1 %vm2323_vm15, %v2595_v24  ;;  %v1621_v23 = vrot.slane %v1378_v15, %v5230_v55  ;;  %v1612_v33 = vcombine.high %v1604_v46, %v1604_v46 }
 0x300   : > { %v2024_v40 = vsel %vm1687_vm7, %v1604_v46, -inf  ;;  %v1628_v17 = vrot.slane %v1614_v11, %v5230_v55  ;;  %v2278_v47 = vsel %vm2261_vm12, %v6104_v27, %v2277_v51  ;;  %4399 = vmatmul.mubr.msk.bf16.vlgmr.msra.gmra.mxu1 %vm2323_vm15, %v2596_v43  ;;  %v1613_v21 = vcombine.high %v1611_v6, %v1611_v6 }
 0x301   : > { %v2025_v25 = vrot.slane %v2024_v40, 4  ;;  %v2038_v32 = vsel %vm1687_vm7, %v1611_v6, -inf  ;;  %v1629_v44 = vcombine.high %v1621_v23, %v1621_v23  ;;  %v2031_v58 = vsel %vm1687_vm7, %v1612_v33, -inf }
 0x302   : > { %v2039_v36 = vrot.slane %v2038_v32, 4  ;;  %v1630_v5 = vcombine.high %v1628_v17, %v1628_v17  ;;  %v2052_v15 = vsel %vm1687_vm7, %v1621_v23, -inf  ;;  %v2032_v49 = vrot.slane %v2031_v58, 4 }
 0x303   : > { %v2026_v56 = vmax.f32 %v2024_v40, %v2025_v25  ;;  %v2045_v55 = vsel %vm1687_vm7, %v1613_v21, -inf  ;;  %v2053_v35 = vrot.slane %v2052_v15, 4  ;;  %v2059_v43 = vsel %vm1687_vm7, %v1629_v44, -inf }
 0x304   : > { %v2040_v2 = vmax.f32 %v2038_v32, %v2039_v36  ;;  %v2046_v26 = vrot.slane %v2045_v55, 4  ;;  %v2066_v24 = vsel %vm1687_vm7, %v1628_v17, -inf  ;;  %v2033_v3 = vmax.f32 %v2031_v58, %v2032_v49 }
 0x305   : > { %v2027_v28 = vrot.slane %v2026_v56, 2  ;;  %v2054_v41 = vmax.f32 %v2052_v15, %v2053_v35  ;;  %v2060_v4 = vrot.slane %v2059_v43, 4  ;;  %v2067_v51 = vrot.slane %v2066_v24, 4 }
 0x306   : > { %v2041_v46 = vrot.slane %v2040_v2, 2  ;;  %v2047_v11 = vmax.f32 %v2045_v55, %v2046_v26  ;;  %v2073_v6 = vsel %vm1687_vm7, %v1630_v5, -inf  ;;  %v2034_v33 = vrot.slane %v2033_v3, 2 }
 0x307   : > { %v2028_v23 = vmax.f32 %v2026_v56, %v2027_v28  ;;  %v2055_v40 = vrot.slane %v2054_v41, 2  ;;  %v2061_v21 = vmax.f32 %v2059_v43, %v2060_v4  ;;  %v2068_v36 = vmax.f32 %v2066_v24, %v2067_v51 }
 0x308   : > { %v2042_v25 = vmax.f32 %v2040_v2, %v2041_v46  ;;  %v2048_v32 = vrot.slane %v2047_v11, 2  ;;  %v2074_v22 = vrot.slane %v2073_v6, 4  ;;  %v2035_v63 = vmax.f32 %v2033_v3, %v2034_v33  ;;  %v6105_v46 = vld [vmem:[#allocation13_spill] sm:$0xff] }
 0x309   : > { %v2029_v44 = vrot.slane %v2028_v23, 1  ;;  %v2056_v17 = vmax.f32 %v2054_v41, %v2055_v40  ;;  %v2062_v54 = vrot.slane %v2061_v21, 2  ;;  %v2069_v49 = vrot.slane %v2068_v36, 2 }
 0x30a   : > { %v2043_v58 = vrot.slane %v2042_v25, 1  ;;  %v2049_v15 = vmax.f32 %v2047_v11, %v2048_v32  ;;  %v2075_v35 = vmax.f32 %v2073_v6, %v2074_v22  ;;  %v2036_v26 = vrot.slane %v2035_v63, 1 }
 0x30b   : > { %v2030_v55 = vmax.f32 %v2028_v23, %v2029_v44  ;;  %v2057_v13 = vrot.slane %v2056_v17, 1  ;;  %v2063_v5 = vmax.f32 %v2061_v21, %v2062_v54  ;;  %v2070_v27 = vmax.f32 %v2068_v36, %v2069_v49  ;;  %v6106_v23 = vld [vmem:[#allocation14_spill] sm:$0xff]  ;;  %v4498_v36 = vld [vmem:[%s6057_s5] sm:$0xff]  }
 0x30c   : > { %v2044_v56 = vmax.f32 %v2042_v25, %v2043_v58  ;;  %v2050_v28 = vrot.slane %v2049_v15, 1  ;;  %v2076_v43 = vrot.slane %v2075_v35, 2  ;;  %v2279_v3 = vsel %vm2263_vm13, %v6105_v46, %v2278_v47 }
 0x30d   : > { %v2128_v2 = vpack.c.bf16 %v2030_v55, %v2030_v55  ;;  %v2058_v4 = vmax.f32 %v2056_v17, %v2057_v13  ;;  %v2064_v24 = vrot.slane %v2063_v5, 1  ;;  %v2071_v33 = vrot.slane %v2070_v27, 1 }
 0x30e   : > { %v2051_v41 = vmax.f32 %v2049_v15, %v2050_v28  ;;  %v2130_v51 = vpack.c.bf16 %v2044_v56, %v2044_v56  ;;  %v5672_v11 = vmax.f32 %v2075_v35, %v2076_v43  ;;  %v2280_v54 = vsel %vm2265_vm14, %v6106_v23, %v2279_v3 }
 0x30f   : > { %v2065_v22 = vmax.f32 %v2063_v5, %v2064_v24  ;;  %v2132_v6 = vpack.c.bf16 %v2058_v4, %v2058_v4  ;;  %v2127_v40 = vpack.c.bf16 %v5575_v59, %v5575_v59  ;;  %v2308_v13 = vpack.c.b16 %v5478_v57, %v2280_v54 }
 0x310   : > { %v2131_v21 = vpack.c.bf16 %v2051_v41, %v2051_v41  ;;  %v5678_v25 = vunpack.c.l.b16 %v2130_v51  ;;  %v6107_v47 = vpack.c.bf16 %v5509_v29, %v5509_v29  ;;  %v6108_v59 = vpack.c.bf16 %v5526_v48, %v5526_v48  ;;  %v4730_v48 = vld [vmem:[%s6057_s5 + $0x8] sm:$0xff]  }
 0x311   : > { %v2133_v44 = vpack.c.bf16 %v2065_v22, %v2065_v22  ;;  %v5689_v17 = vunpack.c.l.b16 %v2132_v6  ;;  %v5694_v15 = vunpack.c.l.b16 %v2127_v40  ;;  %4375 = vmatmul.mubr.msk.bf16.vlgmr.msra.gmra.mxu0 %vm2323_vm15, %v2308_v13  ;;  %v5699_v57 = vunpack.c.l.b16 %v2128_v2 }
 0x312   : > { %v5684_v32 = vunpack.c.l.b16 %v6107_v47  ;;  %v2238_v58 = vunpack.c.l.b16 %v6108_v59  ;;  %v5696_v49 = vunpack.c.l.b16 %v2131_v21  ;;  %v2289_v29 = vsel %vm2255_vm9, %v5492_v38, %v5496_v20  ;;  %4383 = vmatpush3.bf16.msra.mxu0 %v4730_v48 }
 0x313   : > { %v2296_v35 = vsel %vm2255_vm9, %v5544_v39, %v5549_v18  ;;  %v2290_v55 = vsel %vm2257_vm10, %v5511_v50, %v2289_v29  ;;  %v2037_v20 = vmax.f32 %v2035_v63, %v2036_v26  ;;  %v2578_v43 = vsel %vm2257_vm10, %v5513_v14, %v5519_v7  ;;  %4384 = vmatprep.subr.bf16.mxu0 %v4498_v36 }
 0x314   : > { %v2297_v5 = vsel %vm2257_vm10, %v5581_v60, %v2296_v35  ;;  %v5716_v56 = vsel %vm2253_vm8, %v5533_v9, %v2238_v58  ;;  %v2291_v28 = vsel %vm2259_vm11, %v5513_v14, %v2290_v55  ;;  %v2585_v2 = vsel %vm2257_vm10, %v5586_v19, %v5597_v12  ;;  %v6109_v35 = vld [vmem:[#allocation6_spill] sm:$0xff] }
 0x315   : > { %v2298_v18 = vsel %vm2259_vm11, %v5586_v19, %v2297_v5  ;;  %v2292_v4 = vsel %vm2261_vm12, %v5515_v34, %v2291_v28  ;;  %v2129_v26 = vpack.c.bf16 %v2037_v20, %v2037_v20  ;;  %v2579_v24 = vsel %vm2259_vm11, %v5515_v34, %v2578_v43 }
 0x316   : > { %v2299_v63 = vsel %vm2261_vm12, %v5593_v8, %v2298_v18  ;;  %v2293_v3 = vsel %vm2263_vm13, %v5684_v32, %v2292_v4  ;;  %v2580_v12 = vsel %vm2261_vm12, %v5684_v32, %v2579_v24  ;;  %v2586_v41 = vsel %vm2259_vm11, %v5593_v8, %v2585_v2  ;;  %4385 = vmatpush3.bf16.msra.mxu0 %v4498_v36 }
 0x317   : > { %v2300_v7 = vsel %vm2263_vm13, %v5694_v15, %v2299_v63  ;;  %v2294_v51 = vsel %vm2265_vm14, %v2238_v58, %v2293_v3  ;;  %v2247_v6 = vunpack.c.l.b16 %v2129_v26  ;;  %v2581_v23 = vsel %vm2263_vm13, %v2238_v58, %v2580_v12 }
 0x318   : > { %v2301_v22 = vsel %vm2265_vm14, %v5699_v57, %v2300_v7  ;;  %v2582_v40 = vsel %vm2265_vm14, %v5533_v9, %v2581_v23  ;;  %v2587_v21 = vsel %vm2261_vm12, %v5694_v15, %v2586_v41  ;;  %v2072_v13 = vmax.f32 %v2070_v27, %v2071_v33  ;;  %v6111_v7 = vld [vmem:[#allocation12_spill] sm:$0xff] }
 0x319   : > { %v2309_v54 = vpack.c.b16 %v2301_v22, %v2294_v51  ;;  %v2588_v47 = vsel %vm2263_vm13, %v5699_v57, %v2587_v21  ;;  %v2251_v59 = vunpack.c.l.b16 %v2133_v44  ;;  %v2302_v29 = vsel %vm2253_vm8, %v5678_v25, %v2247_v6  ;;  %v6112_v41 = vld [vmem:[#allocation16_spill] sm:$0xff]  ;;  %v6113_v51 = vld [vmem:[#allocation15_spill] sm:$0xff]  ;;  %v6114_v22 = vld [vmem:[#allocation17_spill] sm:$0xff] }
 0x31a   : > { %v2404_v58 = vsel %vm2257_vm10, %v5260_v45, %v6109_v35  ;;  %v2589_v36 = vsel %vm2265_vm14, %v2247_v6, %v2588_v47  ;;  %v2134_v9 = vpack.c.bf16 %v2072_v13, %v2072_v13  ;;  %v2303_v48 = vsel %vm2255_vm9, %v5696_v49, %v2302_v29  ;;  %v6110_v45 = vld [vmem:[#allocation7_spill] sm:$0xff] }
 0x31b   : > { %4378 = vmatprep.mubr.msk.bf16.mxu0 %vm2323_vm15, %v2309_v54  ;;  %v2405_v27 = vsel %vm2259_vm11, %v5277_v62, %v2404_v58  ;;  %v2597_v33 = vpack.c.b16 %v2589_v36, %v2582_v40  ;;  %v2304_v44 = vsel %vm2257_vm10, %v5689_v17, %v2303_v48  ;;  %v2410_v5 = vsel %vm2255_vm9, %v6110_v45, %v5591_v61  ;;  %v6115_v40 = vld [vmem:[#allocation18_spill] sm:$0xff] }
 0x31c   : > { %v2406_v55 = vsel %vm2261_vm12, %v5288_v42, %v2405_v27  ;;  %v2252_v20 = vunpack.c.l.b16 %v2134_v9  ;;  %v2305_v28 = vsel %vm2259_vm11, %v2251_v59, %v2304_v44  ;;  %v2411_v62 = vsel %vm2257_vm10, %v5324_v52, %v2410_v5  ;;  %v4505_v36 = vld [vmem:[%s6059_s7 + $0x28] sm:$0xff]   ;;  %v4504_v9 = vld [vmem:[%s6059_s7] sm:$0xff]  }
 0x31d   : > { %v2407_v18 = vsel %vm2263_vm13, %v5283_v0, %v2406_v55  ;;  %4402 = vmatprep.mubr.msk.bf16.mxu1 %vm2323_vm15, %v2597_v33  ;;  %v2412_v42 = vsel %vm2259_vm11, %v5344_v31, %v2411_v62  ;;  %v2078_v2 = vrot.slane %v5672_v11, 1  ;;  %v2590_v61 = vsel %vm2253_vm8, %v5696_v49, %v5678_v25  ;;  %v4506_v55 = vld [vmem:[%s6059_s7 + $0x20] sm:$0xff]  }
 0x31e   : > { %v2408_v43 = vsel %vm2265_vm14, %v5539_v16, %v2407_v18  ;;  %v2306_v4 = vsel %vm2261_vm12, %v2252_v20, %v2305_v28  ;;  %v2413_v0 = vsel %vm2261_vm12, %v5356_v1, %v2412_v42  ;;  %v2591_v52 = vsel %vm2255_vm9, %v5689_v17, %v2590_v61  ;;  %v5873_v28 = vld [vmem:[%s6059_s7 + $0x58] sm:$0xff]  }
 0x31f   : > { %v2420_v16 = vsel %vm2261_vm12, %v6103_v10, %v5653_v30  ;;  %v2310_v63 = vpack.c.b16 %v2306_v4, %v2306_v4  ;;  %v2414_v31 = vsel %vm2263_vm13, %v5358_v37, %v2413_v0  ;;  %v2079_v26 = vmax.f32 %v5672_v11, %v2078_v2 }
 0x320   : > { %v2592_v24 = vsel %vm2257_vm10, %v2251_v59, %v2591_v52  ;;  %v2415_v3 = vsel %vm2265_vm14, %v5551_v53, %v2414_v31  ;;  %v2421_v12 = vsel %vm2263_vm13, %v6111_v7, %v2420_v16  ;;  %v2429_v10 = vsel %vm2265_vm14, %v6113_v51, %v6112_v41  ;;  %v4065_v7 = vld [vmem:[%s6058_s6] ss:$0 sm:$0xff] }
 0x321   : > { %v2593_v1 = vsel %vm2259_vm11, %v2252_v20, %v2592_v24  ;;  %4379 = vmatmul.mubr.msk.bf16.gmra.mxu0 %vm2323_vm15, %v2310_v63  ;;  %v2449_v30 = vpack.c.b16 %v2415_v3, %v2408_v43  ;;  %v2135_v37 = vpack.c.bf16 %v2079_v26, %v2079_v26  ;;  %v2422_v11 = vsel %vm2265_vm14, %v6105_v46, %v2421_v12 }
 0x322   : > { %v2432_v53 = vsel %vm2257_vm10, %v5492_v38, %v6114_v22  ;;  %v2450_v23 = vpack.c.b16 %v2429_v10, %v2422_v11  ;;  %v2438_v21 = vsel %vm2255_vm9, %v6115_v40, %v5716_v56  ;;  %v2444_v13 = vsel %vm2253_vm8, %v2247_v6, %v5699_v57 }
 0x323   : > { %v2433_v54 = vsel %vm2259_vm11, %v5511_v50, %v2432_v53  ;;  %4386 = vmatprep.mubr.msk.bf16.mxu0 %vm2323_vm15, %v2449_v30  ;;  %v2547_v47 = vunpack.c.l.b16 %v2135_v37  ;;  %v2439_v38 = vsel %vm2257_vm10, %v5544_v39, %v2438_v21  ;;  %v2445_v29 = vsel %vm2255_vm9, %v5678_v25, %v2444_v13 }
 0x324   : > { %v2434_v46 = vsel %vm2261_vm12, %v5513_v14, %v2433_v54  ;;  %v2440_v56 = vsel %vm2259_vm11, %v5581_v60, %v2439_v38  ;;  %v2446_v57 = vsel %vm2257_vm10, %v5696_v49, %v2445_v29  ;;  %vm3387_vm7 = vcmask 1047554  }
 0x325   : > { %v2435_v50 = vsel %vm2263_vm13, %v5515_v34, %v2434_v46  ;;  %v2594_v6 = vsel %vm2261_vm12, %v2547_v47, %v2593_v1  ;;  %v2441_v39 = vsel %vm2261_vm12, %v5586_v19, %v2440_v56  ;;  %v2447_v25 = vsel %vm2259_vm11, %v5689_v17, %v2446_v57  ;;  %v4501_v17 = vld [vmem:[%s6059_s7 + $0x38] sm:$0xff]  }
 0x326   : > { %v2436_v14 = vsel %vm2265_vm14, %v5684_v32, %v2435_v50  ;;  %v2598_v35 = vpack.c.b16 %v2594_v6, %v2594_v6  ;;  %v2442_v34 = vsel %vm2263_vm13, %v5593_v8, %v2441_v39  ;;  %v2448_v60 = vsel %vm2261_vm12, %v2251_v59, %v2447_v25  ;;  %v4499_v32 = vld [vmem:[%s6059_s7 + $0x18] sm:$0xff]   ;;  %v4500_v8 = vld [vmem:[%s6059_s7 + $0x10] sm:$0xff]   ;;  %4406 = vmatprep.subr.bf16.mxu0 %v4501_v17  ;;  %v4502_v59 = vld [vmem:[%s6059_s7 + $0x8] sm:$0xff]  }
 0x327   : > { %v2443_v49 = vsel %vm2265_vm14, %v5694_v15, %v2442_v34  ;;  %v2452_v19 = vpack.c.b16 %v2448_v60, %v2448_v60  ;;  %v4503_v15 = vld [vmem:[%s6059_s7 + $0x30] sm:$0xff]   ;;  %4422 = vmatprep.subr.bf16.mxu1 %v4499_v32 }
 0x328   : > { %4403 = vmatmul.mubr.msk.bf16.gmra.mxu1 %vm2323_vm15, %v2598_v35  ;;  %v2451_v58 = vpack.c.b16 %v2443_v49, %v2436_v14 }
 0x329   : > { %4387 = vmatmul.mubr.msk.bf16.vlgmr.msra.gmra.mxu0 %vm2323_vm15, %v2450_v23  ;;  %4423 = vmatpush3.bf16.msra.mxu1 %v4499_v32 }
 0x32a   : > { %4390 = vmatprep.mubr.msk.bf16.mxu0 %vm2323_vm15, %v2451_v58  ;;  %4407 = vmatpush3.bf16.msra.mxu0 %v4501_v17 }
 0x32b   : > { %4424 = vmatprep.subr.bf16.mxu1 %v4500_v8  ;;  %4408 = vmatprep.subr.bf16.mxu0 %v4503_v15 }
 0x32d   : > { %4425 = vmatpush3.bf16.msra.mxu1 %v4500_v8 }
 0x32e   : > { %4409 = vmatpush3.bf16.msra.mxu0 %v4503_v15  ;;  %4426 = vmatprep.subr.bf16.mxu1 %v4502_v59 }
 0x32f   : > { %4410 = vmatprep.subr.bf16.mxu0 %v4505_v36 }
 0x331   : > { %4391 = vmatmul.mubr.msk.bf16.gmra.mxu0 %vm2323_vm15, %v2452_v19  ;;  %4427 = vmatpush3.bf16.msra.mxu1 %v4502_v59 }
 0x332   : > { %4411 = vmatpush3.bf16.msra.mxu0 %v4505_v36  ;;  %4428 = vmatprep.subr.bf16.mxu1 %v4504_v9 }
 0x333   : > { %4412 = vmatprep.subr.bf16.mxu0 %v4506_v55 }
 0x335   : > { %4429 = vmatpush3.bf16.msra.mxu1 %v4504_v9 }
 0x336   : > { %4413 = vmatpush3.bf16.msra.mxu0 %v4506_v55 }
 0x337   : > { %4438 = vmatprep.subr.bf16.mxu0 %v5873_v28 }
 0x3c0   : > { %v4400_v33 = vpop.f32.mrf.mxu1 }
 0x3c2   : > { %v2657_v45 = vpop.f32.mrf.mxu1 }
 0x3c4   : > { %v4401_v18 = vpop.f32.mrf.mxu1 }
 0x3c6   : > { %v2660_v42 = vpop.f32.mrf.mxu1 }
 0x3d1   : > { %v4376_v48 = vpop.f32.mrf.mxu0 }
 0x3d3   : > { %v2370_v27 = vpop.f32.mrf.mxu0 }
 0x3d5   : > { %v4377_v44 = vpop.f32.mrf.mxu0 }
 0x3d7   : > { %v2373_v5 = vpop.f32.mrf.mxu0 }
 0x3e1   : > { %v4380_v20 = vpop.f32.mrf.mxu0 }
 0x3e3   : > { %v2386_v62 = vpop.f32.mrf.mxu0 }
 0x3e5   : > { %v4381_v43 = vpop.f32.mrf.mxu0 }
 0x3e7   : > { %v2389_v2 = vpop.f32.mrf.mxu0 }
 0x3e8   : > { %v4404_v61 = vpop.f32.mrf.mxu1 }
 0x3e9   : > { %v4388_v4 = vpop.f32.mrf.mxu0 }
 0x3ea   : > { %v2673_v0 = vpop.f32.mrf.mxu1  ;;  %v2520_v52 = vadd.f32 %v4388_v4, %v4376_v48 }
 0x3eb   : > { %v2511_v16 = vpop.f32.mrf.mxu0 }
 0x3ec   : > { %v4405_v63 = vpop.f32.mrf.mxu1  ;;  %v2512_v31 = vadd.f32 %v2511_v16, %v2370_v27  ;;  %v2689_v24 = vadd.f32 %v4400_v33, %v2520_v52 }
 0x3ed   : > { %v4389_v26 = vpop.f32.mrf.mxu0 }
 0x3ee   : > { %v2687_v3 = vadd.f32 %v2657_v45, %v2512_v31  ;;  %v2523_v1 = vadd.f32 %v4389_v26, %v4377_v44  ;;  %v5881_v37 = vadd.f32 %v4065_v7, %v2689_v24  ;;  %v2676_v49 = vpop.f32.mrf.mxu1 }
 0x3ef   : > { %v2514_v12 = vpop.f32.mrf.mxu0 }
 0x3f0   : > { %v5879_v41 = vadd.f32 %v4065_v7, %v2687_v3  ;;  %v2690_v51 = vadd.f32 %v4401_v18, %v2523_v1  ;;  %v2515_v10 = vadd.f32 %v2514_v12, %v2373_v5  ;;  %v2733_v47 = vmul.f32 %v5881_v37, %v5881_v37 }
 0x3f1   : > { %v4392_v30 = vpop.f32.mrf.mxu0  ;;  %v2712_v25 = vsel %vm2708_vm1, %v5881_v37, 0.0 }
 0x3f2   : > { %v2688_v11 = vadd.f32 %v2660_v42, %v2515_v10  ;;  %v2536_v22 = vadd.f32 %v4392_v30, %v4380_v20  ;;  %v2731_v54 = vmul.f32 %v5879_v41, %v5879_v41  ;;  %v5885_v40 = vadd.f32 %v4065_v7, %v2690_v51 }
 0x3f3   : > { %v2527_v53 = vpop.f32.mrf.mxu0  ;;  %v2709_v38 = vsel %vm2708_vm1, %v5879_v41, 0.0  ;;  %v2741_v58 = vsel %vm2708_vm1, %v2733_v47, 0.0 }
 0x3f4   : > { %v2528_v23 = vadd.f32 %v2527_v53, %v2386_v62  ;;  %v5887_v21 = vadd.f32 %v4065_v7, %v2688_v11  ;;  %v2693_v56 = vadd.f32 %v4404_v61, %v2536_v22  ;;  %v2738_v35 = vsel %vm2708_vm1, %v2731_v54, 0.0 }
 0x3f5   : > { %v4393_v13 = vpop.f32.mrf.mxu0  ;;  %v2734_v34 = vmul.f32 %v5885_v40, %v5885_v40  ;;  %v2714_v8 = vsel %vm2708_vm1, %v5885_v40, 0.0 }
 0x3f6   : > { %v2691_v46 = vadd.f32 %v2673_v0, %v2528_v23  ;;  %v2710_v29 = vsel %vm2708_vm1, %v5887_v21, 0.0  ;;  %v2732_v50 = vmul.f32 %v5887_v21, %v5887_v21  ;;  %v5908_v17 = vadd.f32 %v4065_v7, %v2693_v56 }
 0x3f7   : > { %v2530_v57 = vpop.f32.mrf.mxu0  ;;  %v2711_v6 = vadd.f32 %v2710_v29, %v2709_v38  ;;  %v2743_v48 = vsel %vm2708_vm1, %v2734_v34, 0.0 }
 0x3f8   : > { %v5897_v14 = vadd.f32 %v4065_v7, %v2691_v46  ;;  %v2531_v39 = vadd.f32 %v2530_v57, %v2389_v2  ;;  %v2739_v60 = vsel %vm2708_vm1, %v2732_v50, 0.0  ;;  %v2737_v45 = vmul.f32 %v5908_v17, %v5908_v17 }
 0x3f9   : > { %v2713_v19 = vadd.f32 %v2712_v25, %v2711_v6  ;;  %v2740_v32 = vadd.f32 %v2739_v60, %v2738_v35  ;;  %v2721_v42 = vsel %vm2720_vm2, %v5908_v17, 0.0 }
 0x3fa   : > { %v2735_v15 = vmul.f32 %v5897_v14, %v5897_v14  ;;  %v2692_v59 = vadd.f32 %v2676_v49, %v2531_v39  ;;  %v2716_v27 = vsel %vm2708_vm1, %v5897_v14, 0.0  ;;  %v2749_v0 = vsel %vm2720_vm2, %v2737_v45, 0.0 }
 0x3fb   : > { %v2742_v36 = vadd.f32 %v2741_v58, %v2740_v32  ;;  %v2715_v9 = vadd.f32 %v2714_v8, %v2713_v19 }
 0x3fc   : > { %v5915_v33 = vadd.f32 %v4065_v7, %v2692_v59  ;;  %v2745_v5 = vsel %vm2708_vm1, %v2735_v15, 0.0 }
 0x3fd   : > { %v2717_v44 = vadd.f32 %v2716_v27, %v2715_v9  ;;  %v2744_v55 = vadd.f32 %v2743_v48, %v2742_v36 }
 0x3fe   : > { %v2718_v20 = vsel %vm2708_vm1, %v5915_v33, 0.0  ;;  %v2736_v18 = vmul.f32 %v5915_v33, %v5915_v33 }
 0x3ff   : > { %v2746_v62 = vadd.f32 %v2745_v5, %v2744_v55  ;;  %v2719_v43 = vadd.f32 %v2718_v20, %v2717_v44 }
 0x400   : > { %v2747_v2 = vsel %vm2708_vm1, %v2736_v18, 0.0 }
 0x401   : > { %v2722_v61 = vadd.f32 %v2721_v42, %v2719_v43  ;;  %v2748_v4 = vadd.f32 %v2747_v2, %v2746_v62 }
 0x403   : > { %v2723_v52 = vrot.slane %v2722_v61, 4  ;;  %v2750_v16 = vadd.f32 %v2749_v0, %v2748_v4 }
 0x405   : > { %v2724_v63 = vadd.f32 %v2723_v52, %v2722_v61  ;;  %v2751_v31 = vrot.slane %v2750_v16, 4 }
 0x407   : > { %v2725_v26 = vrot.slane %v2724_v63, 2  ;;  %v2752_v24 = vadd.f32 %v2751_v31, %v2750_v16 }
 0x409   : > { %v2726_v3 = vadd.f32 %v2725_v26, %v2724_v63  ;;  %v2753_v1 = vrot.slane %v2752_v24, 2 }
 0x40b   : > { %v2727_v7 = vrot.slane %v2726_v3, 1  ;;  %v2754_v12 = vadd.f32 %v2753_v1, %v2752_v24 }
 0x40d   : > { %v2728_v51 = vadd.f32 %v2727_v7, %v2726_v3  ;;  %v2755_v30 = vrot.slane %v2754_v12, 1 }
 0x40f   : > { %v2730_v10 = vmul.f32 0.018518519, %v2728_v51  ;;  %v2756_v22 = vadd.f32 %v2755_v30, %v2754_v12 }
 0x411   : > { %v2757_v11 = vmul.f32 54.0, %v2730_v10  ;;  %v2766_v38 = vsub.f32 %v5915_v33, %v2730_v10  ;;  %v2761_v29 = vsub.f32 %v5879_v41, %v2730_v10  ;;  %v2762_v50 = vsub.f32 %v5887_v21, %v2730_v10 }
 0x412   : > { %v2763_v56 = vsub.f32 %v5881_v37, %v2730_v10  ;;  %v2764_v57 = vsub.f32 %v5885_v40, %v2730_v10  ;;  %v2765_v6 = vsub.f32 %v5897_v14, %v2730_v10  ;;  %v2767_v39 = vsub.f32 %v5908_v17, %v2730_v10 }
 0x413   : > { %v2758_v53 = vmul.f32 %v2757_v11, %v2730_v10  ;;  %v2773_v25 = vmul.f32 %v2766_v38, %v2766_v38  ;;  %v2768_v35 = vmul.f32 %v2761_v29, %v2761_v29  ;;  %v2769_v34 = vmul.f32 %v2762_v50, %v2762_v50 }
 0x414   : > { %v2770_v60 = vmul.f32 %v2763_v56, %v2763_v56  ;;  %v2771_v58 = vmul.f32 %v2764_v57, %v2764_v57  ;;  %v2772_v19 = vmul.f32 %v2765_v6, %v2765_v6  ;;  %v2774_v32 = vmul.f32 %v2767_v39, %v2767_v39 }
 0x415   : > { %v2759_v23 = vsub.f32 %v2756_v22, %v2758_v53 }
 0x417   : > { %v2760_v54 = vmax.f32 %v2759_v23, 0.0 }
 0x419   : > { %v2775_v13 = vmul.f32 0.018867925, %v2760_v54 }
 0x41b   : > { %v2776_v47 = vadd.f32 0.0001, %v2775_v13 }
 0x41d   : > { %v2777_v46 = vmul.f32 4.0, %v2776_v47 }
 0x41f   : > { %4669 = vrcp.f32 %v2777_v46 }
 0x42c   : > { %v4670_v49 = vpop.eup %4669 }
 0x42d   : > { %v2784_v8 = vmul.f32 %v4670_v49, %v2773_v25  ;;  %v2779_v15 = vmul.f32 %v4670_v49, %v2768_v35  ;;  %v2780_v59 = vmul.f32 %v4670_v49, %v2769_v34  ;;  %v2781_v36 = vmul.f32 %v4670_v49, %v2770_v60 }
 0x42e   : > { %v2782_v9 = vmul.f32 %v4670_v49, %v2771_v58  ;;  %v2783_v48 = vmul.f32 %v4670_v49, %v2772_v19  ;;  %v2785_v27 = vmul.f32 %v4670_v49, %v2774_v32 }
 0x42f   : > { %v2791_v44 = vadd.f32 0.5, %v2784_v8  ;;  %v2786_v55 = vadd.f32 0.5, %v2779_v15  ;;  %v2787_v45 = vadd.f32 0.5, %v2780_v59  ;;  %v2788_v5 = vadd.f32 0.5, %v2781_v36 }
 0x430   : > { %v2789_v20 = vadd.f32 0.5, %v2782_v9  ;;  %v2790_v18 = vadd.f32 0.5, %v2783_v48  ;;  %v2792_v62 = vadd.f32 0.5, %v2785_v27 }
 0x431   : > { %v4071_v43 = vmul.f32 -1.442695, %v2791_v44  ;;  %v4066_v42 = vmul.f32 -1.442695, %v2786_v55  ;;  %v4067_v2 = vmul.f32 -1.442695, %v2787_v45 }
 0x432   : > { %v4068_v61 = vmul.f32 -1.442695, %v2788_v5  ;;  %v4069_v4 = vmul.f32 -1.442695, %v2789_v20  ;;  %v4070_v0 = vmul.f32 -1.442695, %v2790_v18 }
 0x433   : > { %4671 = vpow2.f32 %v4071_v43  ;;  %v4072_v52 = vmul.f32 -1.442695, %v2792_v62  ;;  %v4508_v18 = vld [vmem:[%s6059_s7 + $0x50] sm:$0xff]  }
 0x434   : > { %4673 = vpow2.f32 %v4066_v42  ;;  %v4509_v42 = vld [vmem:[%s6059_s7 + $0x48] sm:$0xff]  }
 0x435   : > { %4675 = vpow2.f32 %v4067_v2 }
 0x436   : > { %4677 = vpow2.f32 %v4068_v61 }
 0x437   : > { %4679 = vpow2.f32 %v4069_v4 }
 0x438   : > { %4681 = vpow2.f32 %v4070_v0 }
 0x439   : > { %4683 = vpow2.f32 %v4072_v52  ;;  %v4510_v52 = vld [vmem:[%s6059_s7 + $0x40] sm:$0xff]  }
 0x440   : > { %v4672_v16 = vpop.eup %4671 }
 0x441   : > { %v4674_v63 = vpop.eup %4673  ;;  %v2819_v31 = vadd.f32 1.0, %v4672_v16 }
 0x442   : > { %v4676_v26 = vpop.eup %4675  ;;  %v2814_v24 = vadd.f32 1.0, %v4674_v63 }
 0x443   : > { %v4678_v3 = vpop.eup %4677  ;;  %4685 = vrcp.f32 %v2819_v31  ;;  %v2815_v1 = vadd.f32 1.0, %v4676_v26 }
 0x444   : > { %v4680_v7 = vpop.eup %4679  ;;  %4687 = vrcp.f32 %v2814_v24  ;;  %v2816_v12 = vadd.f32 1.0, %v4678_v3  ;;  %v4513_v24 = vld [vmem:[#allocation2 + $0x74] ss:$8 sps:$4 sm:$0xff]  }
 0x445   : > { %v4682_v51 = vpop.eup %4681  ;;  %4689 = vrcp.f32 %v2815_v1  ;;  %v2817_v10 = vadd.f32 1.0, %v4680_v7  ;;  %v4516_v3 = vld [vmem:[#allocation2 + $0x174] ss:$8 sps:$4 sm:$0xff]   ;;  %v4511_v1 = vld [vmem:[#allocation2 + $0x70] ss:$8 sps:$4 sm:$0xff]   ;;  %3796 = vmatprep.subr.bf16.mxu1 %v4513_v24 }
 0x446   : > { %v4684_v30 = vpop.eup %4683  ;;  %4691 = vrcp.f32 %v2816_v12  ;;  %v2818_v11 = vadd.f32 1.0, %v4682_v51  ;;  %v4514_v7 = vld [vmem:[#allocation2 + $0x170] ss:$8 sps:$4 sm:$0xff]   ;;  %v4519_v12 = vld [vmem:[#allocation2 + $0x64] ss:$8 sps:$4 sm:$0xff]  }
 0x447   : > { %4693 = vrcp.f32 %v2817_v10  ;;  %v2820_v22 = vadd.f32 1.0, %v4684_v30  ;;  %v4517_v51 = vld [vmem:[#allocation2 + $0x60] ss:$8 sps:$4 sm:$0xff]   ;;  %v4522_v30 = vld [vmem:[#allocation2 + $0x164] ss:$8 sps:$4 sm:$0xff]  }
 0x448   : > { %4695 = vrcp.f32 %v2818_v11  ;;  %v4520_v10 = vld [vmem:[#allocation2 + $0x160] ss:$8 sps:$4 sm:$0xff]  }
 0x449   : > { %4697 = vrcp.f32 %v2820_v22  ;;  %v4525_v22 = vld [vmem:[#allocation2 + $0x54] ss:$8 sps:$4 sm:$0xff]  }
 0x450   : > { %v4686_v53 = vpop.eup %4685 }
 0x451   : > { %v4688_v23 = vpop.eup %4687  ;;  %v2840_v47 = vmul.f32 %v4686_v53, %v5915_v33  ;;  %v4528_v53 = vld [vmem:[#allocation2 + $0x154] ss:$8 sps:$4 sm:$0xff]  }
 0x452   : > { %v4690_v54 = vpop.eup %4689  ;;  %v2835_v13 = vmul.f32 %v4688_v23, %v5879_v41 }
 0x453   : > { %v4692_v46 = vpop.eup %4691  ;;  %v2836_v38 = vmul.f32 %v4690_v54, %v5887_v21  ;;  %v2847_v60 = vmax.f32 %v2840_v47, 0.0  ;;  %v4523_v54 = vld [vmem:[#allocation2 + $0x50] ss:$8 sps:$4 sm:$0xff]  }
 0x454   : > { %v4694_v29 = vpop.eup %4693  ;;  %v2842_v50 = vmax.f32 %v2835_v13, 0.0  ;;  %v2837_v56 = vmul.f32 %v4692_v46, %v5881_v37  ;;  %v4526_v13 = vld [vmem:[#allocation2 + $0x150] ss:$8 sps:$4 sm:$0xff]   ;;  %v4531_v46 = vld [vmem:[#allocation2 + $0x44] ss:$8 sps:$4 sm:$0xff]  }
 0x455   : > { %v4696_v57 = vpop.eup %4695  ;;  %v2843_v6 = vmax.f32 %v2836_v38, 0.0  ;;  %v2838_v39 = vmul.f32 %v4694_v29, %v5885_v40  ;;  %v4534_v38 = vld [vmem:[#allocation2 + $0x144] ss:$8 sps:$4 sm:$0xff]  }
 0x456   : > { %v4698_v25 = vpop.eup %4697  ;;  %v2844_v35 = vmax.f32 %v2837_v56, 0.0  ;;  %v2839_v34 = vmul.f32 %v4696_v57, %v5897_v14  ;;  %v4529_v56 = vld [vmem:[#allocation2 + $0x40] ss:$8 sps:$4 sm:$0xff]  }
 0x457   : > { %v2849_v49 = vpack.c.bf16 %v2843_v6, %v2842_v50  ;;  %v2845_v41 = vmax.f32 %v2838_v39, 0.0  ;;  %v2841_v33 = vmul.f32 %v4698_v25, %v5908_v17  ;;  %v4532_v57 = vld [vmem:[#allocation2 + $0x140] ss:$8 sps:$4 sm:$0xff]   ;;  %v4537_v6 = vld [vmem:[#allocation2 + $0x34] ss:$8 sps:$4 sm:$0xff]  }
 0x458   : > { %v2846_v58 = vmax.f32 %v2839_v34, 0.0  ;;  %v4540_v39 = vld [vmem:[#allocation2 + $0x134] ss:$8 sps:$4 sm:$0xff]  }
 0x459   : > { %4430 = vmatprep.mubr.msk.bf16.mxu1 %vm2708_vm1, %v2849_v49  ;;  %v2850_v21 = vpack.c.bf16 %v2845_v41, %v2844_v35  ;;  %v2873_v19 = vshll.u32 %v2849_v49, 16  ;;  %v2848_v32 = vmax.f32 %v2841_v33, 0.0  ;;  %v2871_v8 = vshrl.u32 %v2849_v49, 16  ;;  %v4538_v41 = vld [vmem:[#allocation2 + $0x130] ss:$8 sps:$4 sm:$0xff]  }
 0x45a   : > { %v2851_v37 = vpack.c.bf16 %v2847_v60, %v2846_v58  ;;  %v3110_v61 = vrot.slane %v2849_v49, 1  ;;  %v4535_v49 = vld [vmem:[#allocation2 + $0x30] ss:$8 sps:$4 sm:$0xff]   ;;  %v4543_v33 = vld [vmem:[#allocation2 + $0x24] ss:$8 sps:$4 sm:$0xff]  }
 0x45b   : > { %4431 = vmatmul.mubr.msk.bf16.vlgmr.msra.gmra.mxu1 %vm2708_vm1, %v2850_v21  ;;  %v2875_v40 = vrot.slane %v2873_v19, 1  ;;  %v2878_v15 = vshll.u32 %v2850_v21, 16  ;;  %v2852_v59 = vpack.c.bf16 %v2848_v32, %v2848_v32  ;;  %v2882_v48 = vshrl.u32 %v2850_v21, 16  ;;  %v4546_v58 = vld [vmem:[#allocation2 + $0x124] ss:$8 sps:$4 sm:$0xff]  }
 0x45c   : > { %4434 = vmatprep.mubr.msk.bf16.mxu1 %vm2708_vm1, %v2851_v37  ;;  %v2886_v14 = vshll.u32 %v2851_v37, 16  ;;  %v2890_v44 = vshrl.u32 %v2851_v37, 16  ;;  %v3111_v4 = vrot.slane %v2850_v21, 1  ;;  %v3113_v16 = vrot.slane %v2851_v37, 1  ;;  %3797 = vmatpush1.bf16.msra.mxu1 %v4511_v1  ;;  %v4541_v37 = vld [vmem:[#allocation2 + $0x20] ss:$8 sps:$4 sm:$0xff]  }
 0x45d   : > { %v2876_v36 = vor.u32 %v2875_v40, %v2871_v8  ;;  %v2880_v9 = vrot.slane %v2878_v15, 1  ;;  %v2894_v17 = vshll.u32 %v2852_v59, 16  ;;  %v2898_v2 = vshrl.u32 %v2852_v59, 16  ;;  %3798 = vmatprep.subr.bf16.mxu1 %v4519_v12  ;;  %v4544_v8 = vld [vmem:[#allocation2 + $0x120] ss:$8 sps:$4 sm:$0xff]  }
 0x45e   : > { %v2888_v27 = vrot.slane %v2886_v14, 1  ;;  %v3115_v63 = vrot.slane %v2852_v59, 1  ;;  %v3114_v31 = vsel %vm486_vm0, %v3111_v4, %v3113_v16  ;;  %v4549_v40 = vld [vmem:[#allocation2 + $0x14] ss:$8 sps:$4 sm:$0xff]  }
 0x45f   : > { %v2881_v55 = vsel %vm901_vm6, %v2876_v36, %v2880_v9  ;;  %v2884_v45 = vor.u32 %v2882_v48, %v2880_v9  ;;  %v2896_v20 = vrot.slane %v2894_v17, 1  ;;  %v4552_v15 = vld [vmem:[#allocation2 + $0x114] ss:$8 sps:$4 sm:$0xff]   ;;  %v4547_v36 = vld [vmem:[#allocation2 + $0x10] ss:$8 sps:$4 sm:$0xff]  }
 0x460   : > { %4414 = vmatprep.mubr.msk.bf16.mxu0 %vm2708_vm1, %v2881_v55  ;;  %v2892_v5 = vor.u32 %v2890_v44, %v2888_v27  ;;  %v3116_v26 = vsel %vm486_vm0, %v3113_v16, %v3115_v63  ;;  %3799 = vmatpush1.bf16.msra.mxu1 %v4517_v51  ;;  %v4550_v9 = vld [vmem:[#allocation2 + $0x110] ss:$8 sps:$4 sm:$0xff]   ;;  %v4555_v48 = vld [vmem:[#allocation2 + $0x4] ss:$8 sps:$4 sm:$0xff]   ;;  %v4553_v55 = vld [vmem:[#allocation2] ss:$8 sps:$4 sm:$0xff]  }
 0x461   : > { %v2889_v62 = vsel %vm901_vm6, %v2884_v45, %v2888_v27  ;;  %v2900_v0 = vor.u32 %v2898_v2, %v2896_v20  ;;  %3800 = vmatprep.subr.bf16.mxu1 %v4525_v22  ;;  %v4558_v17 = vld [vmem:[#allocation2 + $0x104] ss:$8 sps:$4 sm:$0xff]   ;;  %v4556_v45 = vld [vmem:[#allocation2 + $0x100] ss:$8 sps:$4 sm:$0xff]  }
 0x462   : > { %4415 = vmatmul.mubr.msk.bf16.vlgmr.msra.gmra.mxu0 %vm2708_vm1, %v2889_v62  ;;  %v2897_v43 = vsel %vm901_vm6, %v2892_v5, %v2896_v20  ;;  %v4561_v20 = vld [vmem:[#allocation2 + $0xf4] ss:$8 sps:$4 sm:$0xff]   ;;  %v4113_v16 = vld [vmem:[%s6060_s8] ss:$0 sm:$0xff]  ;;  %vm3377_vm6 = vcmask 1041408  }
 0x463   : > { %4439 = vmatpush3.bf16.msra.mxu0 %v5873_v28  ;;  %4418 = vmatprep.mubr.msk.bf16.mxu0 %vm2708_vm1, %v2897_v43  ;;  %v3112_v28 = vsel %vm486_vm0, %v3110_v61, %v3111_v4  ;;  %v4559_v61 = vld [vmem:[#allocation2 + $0xf0] ss:$8 sps:$4 sm:$0xff]   ;;  %v4565_v51 = vld [vmem:[#allocation2 + $0xe0] ss:$8 sps:$4 sm:$0xff]  }
 0x464   : > { %4435 = vmatmul.mubr.msk.bf16.gmra.mxu1 %vm2708_vm1, %v2852_v59  ;;  %4440 = vmatprep.subr.bf16.mxu0 %v4508_v18  ;;  %v4562_v4 = vld [vmem:[#allocation2 + $0x1f0] ss:$8 sps:$4 sm:$0xff]  }
 0x465   : > { %3801 = vmatpush1.bf16.msra.mxu1 %v4523_v54 }
 0x466   : > { %3802 = vmatprep.subr.bf16.mxu1 %v4531_v46 }
 0x467   : > { %4441 = vmatpush3.bf16.msra.mxu0 %v4508_v18  ;;  %v4564_v18 = vld [vmem:[#allocation2 + $0x1f4] ss:$8 sps:$4 sm:$0xff]  }
 0x468   : > { %4442 = vmatprep.subr.bf16.mxu0 %v4509_v42 }
 0x469   : > { %3803 = vmatpush1.bf16.msra.mxu1 %v4529_v56 }
 0x46a   : > { %4419 = vmatmul.mubr.msk.bf16.gmra.mxu0 %vm2708_vm1, %v2900_v0  ;;  %3804 = vmatprep.subr.bf16.mxu1 %v4537_v6 }
 0x46b   : > { %4443 = vmatpush3.bf16.msra.mxu0 %v4509_v42  ;;  %4446 = vmatprep.mubr.msk.bf16.mxu0 %vm2708_vm1, %v3112_v28 }
 0x46c   : > { %4444 = vmatprep.subr.bf16.mxu0 %v4510_v52 }
 0x46d   : > { %3805 = vmatpush1.bf16.msra.mxu1 %v4535_v49  ;;  %v4579_v49 = vld [vmem:[#allocation2 + $0xc4] ss:$8 sps:$4 sm:$0xff]  }
 0x46e   : > { %3806 = vmatprep.subr.bf16.mxu1 %v4543_v33 }
 0x46f   : > { %4445 = vmatpush3.bf16.msra.mxu0 %v4510_v52 }
 0x470   : > { %3837 = vmatprep.subr.bf16.mxu0 %v4516_v3 }
 0x471   : > { %3807 = vmatpush1.bf16.msra.mxu1 %v4541_v37 }
 0x472   : > { %4447 = vmatmul.mubr.msk.bf16.vlgmr.msra.gmra.mxu0 %vm2708_vm1, %v3114_v31  ;;  %3808 = vmatprep.subr.bf16.mxu1 %v4549_v40  ;;  %v4570_v31 = vld [vmem:[#allocation2 + $0x1e4] ss:$8 sps:$4 sm:$0xff]  }
 0x473   : > { %4450 = vmatprep.mubr.msk.bf16.mxu0 %vm2708_vm1, %v3116_v26  ;;  %3838 = vmatpush1.bf16.msra.mxu0 %v4514_v7 }
 0x474   : > { %3839 = vmatprep.subr.bf16.mxu0 %v4522_v30 }
 0x475   : > { %3809 = vmatpush1.bf16.msra.mxu1 %v4547_v36 }
 0x476   : > { %3810 = vmatprep.subr.bf16.mxu1 %v4555_v48  ;;  %v4585_v48 = vld [vmem:[#allocation2 + $0xb4] ss:$8 sps:$4 sm:$0xff]  }
 0x477   : > { %3840 = vmatpush1.bf16.msra.mxu0 %v4520_v10  ;;  %v4568_v10 = vld [vmem:[#allocation2 + $0x1e0] ss:$8 sps:$4 sm:$0xff]  }
 0x478   : > { %3841 = vmatprep.subr.bf16.mxu0 %v4528_v53  ;;  %v4573_v53 = vld [vmem:[#allocation2 + $0xd4] ss:$8 sps:$4 sm:$0xff]  }
 0x479   : > { %3811 = vmatpush1.bf16.msra.mxu1 %v4553_v55 }
 0x47a   : > { %4451 = vmatmul.mubr.msk.bf16.gmra.mxu0 %vm2708_vm1, %v3115_v63  ;;  %3812 = vmatprep.subr.bf16.mxu1 %v4561_v20  ;;  %v4567_v63 = vld [vmem:[#allocation2 + $0xe4] ss:$8 sps:$4 sm:$0xff]   ;;  %v4583_v20 = vld [vmem:[#allocation2 + $0xb0] ss:$8 sps:$4 sm:$0xff]  }
 0x47b   : > { %3842 = vmatpush1.bf16.msra.mxu0 %v4526_v13 }
 0x47c   : > { %3843 = vmatprep.subr.bf16.mxu0 %v4534_v38 }
 0x47d   : > { %3813 = vmatpush2.bf16.msra.mxu1 %v4559_v61 }
 0x47e   : > { %3814 = vmatprep.subr.bf16.mxu1 %v4567_v63 }
 0x47f   : > { %3844 = vmatpush1.bf16.msra.mxu0 %v4532_v57 }
 0x480   : > { %3845 = vmatprep.subr.bf16.mxu0 %v4540_v39  ;;  %v4571_v39 = vld [vmem:[#allocation2 + $0xd0] ss:$8 sps:$4 sm:$0xff]  }
 0x481   : > { %3815 = vmatpush2.bf16.msra.mxu1 %v4565_v51 }
 0x482   : > { %3816 = vmatprep.subr.bf16.mxu1 %v4573_v53  ;;  %v4606_v53 = vld [vmem:[#allocation2 + $0x184] ss:$8 sps:$4 sm:$0xff]  }
 0x483   : > { %3846 = vmatpush1.bf16.msra.mxu0 %v4538_v41  ;;  %v4582_v41 = vld [vmem:[#allocation2 + $0x1c4] ss:$8 sps:$4 sm:$0xff]  }
 0x484   : > { %3847 = vmatprep.subr.bf16.mxu0 %v4546_v58 }
 0x485   : > { %3817 = vmatpush2.bf16.msra.mxu1 %v4571_v39 }
 0x486   : > { %3818 = vmatprep.subr.bf16.mxu1 %v4579_v49 }
 0x487   : > { %3848 = vmatpush1.bf16.msra.mxu0 %v4544_v8 }
 0x488   : > { %3849 = vmatprep.subr.bf16.mxu0 %v4552_v15  ;;  %v4577_v15 = vld [vmem:[#allocation2 + $0xc0] ss:$8 sps:$4 sm:$0xff]  }
 0x489   : > { %3819 = vmatpush2.bf16.msra.mxu1 %v4577_v15 }
 0x48a   : > { %3820 = vmatprep.subr.bf16.mxu1 %v4585_v48 }
 0x48b   : > { %3850 = vmatpush1.bf16.msra.mxu0 %v4550_v9 }
 0x48c   : > { %3851 = vmatprep.subr.bf16.mxu0 %v4558_v17  ;;  %v4588_v17 = vld [vmem:[#allocation2 + $0x1b4] ss:$8 sps:$4 sm:$0xff]  }
 0x48d   : > { %3821 = vmatpush2.bf16.msra.mxu1 %v4583_v20 }
 0x48f   : > { %3852 = vmatpush1.bf16.msra.mxu0 %v4556_v45 }
 0x490   : > { %3853 = vmatprep.subr.bf16.mxu0 %v4564_v18  ;;  %v4586_v18 = vld [vmem:[#allocation2 + $0x1b0] ss:$8 sps:$4 sm:$0xff]  }
 0x493   : > { %3854 = vmatpush2.bf16.msra.mxu0 %v4562_v4 }
 0x494   : > { %3855 = vmatprep.subr.bf16.mxu0 %v4570_v31  ;;  %v4597_v31 = vld [vmem:[#allocation2 + $0x94] ss:$8 sps:$4 sm:$0xff]  }
 0x497   : > { %3856 = vmatpush2.bf16.msra.mxu0 %v4568_v10 }
 0x51b   : > { %v5968_v11 = vpop.f32.mrf.mxu1 }
 0x51d   : > { %v3067_v23 = vpop.f32.mrf.mxu1 }
 0x51f   : > { %v5970_v47 = vpop.f32.mrf.mxu1 }
 0x521   : > { %v5972_v29 = vpop.f32.mrf.mxu1 }
 0x522   : > { %v4416_v50 = vpop.f32.mrf.mxu0 }
 0x523   : > { %v3076_v43 = vadd.f32 %v5968_v11, %v4416_v50 }
 0x524   : > { %v5974_v25 = vpop.f32.mrf.mxu1  ;;  %v2971_v35 = vpop.f32.mrf.mxu0 }
 0x525   : > { %v3068_v5 = vadd.f32 %v3067_v23, %v2971_v35  ;;  %v4576_v23 = vld [vmem:[#allocation2 + $0x1d4] ss:$8 sps:$4 sm:$0xff]  }
 0x526   : > { %v5976_v34 = vpop.f32.mrf.mxu1  ;;  %v4417_v60 = vpop.f32.mrf.mxu0  ;;  %3857 = vmatprep.subr.bf16.mxu0 %v4576_v23 }
 0x527   : > { %v3079_v0 = vadd.f32 %v5970_v47, %v4417_v60 }
 0x528   : > { %v4437_v21 = vpop.f32.mrf.mxu1  ;;  %v2974_v19 = vpop.f32.mrf.mxu0 }
 0x529   : > { %v3071_v52 = vadd.f32 %v5972_v29, %v2974_v19 }
 0x52a   : > { %v4420_v32 = vpop.f32.mrf.mxu0  ;;  %v3086_v46 = vpop.f32.mrf.mxu1 }
 0x52b   : > { %v3092_v7 = vadd.f32 %v5974_v25, %v4420_v32  ;;  %v4574_v25 = vld [vmem:[#allocation2 + $0x1d0] ss:$8 sps:$4 sm:$0xff]  }
 0x52c   : > { %v2987_v59 = vpop.f32.mrf.mxu0  ;;  %3858 = vmatpush2.bf16.msra.mxu0 %v4574_v25 }
 0x52d   : > { %v3084_v30 = vadd.f32 %v5976_v34, %v2987_v59  ;;  %v4580_v59 = vld [vmem:[#allocation2 + $0x1c0] ss:$8 sps:$4 sm:$0xff]   ;;  %3859 = vmatprep.subr.bf16.mxu0 %v4582_v41 }
 0x52e   : > { %v4421_v14 = vpop.f32.mrf.mxu0 }
 0x530   : > { %v2990_v27 = vpop.f32.mrf.mxu0  ;;  %3860 = vmatpush2.bf16.msra.mxu0 %v4580_v59 }
 0x531   : > { %v3087_v57 = vadd.f32 %v3086_v46, %v2990_v27  ;;  %3861 = vmatprep.subr.bf16.mxu0 %v4588_v17 }
 0x532   : > { %v4448_v44 = vpop.f32.mrf.mxu0 }
 0x533   : > { %v3219_v28 = vadd.f32 %v4448_v44, %v3076_v43 }
 0x534   : > { %v3187_v62 = vpop.f32.mrf.mxu0  ;;  %3862 = vmatpush2.bf16.msra.mxu0 %v4586_v18 }
 0x535   : > { %v3217_v42 = vadd.f32 %v3187_v62, %v3068_v5  ;;  %v5988_v11 = vadd.f32 %v4113_v16, %v3219_v28  ;;  %v4592_v28 = vld [vmem:[#allocation2 + $0x1a0] ss:$8 sps:$4 sm:$0xff]  }
 0x536   : > { %v4449_v2 = vpop.f32.mrf.mxu0 }
 0x537   : > { %v5984_v26 = vadd.f32 %v4113_v16, %v3217_v42  ;;  %v3220_v3 = vadd.f32 %v4449_v2, %v3079_v0  ;;  %v3256_v35 = vmul.f32 %v5988_v11, %v5988_v11  ;;  %v4591_v42 = vld [vmem:[#allocation2 + $0xa4] ss:$8 sps:$4 sm:$0xff]  }
 0x538   : > { %v3190_v24 = vpop.f32.mrf.mxu0  ;;  %v4594_v2 = vld [vmem:[#allocation2 + $0x1a4] ss:$8 sps:$4 sm:$0xff]   ;;  %3822 = vmatprep.subr.bf16.mxu1 %v4591_v42 }
 0x539   : > { %v3218_v1 = vadd.f32 %v3190_v24, %v3071_v52  ;;  %v3254_v54 = vmul.f32 %v5984_v26, %v5984_v26  ;;  %v5994_v38 = vadd.f32 %v4113_v16, %v3220_v3  ;;  %v4589_v52 = vld [vmem:[#allocation2 + $0xa0] ss:$8 sps:$4 sm:$0xff]   ;;  %3863 = vmatprep.subr.bf16.mxu0 %v4594_v2  ;;  %v4600_v24 = vld [vmem:[#allocation2 + $0x194] ss:$8 sps:$4 sm:$0xff]  }
 0x53a   : > { %v4452_v12 = vpop.f32.mrf.mxu0  ;;  %3823 = vmatpush2.bf16.msra.mxu1 %v4589_v52  ;;  %3864 = vmatpush2.bf16.msra.mxu0 %v4592_v28 }
 0x53b   : > { %v5990_v22 = vadd.f32 %v4113_v16, %v3218_v1  ;;  %v3223_v13 = vadd.f32 %v4452_v12, %v3092_v7  ;;  %v3257_v19 = vmul.f32 %v5994_v38, %v5994_v38  ;;  %v4595_v7 = vld [vmem:[#allocation2 + $0x90] ss:$8 sps:$4 sm:$0xff]   ;;  %3824 = vmatprep.subr.bf16.mxu1 %v4597_v31  ;;  %3865 = vmatprep.subr.bf16.mxu0 %v4600_v24 }
 0x53c   : > { %v3203_v47 = vpop.f32.mrf.mxu0  ;;  %v4598_v12 = vld [vmem:[#allocation2 + $0x190] ss:$8 sps:$4 sm:$0xff]  }
 0x53d   : > { %v3238_v29 = vadd.f32 %v5990_v22, %v5984_v26  ;;  %v3255_v50 = vmul.f32 %v5990_v22, %v5990_v22  ;;  %v3221_v56 = vadd.f32 %v3203_v47, %v3084_v30  ;;  %v6003_v33 = vadd.f32 %v4113_v16, %v3223_v13  ;;  %v4603_v30 = vld [vmem:[#allocation2 + $0x84] ss:$8 sps:$4 sm:$0xff]   ;;  %v4601_v13 = vld [vmem:[#allocation2 + $0x80] ss:$8 sps:$4 sm:$0xff]  }
 0x53e   : > { %v4453_v6 = vpop.f32.mrf.mxu0  ;;  %3825 = vmatpush2.bf16.msra.mxu1 %v4595_v7  ;;  %3866 = vmatpush2.bf16.msra.mxu0 %v4598_v12  ;;  %v4604_v47 = vld [vmem:[#allocation2 + $0x180] ss:$8 sps:$4 sm:$0xff]  }
 0x53f   : > { %v3239_v34 = vadd.f32 %v3238_v29, %v5988_v11  ;;  %v3261_v60 = vadd.f32 %v3255_v50, %v3254_v54  ;;  %v6005_v58 = vadd.f32 %v4113_v16, %v3221_v56  ;;  %v3260_v27 = vmul.f32 %v6003_v33, %v6003_v33  ;;  %3826 = vmatprep.subr.bf16.mxu1 %v4603_v30 }
 0x540   : > { %v3206_v21 = vpop.f32.mrf.mxu0  ;;  %v3244_v5 = vsel %vm3243_vm3, %v6003_v33, 0.0  ;;  %3867 = vmatprep.subr.bf16.mxu0 %v4606_v53 }
 0x541   : > { %v3262_v32 = vadd.f32 %v3261_v60, %v3256_v35  ;;  %v3240_v37 = vadd.f32 %v3239_v34, %v5994_v38  ;;  %v3222_v8 = vadd.f32 %v3206_v21, %v3087_v57  ;;  %v3258_v40 = vmul.f32 %v6005_v58, %v6005_v58 }
 0x542   : > { %v3266_v61 = vsel %vm3243_vm3, %v3260_v27, 0.0  ;;  %3827 = vmatpush2.bf16.msra.mxu1 %v4601_v13  ;;  %3868 = vmatpush2.bf16.msra.mxu0 %v4604_v47 }
 0x543   : > { %v3241_v14 = vadd.f32 %v3240_v37, %v6005_v58  ;;  %v3263_v36 = vadd.f32 %v3262_v32, %v3257_v19  ;;  %v6013_v9 = vadd.f32 %v4113_v16, %v3222_v8 }
 0x545   : > { %v3264_v44 = vadd.f32 %v3263_v36, %v3258_v40  ;;  %v3242_v55 = vadd.f32 %v3241_v14, %v6013_v9  ;;  %v3259_v45 = vmul.f32 %v6013_v9, %v6013_v9 }
 0x547   : > { %v3245_v62 = vadd.f32 %v3244_v5, %v3242_v55  ;;  %v3265_v43 = vadd.f32 %v3264_v44, %v3259_v45 }
 0x549   : > { %v3246_v4 = vrot.slane %v3245_v62, 4  ;;  %v3267_v0 = vadd.f32 %v3266_v61, %v3265_v43 }
 0x54b   : > { %v3247_v16 = vadd.f32 %v3246_v4, %v3245_v62  ;;  %v3268_v63 = vrot.slane %v3267_v0, 4 }
 0x54d   : > { %v3248_v3 = vrot.slane %v3247_v16, 2  ;;  %v3269_v1 = vadd.f32 %v3268_v63, %v3267_v0 }
 0x54f   : > { %v3249_v51 = vadd.f32 %v3248_v3, %v3247_v16  ;;  %v3270_v10 = vrot.slane %v3269_v1, 2 }
 0x551   : > { %v3250_v23 = vrot.slane %v3249_v51, 1  ;;  %v3271_v54 = vadd.f32 %v3270_v10, %v3269_v1 }
 0x553   : > { %v3251_v46 = vadd.f32 %v3250_v23, %v3249_v51  ;;  %v3272_v50 = vrot.slane %v3271_v54, 1 }
 0x555   : > { %v3253_v29 = vmul.f32 0.01923077, %v3251_v46  ;;  %v3273_v57 = vadd.f32 %v3272_v50, %v3271_v54 }
 0x557   : > { %v3274_v56 = vmul.f32 52.0, %v3253_v29  ;;  %v3283_v49 = vsub.f32 %v6013_v9, %v3253_v29  ;;  %v3279_v41 = vsub.f32 %v5990_v22, %v3253_v29  ;;  %v3280_v21 = vsub.f32 %v5988_v11, %v3253_v29 }
 0x558   : > { %v3281_v19 = vsub.f32 %v5994_v38, %v3253_v29  ;;  %v3282_v32 = vsub.f32 %v6005_v58, %v3253_v29  ;;  %v3284_v37 = vsub.f32 %v6003_v33, %v3253_v29  ;;  %v3278_v8 = vsub.f32 %v5984_v26, %v3253_v29 }
 0x559   : > { %v3275_v6 = vmul.f32 %v3274_v56, %v3253_v29  ;;  %v3290_v40 = vmul.f32 %v3283_v49, %v3283_v49  ;;  %v3286_v15 = vmul.f32 %v3279_v41, %v3279_v41  ;;  %v3287_v59 = vmul.f32 %v3280_v21, %v3280_v21 }
 0x55a   : > { %v3288_v14 = vmul.f32 %v3281_v19, %v3281_v19  ;;  %v3289_v48 = vmul.f32 %v3282_v32, %v3282_v32  ;;  %v3291_v17 = vmul.f32 %v3284_v37, %v3284_v37  ;;  %v3285_v27 = vmul.f32 %v3278_v8, %v3278_v8 }
 0x55b   : > { %v3276_v39 = vsub.f32 %v3273_v57, %v3275_v6 }
 0x55d   : > { %v3277_v25 = vmax.f32 %v3276_v39, 0.0 }
 0x55f   : > { %v3292_v35 = vmul.f32 0.019607844, %v3277_v25 }
 0x561   : > { %v3293_v34 = vadd.f32 0.0001, %v3292_v35 }
 0x563   : > { %v3294_v60 = vmul.f32 4.0, %v3293_v34 }
 0x565   : > { %4699 = vrcp.f32 %v3294_v60 }
 0x572   : > { %v4700_v36 = vpop.eup %4699 }
 0x573   : > { %v3301_v44 = vmul.f32 %v4700_v36, %v3290_v40  ;;  %v3297_v55 = vmul.f32 %v4700_v36, %v3286_v15  ;;  %v3298_v45 = vmul.f32 %v4700_v36, %v3287_v59  ;;  %v3299_v5 = vmul.f32 %v4700_v36, %v3288_v14 }
 0x574   : > { %v3300_v20 = vmul.f32 %v4700_v36, %v3289_v48  ;;  %v3302_v18 = vmul.f32 %v4700_v36, %v3291_v17  ;;  %v3296_v62 = vmul.f32 %v4700_v36, %v3285_v27 }
 0x575   : > { %v3308_v43 = vadd.f32 0.5, %v3301_v44  ;;  %v3304_v42 = vadd.f32 0.5, %v3297_v55  ;;  %v3305_v2 = vadd.f32 0.5, %v3298_v45  ;;  %v3306_v61 = vadd.f32 0.5, %v3299_v5 }
 0x576   : > { %v3307_v4 = vadd.f32 0.5, %v3300_v20  ;;  %v3309_v0 = vadd.f32 0.5, %v3302_v18  ;;  %v3303_v52 = vadd.f32 0.5, %v3296_v62 }
 0x577   : > { %v4119_v28 = vmul.f32 -1.442695, %v3308_v43  ;;  %v4115_v16 = vmul.f32 -1.442695, %v3304_v42  ;;  %v4116_v63 = vmul.f32 -1.442695, %v3305_v2 }
 0x578   : > { %v4117_v31 = vmul.f32 -1.442695, %v3306_v61  ;;  %v4118_v24 = vmul.f32 -1.442695, %v3307_v4  ;;  %v4120_v3 = vmul.f32 -1.442695, %v3309_v0 }
 0x579   : > { %4701 = vpow2.f32 %v4119_v28  ;;  %v4114_v1 = vmul.f32 -1.442695, %v3303_v52 }
 0x57a   : > { %4703 = vpow2.f32 %v4115_v16 }
 0x57b   : > { %4705 = vpow2.f32 %v4116_v63 }
 0x57c   : > { %4707 = vpow2.f32 %v4117_v31 }
 0x57d   : > { %4709 = vpow2.f32 %v4118_v24 }
 0x57e   : > { %4711 = vpow2.f32 %v4120_v3 }
 0x57f   : > { %4713 = vpow2.f32 %v4114_v1 }
 0x586   : > { %v4702_v7 = vpop.eup %4701 }
 0x587   : > { %v4704_v12 = vpop.eup %4703  ;;  %v3336_v51 = vadd.f32 1.0, %v4702_v7 }
 0x588   : > { %v4706_v10 = vpop.eup %4705  ;;  %v3332_v30 = vadd.f32 1.0, %v4704_v12 }
 0x589   : > { %v4708_v53 = vpop.eup %4707  ;;  %4715 = vrcp.f32 %v3336_v51  ;;  %v3333_v23 = vadd.f32 1.0, %v4706_v10 }
 0x58a   : > { %v4710_v54 = vpop.eup %4709  ;;  %v3334_v13 = vadd.f32 1.0, %v4708_v53  ;;  %4717 = vrcp.f32 %v3332_v30 }
 0x58b   : > { %v4712_v47 = vpop.eup %4711  ;;  %4719 = vrcp.f32 %v3333_v23  ;;  %v3335_v46 = vadd.f32 1.0, %v4710_v54 }
 0x58c   : > { %v4714_v29 = vpop.eup %4713  ;;  %4721 = vrcp.f32 %v3334_v13  ;;  %v3337_v50 = vadd.f32 1.0, %v4712_v47 }
 0x58d   : > { %4723 = vrcp.f32 %v3335_v46  ;;  %v3331_v56 = vadd.f32 1.0, %v4714_v29 }
 0x58e   : > { %4725 = vrcp.f32 %v3337_v50  ;;  %v4776_v50 = vmov 1966171168  }
 0x58f   : > { %4727 = vrcp.f32 %v3331_v56  ;;  %v3882_v56 = vunpack.c.l.s4 %v4776_v50 }
 0x596   : > { %v4716_v57 = vpop.eup %4715 }
 0x597   : > { %v4718_v6 = vpop.eup %4717  ;;  %v3357_v25 = vmul.f32 %v4716_v57, %v6013_v9 }
 0x598   : > { %v4720_v39 = vpop.eup %4719  ;;  %v3353_v35 = vmul.f32 %v4718_v6, %v5990_v22  ;;  %v3883_v6 = vunpack.c.0.s8 %v3882_v56 }
 0x599   : > { %v4722_v34 = vpop.eup %4721  ;;  %v3354_v60 = vmul.f32 %v4720_v39, %v5988_v11  ;;  %v3364_v40 = vmax.f32 %v3357_v25, 0.0 }
 0x59a   : > { %v4724_v49 = vpop.eup %4723  ;;  %v3355_v41 = vmul.f32 %v4722_v34, %v5994_v38  ;;  %v3360_v21 = vmax.f32 %v3353_v35, 0.0 }
 0x59b   : > { %v4726_v19 = vpop.eup %4725  ;;  %v3361_v32 = vmax.f32 %v3354_v60, 0.0  ;;  %v3356_v37 = vmul.f32 %v4724_v49, %v6005_v58 }
 0x59c   : > { %v4728_v8 = vpop.eup %4727  ;;  %v3362_v9 = vmax.f32 %v3355_v41, 0.0  ;;  %v3376_v15 = vsel %vm3375_vm4, %v3360_v21, -inf  ;;  %v3358_v22 = vmul.f32 %v4726_v19, %v6003_v33  ;;  %v3367_v36 = vsel %vm3366_vm5, %v3360_v21, -inf  ;;  %v6116_v41 = vld [vmem:[#allocation5_spill] sm:$0xff] }
 0x59d   : > { %v3379_v59 = vmax.f32 %v3376_v15, %v3361_v32  ;;  %v3363_v11 = vmax.f32 %v3356_v37, 0.0  ;;  %v3352_v14 = vmul.f32 %v4728_v8, %v5984_v26  ;;  %v3886_v21 = vsub.s32 %v3883_v6, %v6116_v41 }
 0x59e   : > { %v3378_v38 = vsel %vm3377_vm6, %v3362_v9, -inf  ;;  %v3388_v48 = vsel %vm3387_vm7, %v3362_v9, -inf  ;;  %v3365_v17 = vmax.f32 %v3358_v22, 0.0  ;;  %v3411_v9 = vld [vmem:[%s6062_s10] sm:$0x3] }
 0x59f   : > { %v3380_v27 = vmax.f32 %v3379_v59, %v3378_v38  ;;  %v3389_v44 = vsel %vm486_vm0, %v3363_v11, -inf  ;;  %v3397_v55 = vsel %vm2265_vm14, %v3363_v11, -inf  ;;  %v3359_v58 = vmax.f32 %v3352_v14, 0.0 }
 0x5a0   : > { %v3399_v45 = vmax.f32 %v3397_v55, %v3364_v40  ;;  %v3390_v5 = vmax.f32 %v3388_v48, %v3389_v44  ;;  %v3398_v18 = vsel %vm3243_vm3, %v3365_v17, -inf  ;;  %v6117_v59 = vlaneseq }
 0x5a1   : > { %v3381_v20 = vrot.slane %v3380_v27, 4  ;;  %v3368_v33 = vmax.f32 %v3359_v58, %v3367_v36 }
 0x5a2   : > { %v3400_v62 = vmax.f32 %v3399_v45, %v3398_v18  ;;  %v3391_v43 = vrot.slane %v3390_v5, 4  ;;  %vm3900_vm0 = vcmp.lt.s32.totalorder %v6117_v59, 256 }
 0x5a3   : > { %v3382_v42 = vmax.f32 %v3380_v27, %v3381_v20  ;;  %v3369_v26 = vrot.slane %v3368_v33, 4 }
 0x5a4   : > { %v3401_v2 = vrot.slane %v3400_v62, 4  ;;  %v3392_v61 = vmax.f32 %v3390_v5, %v3391_v43 }
 0x5a5   : > { %v3383_v4 = vrot.slane %v3382_v42, 2  ;;  %v3370_v0 = vmax.f32 %v3368_v33, %v3369_v26 }
 0x5a6   : > { %v3402_v52 = vmax.f32 %v3400_v62, %v3401_v2  ;;  %v3393_v28 = vrot.slane %v3392_v61, 2 }
 0x5a7   : > { %v3384_v16 = vmax.f32 %v3382_v42, %v3383_v4  ;;  %v3371_v63 = vrot.slane %v3370_v0, 2 }
 0x5a8   : > { %v3403_v31 = vrot.slane %v3402_v52, 2  ;;  %v3394_v24 = vmax.f32 %v3392_v61, %v3393_v28 }
 0x5a9   : > { %v3385_v3 = vrot.slane %v3384_v16, 1  ;;  %v3372_v1 = vmax.f32 %v3370_v0, %v3371_v63 }
 0x5aa   : > { %v3404_v7 = vmax.f32 %v3402_v52, %v3403_v31  ;;  %v3395_v12 = vrot.slane %v3394_v24, 1 }
 0x5ab   : > { %v3386_v51 = vmax.f32 %v3384_v16, %v3385_v3  ;;  %v3373_v10 = vrot.slane %v3372_v1, 1 }
 0x5ac   : > { %v3405_v30 = vrot.slane %v3404_v7, 1  ;;  %v3396_v54 = vmax.f32 %v3394_v24, %v3395_v12 }
 0x5ad   : > { %v3408_v53 = vpack.c.bf16 %v3386_v51, %v3386_v51  ;;  %v3374_v23 = vmax.f32 %v3372_v1, %v3373_v10 }
 0x5ae   : > { %v3406_v13 = vmax.f32 %v3404_v7, %v3405_v30  ;;  %v3409_v29 = vpack.c.bf16 %v3396_v54, %v3396_v54 }
 0x5af   : > { %3828 = vmatprep.mubr.bf16.mxu1 %v3408_v53  ;;  %v3407_v47 = vpack.c.bf16 %v3374_v23, %v3374_v23 }
 0x5b0   : > { %v3410_v46 = vpack.c.bf16 %v3406_v13, %v3406_v13 }
 0x5b1   : > { %3829 = vmatmul.mubr.bf16.vlgmr.msra.gmra.mxu1 %v3407_v47 }
 0x5b2   : > { %3869 = vmatprep.mubr.bf16.mxu0 %v3410_v46 }
 0x5b3   : > { %3870 = vmatmul.mubr.bf16.vlgmr.msra.gmra.mxu0 %v3409_v29 }
 0x671   : > { %v3830_v57 = vpop.f32.mrf.mxu1 }
 0x673   : > { %v3871_v39 = vpop.f32.mrf.mxu0  ;;  %v3832_v25 = vpop.f32.mrf.mxu1 }
 0x674   : > { %v3872_v60 = vadd.f32 %v3871_v39, %v3830_v57 }
 0x675   : > { %v3873_v35 = vpop.f32.mrf.mxu0  ;;  %v3834_v34 = vpop.f32.mrf.mxu1 }
 0x676   : > { %v3874_v49 = vadd.f32 %v3873_v35, %v3832_v25 }
 0x677   : > { %v3875_v19 = vpop.f32.mrf.mxu0  ;;  %v3835_v32 = vpop.f32.mrf.mxu1 }
 0x678   : > { %v3880_v37 = vcombine.low %v3872_v60, %v3874_v49 }
 0x679   : > { %v3876_v8 = vpop.f32.mrf.mxu0 }
 0x67a   : > { %v3887_v40 = vrot.slane %v3880_v37, %v3886_v21 }
 0x67c   : > { %v3894_v15 = vrot.slane %v3887_v40, %v3886_v21 }
 0x67e   : > { %v3896_v22 = vadd.f32 %v3894_v15, %v3411_v9 }
 0x680   : > { %v3897_v11 = vmax.f32 %v3896_v22, 0.0 }
 0x682   : > { %3902 = vst.msk [vmem:[%s399_s24] sm:$0x3] %vm3900_vm0, %v3897_v11 }
 0x683 PF: > { %s22_s17 = sadd.s32 1, %s4767_s17  }
 0x684   : > { %p19_p1 = scmp.ge.s32.totalorder %s22_s17, 4  }
 0x686   :  { %21 = sbr.rel (!%p19_p1) target bundleno = 1 (0x1), region = 105 }
 0x68b   :  { %3922 = vsyncpa [#allocation3], 1 }
 0x68c   :  { %3924 = vsyncpa [#allocation3 + $0x1], 1 }

</bundles_post_ra>
